<compile_context>
chip_gen: v6e
topology: v6e:2x2x1
jax: 0.10.0
libtpu: 0.0.40
codegen_flags: <defaults>
</compile_context>

<pallas_src>
import functools

import numpy as np
import jax
import jax.numpy as jnp
from jax import lax
from jax.experimental import pallas as pl
from jax.experimental.pallas import tpu as pltpu


# ----------------------------- in-kernel helpers ---------------------------- #

def _roll_rows(x, shift):
    """Circular roll along axis 0 (sublane axis) via static slices + concat."""
    p = x.shape[0]
    shift = shift % p
    if shift == 0:
        return x
    return jnp.concatenate([x[p - shift:], x[:p - shift]], axis=0)


def _shifted_plane(act, col_idx, a, q, H, W):
    """Flattened version of roll2d(plane, (a, q)) in flat (H*W, C) layout.

    Returns y with y[i*W + j, :] = act[((i - a) % H) * W + ((j - q) % W), :].
    A flat roll by a*W + q is correct for columns j >= q; columns j < q wrap
    within the row, which a second flat roll (shifted by W less) provides; a
    static column mask selects between the two.  Only sublane-axis movement.
    """
    P = H * W
    r_hi = _roll_rows(act, (a * W + q) % P)
    if q == 0:
        return r_hi
    r_lo = _roll_rows(act, (a * W + q - W) % P)
    return jnp.where(col_idx >= q, r_hi, r_lo)


def _ccl_block(act, wm, bias, H, W, kh, kw, sh, sw, relu):
    """One CCL layer on one example.  act: (H*W, c_in) f32.

    Returns (new_act, Hs, Ws) with new_act of shape (Hs*Ws, c_out).
    """
    # static per-row column index (built without vector div/mod)
    col_idx = None
    if kw > 1:
        col = lax.broadcasted_iota(jnp.int32, (W, 1), 0)
        col_idx = jnp.concatenate([col] * H, axis=0) if H > 1 else col

    # rolled stack: (H*W, kh*kw*c_in); tap order (a, q) outer, channel inner
    taps = [_shifted_plane(act, col_idx, a, q, H, W)
            for a in range(kh) for q in range(kw)]
    xr = taps[0] if len(taps) == 1 else jnp.concatenate(taps, axis=-1)

    # one MXU contraction per layer + bias (+ fused relu)
    h = jnp.dot(xr, wm, preferred_element_type=jnp.float32) + bias
    if relu:
        h = jnp.maximum(h, 0.0)

    # strided spatial subsampling directly in the flat layout (static slices)
    if sh == 1 and sw == 1:
        return h, H, W
    hs = len(range(0, H, sh))
    ws = len(range(0, W, sw))
    if sw == 1:
        rows = [h[i * W:i * W + W] for i in range(0, H, sh)]
    else:
        rows = [h[i * W + j:i * W + j + 1]
                for i in range(0, H, sh) for j in range(0, W, sw)]
    return jnp.concatenate(rows, axis=0), hs, ws


def _net_kernel(*refs, meta, hw0):
    """Fused Net_ours forward for one batch element.

    refs = (x_ref, wm_1..wm_L, bias_1..bias_L, out_ref)
      x_ref : (1, H0*W0, c_in0)  VMEM block (this batch element)
      wm_l  : (kh*kw*c_in, c_out) VMEM (whole array, resident across steps)
      bias_l: (1, c_out)          VMEM
      o_ref : (1, 1, n_classes)   VMEM block
    """
    n = len(meta)
    x_ref = refs[0]
    wm_refs = refs[1:1 + n]
    b_refs = refs[1 + n:1 + 2 * n]
    o_ref = refs[1 + 2 * n]

    act = x_ref[0].astype(jnp.float32)            # (H0*W0, c_in0)
    H, W = hw0
    for l, (kh, kw, sh, sw) in enumerate(meta):
        act, H, W = _ccl_block(act, wm_refs[l][...], b_refs[l][...],
                               H, W, kh, kw, sh, sw, relu=(l < n - 1))

    # fused head: spatial mean + log_softmax (VPU/EUP epilogue)
    m = jnp.mean(act, axis=0, keepdims=True)                      # (1, n_cls)
    z = m - jnp.max(m, axis=1, keepdims=True)
    lse = jnp.log(jnp.sum(jnp.exp(z), axis=1, keepdims=True))
    o_ref[0] = (z - lse).astype(o_ref.dtype)


# ------------------------------- model wrapper ------------------------------ #

def net_ours_forward(x, params):
    """Forward pass of Net_ours: x (B, c_in, H, W) -> log-probs (B, n_classes)."""
    B, c_in0, H0, W0 = x.shape
    # NCHW -> flat spatial-major (B, H*W, C): one-time input layout glue
    xf = jnp.transpose(x.astype(jnp.float32), (0, 2, 3, 1)).reshape(B, H0 * W0, c_in0)

    wms, biases, meta = [], [], []
    for (w, b, stride) in params:
        c_out, c_in, kh, kw = w.shape
        wm = jnp.transpose(w.astype(jnp.float32), (2, 3, 1, 0)).reshape(kh * kw * c_in, c_out)
        wms.append(wm)                                   # wm[(a*kw+q)*c_in+c, o] = w[o,c,a,q]
        biases.append(b.astype(jnp.float32).reshape(1, c_out))
        meta.append((int(kh), int(kw), int(stride[0]), int(stride[1])))
    ncls = params[-1][0].shape[0]

    in_specs = [pl.BlockSpec((1, H0 * W0, c_in0), lambda b: (b, 0, 0))]
    in_specs += [pl.BlockSpec(a.shape, lambda b: (0, 0)) for a in wms + biases]

    out = pl.pallas_call(
        functools.partial(_net_kernel, meta=tuple(meta), hw0=(H0, W0)),
        out_shape=jax.ShapeDtypeStruct((B, 1, ncls), jnp.float32),
        grid=(B,),
        in_specs=in_specs,
        out_specs=pl.BlockSpec((1, 1, ncls), lambda b: (b, 0, 0)),
        compiler_params=pltpu.CompilerParams(
            dimension_semantics=("parallel",)),
    )(xf, *wms, *biases)
    return out.reshape(B, ncls)


# ------------------------------ Net_ours params ----------------------------- #

_LAYER_DEFS = [  # (c_in, c_out, kernel, stride)
    (1, 8, 3, 1), (8, 8, 3, 2), (8, 8, 3, 3), (8, 8, 3, 2), (8, 10, 1, 1),
]


def init_params(key):
    params = []
    for i, (ci, co, k, s) in enumerate(_LAYER_DEFS):
        kw_, kb_ = jax.random.split(jax.random.fold_in(key, i))
        K = float(np.sqrt(1.0 / (ci * k * k)))
        w = jax.random.uniform(kw_, (co, ci, k, k), jnp.float32, -K, K)
        b = jax.random.uniform(kb_, (co,), jnp.float32, -K, K)
        params.append((w, b, (s, s)))
    return params


# --------------------------- pure-numpy FFT reference ------------------------ #

def reference_forward_np(x, params):
    x = np.asarray(x, np.float64)
    for idx, (w, b, stride) in enumerate(params):
        w = np.asarray(w, np.float64)
        b = np.asarray(b, np.float64)
        H, W = x.shape[-2:]
        X = np.fft.rfft2(x)[:, None]                 # (B, 1, ci, H, Wf)
        Wf = np.fft.rfft2(w, s=(H, W))               # (co, ci, H, Wf)
        h = (X * Wf).sum(2)
        h = np.fft.irfft2(h, s=(H, W)) + b.reshape(-1, 1, 1)
        h = h[:, :, ::stride[0], ::stride[1]]
        if idx < len(params) - 1:
            h = np.maximum(h, 0.0)
        x = h
    logits = x.mean(axis=(-1, -2))
    z = logits - logits.max(axis=-1, keepdims=True)
    return z - np.log(np.exp(z).sum(axis=-1, keepdims=True))


if __name__ == "__main__":
    key = jax.random.PRNGKey(0)
    kx, kp = jax.random.split(key)
    x = jax.random.normal(kx, (2, 1, 16, 16), jnp.float32)   # NCHW, 1 input channel
    params = init_params(kp)

    fwd = jax.jit(lambda xx: net_ours_forward(xx, params))
    out = jax.block_until_ready(fwd(x))

    assert out.shape == (2, 10)
    ref = reference_forward_np(np.asarray(x), params)
    # tolerance leaves headroom for MXU f32 matmul precision vs float64 FFT ref
    np.testing.assert_allclose(np.asarray(out), ref, atol=2e-3, rtol=2e-3)
    print("KERNEL_OK")
</pallas_src>

<mosaic_0001>
module attributes {stable_mosaic.version = 11 : i64} {
  func.func @_net_kernel(%arg0: i32, %arg1: memref<1x256x1xf32, #tpu.memory_space<vmem>>, %arg2: memref<9x8xf32, #tpu.memory_space<vmem>>, %arg3: memref<72x8xf32, #tpu.memory_space<vmem>>, %arg4: memref<72x8xf32, #tpu.memory_space<vmem>>, %arg5: memref<72x8xf32, #tpu.memory_space<vmem>>, %arg6: memref<8x10xf32, #tpu.memory_space<vmem>>, %arg7: memref<1x8xf32, #tpu.memory_space<vmem>>, %arg8: memref<1x8xf32, #tpu.memory_space<vmem>>, %arg9: memref<1x8xf32, #tpu.memory_space<vmem>>, %arg10: memref<1x8xf32, #tpu.memory_space<vmem>>, %arg11: memref<1x10xf32, #tpu.memory_space<vmem>>, %arg12: memref<1x1x10xf32, #tpu.memory_space<vmem>>) attributes {dimension_semantics = [#tpu.dimension_semantics<parallel>], iteration_bounds = array<i64: 2>, scalar_prefetch = 0 : i64, scratch_operands = 0 : i64, tpu.core_type = #tpu.core_type<tc>, window_params = [{transform_indices = @transform_0, window_bounds = array<i64: 1, 256, 1>}, {pipeline_mode = #tpu.pipeline_mode<synchronous>, transform_indices = @transform_1, window_bounds = array<i64: 9, 8>}, {pipeline_mode = #tpu.pipeline_mode<synchronous>, transform_indices = @transform_2, window_bounds = array<i64: 72, 8>}, {pipeline_mode = #tpu.pipeline_mode<synchronous>, transform_indices = @transform_3, window_bounds = array<i64: 72, 8>}, {pipeline_mode = #tpu.pipeline_mode<synchronous>, transform_indices = @transform_4, window_bounds = array<i64: 72, 8>}, {pipeline_mode = #tpu.pipeline_mode<synchronous>, transform_indices = @transform_5, window_bounds = array<i64: 8, 10>}, {pipeline_mode = #tpu.pipeline_mode<synchronous>, transform_indices = @transform_6, window_bounds = array<i64: 1, 8>}, {pipeline_mode = #tpu.pipeline_mode<synchronous>, transform_indices = @transform_7, window_bounds = array<i64: 1, 8>}, {pipeline_mode = #tpu.pipeline_mode<synchronous>, transform_indices = @transform_8, window_bounds = array<i64: 1, 8>}, {pipeline_mode = #tpu.pipeline_mode<synchronous>, transform_indices = @transform_9, window_bounds = array<i64: 1, 8>}, {pipeline_mode = #tpu.pipeline_mode<synchronous>, transform_indices = @transform_10, window_bounds = array<i64: 1, 10>}, {transform_indices = @transform_11, window_bounds = array<i64: 1, 1, 10>}]} {
    %c0 = arith.constant 0 : index
    %c0_0 = arith.constant 0 : index
    %c0_1 = arith.constant 0 : index
    %0 = vector.load %arg1[%c0, %c0_0, %c0_1] : memref<1x256x1xf32, #tpu.memory_space<vmem>>, vector<1x256x1xf32>
    %1 = vector.shape_cast %0 : vector<1x256x1xf32> to vector<256x1xf32>
    %c0_2 = arith.constant 0 : index
    %c0_3 = arith.constant 0 : index
    %2 = vector.load %arg2[%c0_2, %c0_3] : memref<9x8xf32, #tpu.memory_space<vmem>>, vector<9x8xf32>
    %c0_4 = arith.constant 0 : index
    %c0_5 = arith.constant 0 : index
    %3 = vector.load %arg7[%c0_4, %c0_5] : memref<1x8xf32, #tpu.memory_space<vmem>>, vector<1x8xf32>
    %4 = tpu.iota {dimensions = array<i32: 0>} : vector<16x1xi32>
    %5 = tpu.concatenate %4, %4, %4, %4, %4, %4, %4, %4, %4, %4, %4, %4, %4, %4, %4, %4 in 0 : vector<16x1xi32>, vector<16x1xi32>, vector<16x1xi32>, vector<16x1xi32>, vector<16x1xi32>, vector<16x1xi32>, vector<16x1xi32>, vector<16x1xi32>, vector<16x1xi32>, vector<16x1xi32>, vector<16x1xi32>, vector<16x1xi32>, vector<16x1xi32>, vector<16x1xi32>, vector<16x1xi32>, vector<16x1xi32> -> vector<256x1xi32>
    %6 = vector.extract_strided_slice %1 {offsets = [255, 0], sizes = [1, 1], strides = [1, 1]} : vector<256x1xf32> to vector<1x1xf32>
    %7 = vector.extract_strided_slice %1 {offsets = [0, 0], sizes = [255, 1], strides = [1, 1]} : vector<256x1xf32> to vector<255x1xf32>
    %8 = tpu.concatenate %6, %7 in 0 : vector<1x1xf32>, vector<255x1xf32> -> vector<256x1xf32>
    %9 = vector.extract_strided_slice %1 {offsets = [15, 0], sizes = [241, 1], strides = [1, 1]} : vector<256x1xf32> to vector<241x1xf32>
    %10 = vector.extract_strided_slice %1 {offsets = [0, 0], sizes = [15, 1], strides = [1, 1]} : vector<256x1xf32> to vector<15x1xf32>
    %11 = tpu.concatenate %9, %10 in 0 : vector<241x1xf32>, vector<15x1xf32> -> vector<256x1xf32>
    %c1_i32 = arith.constant 1 : i32
    %12 = vector.broadcast %c1_i32 : i32 to vector<256x1xi32>
    %13 = arith.cmpi sge, %5, %12 : vector<256x1xi32>
    %14 = arith.select %13, %8, %11 : vector<256x1xi1>, vector<256x1xf32>
    %15 = vector.extract_strided_slice %1 {offsets = [254, 0], sizes = [2, 1], strides = [1, 1]} : vector<256x1xf32> to vector<2x1xf32>
    %16 = vector.extract_strided_slice %1 {offsets = [0, 0], sizes = [254, 1], strides = [1, 1]} : vector<256x1xf32> to vector<254x1xf32>
    %17 = tpu.concatenate %15, %16 in 0 : vector<2x1xf32>, vector<254x1xf32> -> vector<256x1xf32>
    %18 = vector.extract_strided_slice %1 {offsets = [14, 0], sizes = [242, 1], strides = [1, 1]} : vector<256x1xf32> to vector<242x1xf32>
    %19 = vector.extract_strided_slice %1 {offsets = [0, 0], sizes = [14, 1], strides = [1, 1]} : vector<256x1xf32> to vector<14x1xf32>
    %20 = tpu.concatenate %18, %19 in 0 : vector<242x1xf32>, vector<14x1xf32> -> vector<256x1xf32>
    %c2_i32 = arith.constant 2 : i32
    %21 = vector.broadcast %c2_i32 : i32 to vector<256x1xi32>
    %22 = arith.cmpi sge, %5, %21 : vector<256x1xi32>
    %23 = arith.select %22, %17, %20 : vector<256x1xi1>, vector<256x1xf32>
    %24 = vector.extract_strided_slice %1 {offsets = [240, 0], sizes = [16, 1], strides = [1, 1]} : vector<256x1xf32> to vector<16x1xf32>
    %25 = vector.extract_strided_slice %1 {offsets = [0, 0], sizes = [240, 1], strides = [1, 1]} : vector<256x1xf32> to vector<240x1xf32>
    %26 = tpu.concatenate %24, %25 in 0 : vector<16x1xf32>, vector<240x1xf32> -> vector<256x1xf32>
    %27 = vector.extract_strided_slice %1 {offsets = [239, 0], sizes = [17, 1], strides = [1, 1]} : vector<256x1xf32> to vector<17x1xf32>
    %28 = vector.extract_strided_slice %1 {offsets = [0, 0], sizes = [239, 1], strides = [1, 1]} : vector<256x1xf32> to vector<239x1xf32>
    %29 = tpu.concatenate %27, %28 in 0 : vector<17x1xf32>, vector<239x1xf32> -> vector<256x1xf32>
    %30 = vector.extract_strided_slice %1 {offsets = [255, 0], sizes = [1, 1], strides = [1, 1]} : vector<256x1xf32> to vector<1x1xf32>
    %31 = vector.extract_strided_slice %1 {offsets = [0, 0], sizes = [255, 1], strides = [1, 1]} : vector<256x1xf32> to vector<255x1xf32>
    %32 = tpu.concatenate %30, %31 in 0 : vector<1x1xf32>, vector<255x1xf32> -> vector<256x1xf32>
    %c1_i32_6 = arith.constant 1 : i32
    %33 = vector.broadcast %c1_i32_6 : i32 to vector<256x1xi32>
    %34 = arith.cmpi sge, %5, %33 : vector<256x1xi32>
    %35 = arith.select %34, %29, %32 : vector<256x1xi1>, vector<256x1xf32>
    %36 = vector.extract_strided_slice %1 {offsets = [238, 0], sizes = [18, 1], strides = [1, 1]} : vector<256x1xf32> to vector<18x1xf32>
    %37 = vector.extract_strided_slice %1 {offsets = [0, 0], sizes = [238, 1], strides = [1, 1]} : vector<256x1xf32> to vector<238x1xf32>
    %38 = tpu.concatenate %36, %37 in 0 : vector<18x1xf32>, vector<238x1xf32> -> vector<256x1xf32>
    %39 = vector.extract_strided_slice %1 {offsets = [254, 0], sizes = [2, 1], strides = [1, 1]} : vector<256x1xf32> to vector<2x1xf32>
    %40 = vector.extract_strided_slice %1 {offsets = [0, 0], sizes = [254, 1], strides = [1, 1]} : vector<256x1xf32> to vector<254x1xf32>
    %41 = tpu.concatenate %39, %40 in 0 : vector<2x1xf32>, vector<254x1xf32> -> vector<256x1xf32>
    %c2_i32_7 = arith.constant 2 : i32
    %42 = vector.broadcast %c2_i32_7 : i32 to vector<256x1xi32>
    %43 = arith.cmpi sge, %5, %42 : vector<256x1xi32>
    %44 = arith.select %43, %38, %41 : vector<256x1xi1>, vector<256x1xf32>
    %45 = vector.extract_strided_slice %1 {offsets = [224, 0], sizes = [32, 1], strides = [1, 1]} : vector<256x1xf32> to vector<32x1xf32>
    %46 = vector.extract_strided_slice %1 {offsets = [0, 0], sizes = [224, 1], strides = [1, 1]} : vector<256x1xf32> to vector<224x1xf32>
    %47 = tpu.concatenate %45, %46 in 0 : vector<32x1xf32>, vector<224x1xf32> -> vector<256x1xf32>
    %48 = vector.extract_strided_slice %1 {offsets = [223, 0], sizes = [33, 1], strides = [1, 1]} : vector<256x1xf32> to vector<33x1xf32>
    %49 = vector.extract_strided_slice %1 {offsets = [0, 0], sizes = [223, 1], strides = [1, 1]} : vector<256x1xf32> to vector<223x1xf32>
    %50 = tpu.concatenate %48, %49 in 0 : vector<33x1xf32>, vector<223x1xf32> -> vector<256x1xf32>
    %51 = vector.extract_strided_slice %1 {offsets = [239, 0], sizes = [17, 1], strides = [1, 1]} : vector<256x1xf32> to vector<17x1xf32>
    %52 = vector.extract_strided_slice %1 {offsets = [0, 0], sizes = [239, 1], strides = [1, 1]} : vector<256x1xf32> to vector<239x1xf32>
    %53 = tpu.concatenate %51, %52 in 0 : vector<17x1xf32>, vector<239x1xf32> -> vector<256x1xf32>
    %c1_i32_8 = arith.constant 1 : i32
    %54 = vector.broadcast %c1_i32_8 : i32 to vector<256x1xi32>
    %55 = arith.cmpi sge, %5, %54 : vector<256x1xi32>
    %56 = arith.select %55, %50, %53 : vector<256x1xi1>, vector<256x1xf32>
    %57 = vector.extract_strided_slice %1 {offsets = [222, 0], sizes = [34, 1], strides = [1, 1]} : vector<256x1xf32> to vector<34x1xf32>
    %58 = vector.extract_strided_slice %1 {offsets = [0, 0], sizes = [222, 1], strides = [1, 1]} : vector<256x1xf32> to vector<222x1xf32>
    %59 = tpu.concatenate %57, %58 in 0 : vector<34x1xf32>, vector<222x1xf32> -> vector<256x1xf32>
    %60 = vector.extract_strided_slice %1 {offsets = [238, 0], sizes = [18, 1], strides = [1, 1]} : vector<256x1xf32> to vector<18x1xf32>
    %61 = vector.extract_strided_slice %1 {offsets = [0, 0], sizes = [238, 1], strides = [1, 1]} : vector<256x1xf32> to vector<238x1xf32>
    %62 = tpu.concatenate %60, %61 in 0 : vector<18x1xf32>, vector<238x1xf32> -> vector<256x1xf32>
    %c2_i32_9 = arith.constant 2 : i32
    %63 = vector.broadcast %c2_i32_9 : i32 to vector<256x1xi32>
    %64 = arith.cmpi sge, %5, %63 : vector<256x1xi32>
    %65 = arith.select %64, %59, %62 : vector<256x1xi1>, vector<256x1xf32>
    %66 = tpu.concatenate %1, %14, %23, %26, %35, %44, %47, %56, %65 in 1 : vector<256x1xf32>, vector<256x1xf32>, vector<256x1xf32>, vector<256x1xf32>, vector<256x1xf32>, vector<256x1xf32>, vector<256x1xf32>, vector<256x1xf32>, vector<256x1xf32> -> vector<256x9xf32>
    %cst = arith.constant dense<0.000000e+00> : vector<256x8xf32>
    %67 = tpu.matmul %66, %2, %cst {dimension_numbers = #tpu.dot_dimension_numbers<[1], [0], [0], [1], [0, 0, 1, 1], [], []>} : vector<256x9xf32>, vector<9x8xf32>, vector<256x8xf32> -> vector<256x8xf32>
    %68 = vector.broadcast %3 : vector<1x8xf32> to vector<256x8xf32>
    %69 = arith.addf %67, %68 : vector<256x8xf32>
    %cst_10 = arith.constant 0.000000e+00 : f32
    %70 = vector.broadcast %cst_10 : f32 to vector<256x8xf32>
    %71 = arith.maximumf %69, %70 : vector<256x8xf32>
    %c0_11 = arith.constant 0 : index
    %c0_12 = arith.constant 0 : index
    %72 = vector.load %arg3[%c0_11, %c0_12] : memref<72x8xf32, #tpu.memory_space<vmem>>, vector<72x8xf32>
    %c0_13 = arith.constant 0 : index
    %c0_14 = arith.constant 0 : index
    %73 = vector.load %arg8[%c0_13, %c0_14] : memref<1x8xf32, #tpu.memory_space<vmem>>, vector<1x8xf32>
    %74 = tpu.iota {dimensions = array<i32: 0>} : vector<16x1xi32>
    %75 = tpu.concatenate %74, %74, %74, %74, %74, %74, %74, %74, %74, %74, %74, %74, %74, %74, %74, %74 in 0 : vector<16x1xi32>, vector<16x1xi32>, vector<16x1xi32>, vector<16x1xi32>, vector<16x1xi32>, vector<16x1xi32>, vector<16x1xi32>, vector<16x1xi32>, vector<16x1xi32>, vector<16x1xi32>, vector<16x1xi32>, vector<16x1xi32>, vector<16x1xi32>, vector<16x1xi32>, vector<16x1xi32>, vector<16x1xi32> -> vector<256x1xi32>
    %76 = vector.extract_strided_slice %71 {offsets = [255, 0], sizes = [1, 8], strides = [1, 1]} : vector<256x8xf32> to vector<1x8xf32>
    %77 = vector.extract_strided_slice %71 {offsets = [0, 0], sizes = [255, 8], strides = [1, 1]} : vector<256x8xf32> to vector<255x8xf32>
    %78 = tpu.concatenate %76, %77 in 0 : vector<1x8xf32>, vector<255x8xf32> -> vector<256x8xf32>
    %79 = vector.extract_strided_slice %71 {offsets = [15, 0], sizes = [241, 8], strides = [1, 1]} : vector<256x8xf32> to vector<241x8xf32>
    %80 = vector.extract_strided_slice %71 {offsets = [0, 0], sizes = [15, 8], strides = [1, 1]} : vector<256x8xf32> to vector<15x8xf32>
    %81 = tpu.concatenate %79, %80 in 0 : vector<241x8xf32>, vector<15x8xf32> -> vector<256x8xf32>
    %c1_i32_15 = arith.constant 1 : i32
    %82 = vector.broadcast %c1_i32_15 : i32 to vector<256x1xi32>
    %83 = arith.cmpi sge, %75, %82 : vector<256x1xi32>
    %84 = vector.shape_cast %83 : vector<256x1xi1> to vector<256x1xi1>
    %85 = vector.broadcast %84 : vector<256x1xi1> to vector<256x8xi1>
    %86 = arith.select %85, %78, %81 : vector<256x8xi1>, vector<256x8xf32>
    %87 = vector.extract_strided_slice %71 {offsets = [254, 0], sizes = [2, 8], strides = [1, 1]} : vector<256x8xf32> to vector<2x8xf32>
    %88 = vector.extract_strided_slice %71 {offsets = [0, 0], sizes = [254, 8], strides = [1, 1]} : vector<256x8xf32> to vector<254x8xf32>
    %89 = tpu.concatenate %87, %88 in 0 : vector<2x8xf32>, vector<254x8xf32> -> vector<256x8xf32>
    %90 = vector.extract_strided_slice %71 {offsets = [14, 0], sizes = [242, 8], strides = [1, 1]} : vector<256x8xf32> to vector<242x8xf32>
    %91 = vector.extract_strided_slice %71 {offsets = [0, 0], sizes = [14, 8], strides = [1, 1]} : vector<256x8xf32> to vector<14x8xf32>
    %92 = tpu.concatenate %90, %91 in 0 : vector<242x8xf32>, vector<14x8xf32> -> vector<256x8xf32>
    %c2_i32_16 = arith.constant 2 : i32
    %93 = vector.broadcast %c2_i32_16 : i32 to vector<256x1xi32>
    %94 = arith.cmpi sge, %75, %93 : vector<256x1xi32>
    %95 = vector.shape_cast %94 : vector<256x1xi1> to vector<256x1xi1>
    %96 = vector.broadcast %95 : vector<256x1xi1> to vector<256x8xi1>
    %97 = arith.select %96, %89, %92 : vector<256x8xi1>, vector<256x8xf32>
    %98 = vector.extract_strided_slice %71 {offsets = [240, 0], sizes = [16, 8], strides = [1, 1]} : vector<256x8xf32> to vector<16x8xf32>
    %99 = vector.extract_strided_slice %71 {offsets = [0, 0], sizes = [240, 8], strides = [1, 1]} : vector<256x8xf32> to vector<240x8xf32>
    %100 = tpu.concatenate %98, %99 in 0 : vector<16x8xf32>, vector<240x8xf32> -> vector<256x8xf32>
    %101 = vector.extract_strided_slice %71 {offsets = [239, 0], sizes = [17, 8], strides = [1, 1]} : vector<256x8xf32> to vector<17x8xf32>
    %102 = vector.extract_strided_slice %71 {offsets = [0, 0], sizes = [239, 8], strides = [1, 1]} : vector<256x8xf32> to vector<239x8xf32>
    %103 = tpu.concatenate %101, %102 in 0 : vector<17x8xf32>, vector<239x8xf32> -> vector<256x8xf32>
    %104 = vector.extract_strided_slice %71 {offsets = [255, 0], sizes = [1, 8], strides = [1, 1]} : vector<256x8xf32> to vector<1x8xf32>
    %105 = vector.extract_strided_slice %71 {offsets = [0, 0], sizes = [255, 8], strides = [1, 1]} : vector<256x8xf32> to vector<255x8xf32>
    %106 = tpu.concatenate %104, %105 in 0 : vector<1x8xf32>, vector<255x8xf32> -> vector<256x8xf32>
    %c1_i32_17 = arith.constant 1 : i32
    %107 = vector.broadcast %c1_i32_17 : i32 to vector<256x1xi32>
    %108 = arith.cmpi sge, %75, %107 : vector<256x1xi32>
    %109 = vector.shape_cast %108 : vector<256x1xi1> to vector<256x1xi1>
    %110 = vector.broadcast %109 : vector<256x1xi1> to vector<256x8xi1>
    %111 = arith.select %110, %103, %106 : vector<256x8xi1>, vector<256x8xf32>
    %112 = vector.extract_strided_slice %71 {offsets = [238, 0], sizes = [18, 8], strides = [1, 1]} : vector<256x8xf32> to vector<18x8xf32>
    %113 = vector.extract_strided_slice %71 {offsets = [0, 0], sizes = [238, 8], strides = [1, 1]} : vector<256x8xf32> to vector<238x8xf32>
    %114 = tpu.concatenate %112, %113 in 0 : vector<18x8xf32>, vector<238x8xf32> -> vector<256x8xf32>
    %115 = vector.extract_strided_slice %71 {offsets = [254, 0], sizes = [2, 8], strides = [1, 1]} : vector<256x8xf32> to vector<2x8xf32>
    %116 = vector.extract_strided_slice %71 {offsets = [0, 0], sizes = [254, 8], strides = [1, 1]} : vector<256x8xf32> to vector<254x8xf32>
    %117 = tpu.concatenate %115, %116 in 0 : vector<2x8xf32>, vector<254x8xf32> -> vector<256x8xf32>
    %c2_i32_18 = arith.constant 2 : i32
    %118 = vector.broadcast %c2_i32_18 : i32 to vector<256x1xi32>
    %119 = arith.cmpi sge, %75, %118 : vector<256x1xi32>
    %120 = vector.shape_cast %119 : vector<256x1xi1> to vector<256x1xi1>
    %121 = vector.broadcast %120 : vector<256x1xi1> to vector<256x8xi1>
    %122 = arith.select %121, %114, %117 : vector<256x8xi1>, vector<256x8xf32>
    %123 = vector.extract_strided_slice %71 {offsets = [224, 0], sizes = [32, 8], strides = [1, 1]} : vector<256x8xf32> to vector<32x8xf32>
    %124 = vector.extract_strided_slice %71 {offsets = [0, 0], sizes = [224, 8], strides = [1, 1]} : vector<256x8xf32> to vector<224x8xf32>
    %125 = tpu.concatenate %123, %124 in 0 : vector<32x8xf32>, vector<224x8xf32> -> vector<256x8xf32>
    %126 = vector.extract_strided_slice %71 {offsets = [223, 0], sizes = [33, 8], strides = [1, 1]} : vector<256x8xf32> to vector<33x8xf32>
    %127 = vector.extract_strided_slice %71 {offsets = [0, 0], sizes = [223, 8], strides = [1, 1]} : vector<256x8xf32> to vector<223x8xf32>
    %128 = tpu.concatenate %126, %127 in 0 : vector<33x8xf32>, vector<223x8xf32> -> vector<256x8xf32>
    %129 = vector.extract_strided_slice %71 {offsets = [239, 0], sizes = [17, 8], strides = [1, 1]} : vector<256x8xf32> to vector<17x8xf32>
    %130 = vector.extract_strided_slice %71 {offsets = [0, 0], sizes = [239, 8], strides = [1, 1]} : vector<256x8xf32> to vector<239x8xf32>
    %131 = tpu.concatenate %129, %130 in 0 : vector<17x8xf32>, vector<239x8xf32> -> vector<256x8xf32>
    %c1_i32_19 = arith.constant 1 : i32
    %132 = vector.broadcast %c1_i32_19 : i32 to vector<256x1xi32>
    %133 = arith.cmpi sge, %75, %132 : vector<256x1xi32>
    %134 = vector.shape_cast %133 : vector<256x1xi1> to vector<256x1xi1>
    %135 = vector.broadcast %134 : vector<256x1xi1> to vector<256x8xi1>
    %136 = arith.select %135, %128, %131 : vector<256x8xi1>, vector<256x8xf32>
    %137 = vector.extract_strided_slice %71 {offsets = [222, 0], sizes = [34, 8], strides = [1, 1]} : vector<256x8xf32> to vector<34x8xf32>
    %138 = vector.extract_strided_slice %71 {offsets = [0, 0], sizes = [222, 8], strides = [1, 1]} : vector<256x8xf32> to vector<222x8xf32>
    %139 = tpu.concatenate %137, %138 in 0 : vector<34x8xf32>, vector<222x8xf32> -> vector<256x8xf32>
    %140 = vector.extract_strided_slice %71 {offsets = [238, 0], sizes = [18, 8], strides = [1, 1]} : vector<256x8xf32> to vector<18x8xf32>
    %141 = vector.extract_strided_slice %71 {offsets = [0, 0], sizes = [238, 8], strides = [1, 1]} : vector<256x8xf32> to vector<238x8xf32>
    %142 = tpu.concatenate %140, %141 in 0 : vector<18x8xf32>, vector<238x8xf32> -> vector<256x8xf32>
    %c2_i32_20 = arith.constant 2 : i32
    %143 = vector.broadcast %c2_i32_20 : i32 to vector<256x1xi32>
    %144 = arith.cmpi sge, %75, %143 : vector<256x1xi32>
    %145 = vector.shape_cast %144 : vector<256x1xi1> to vector<256x1xi1>
    %146 = vector.broadcast %145 : vector<256x1xi1> to vector<256x8xi1>
    %147 = arith.select %146, %139, %142 : vector<256x8xi1>, vector<256x8xf32>
    %148 = tpu.concatenate %71, %86, %97, %100, %111, %122, %125, %136, %147 in 1 : vector<256x8xf32>, vector<256x8xf32>, vector<256x8xf32>, vector<256x8xf32>, vector<256x8xf32>, vector<256x8xf32>, vector<256x8xf32>, vector<256x8xf32>, vector<256x8xf32> -> vector<256x72xf32>
    %cst_21 = arith.constant dense<0.000000e+00> : vector<256x8xf32>
    %149 = tpu.matmul %148, %72, %cst_21 {dimension_numbers = #tpu.dot_dimension_numbers<[1], [0], [0], [1], [0, 0, 1, 1], [], []>} : vector<256x72xf32>, vector<72x8xf32>, vector<256x8xf32> -> vector<256x8xf32>
    %150 = vector.broadcast %73 : vector<1x8xf32> to vector<256x8xf32>
    %151 = arith.addf %149, %150 : vector<256x8xf32>
    %cst_22 = arith.constant 0.000000e+00 : f32
    %152 = vector.broadcast %cst_22 : f32 to vector<256x8xf32>
    %153 = arith.maximumf %151, %152 : vector<256x8xf32>
    %154 = vector.extract_strided_slice %153 {offsets = [0, 0], sizes = [1, 8], strides = [1, 1]} : vector<256x8xf32> to vector<1x8xf32>
    %155 = vector.extract_strided_slice %153 {offsets = [2, 0], sizes = [1, 8], strides = [1, 1]} : vector<256x8xf32> to vector<1x8xf32>
    %156 = vector.extract_strided_slice %153 {offsets = [4, 0], sizes = [1, 8], strides = [1, 1]} : vector<256x8xf32> to vector<1x8xf32>
    %157 = vector.extract_strided_slice %153 {offsets = [6, 0], sizes = [1, 8], strides = [1, 1]} : vector<256x8xf32> to vector<1x8xf32>
    %158 = vector.extract_strided_slice %153 {offsets = [8, 0], sizes = [1, 8], strides = [1, 1]} : vector<256x8xf32> to vector<1x8xf32>
    %159 = vector.extract_strided_slice %153 {offsets = [10, 0], sizes = [1, 8], strides = [1, 1]} : vector<256x8xf32> to vector<1x8xf32>
    %160 = vector.extract_strided_slice %153 {offsets = [12, 0], sizes = [1, 8], strides = [1, 1]} : vector<256x8xf32> to vector<1x8xf32>
    %161 = vector.extract_strided_slice %153 {offsets = [14, 0], sizes = [1, 8], strides = [1, 1]} : vector<256x8xf32> to vector<1x8xf32>
    %162 = vector.extract_strided_slice %153 {offsets = [32, 0], sizes = [1, 8], strides = [1, 1]} : vector<256x8xf32> to vector<1x8xf32>
    %163 = vector.extract_strided_slice %153 {offsets = [34, 0], sizes = [1, 8], strides = [1, 1]} : vector<256x8xf32> to vector<1x8xf32>
    %164 = vector.extract_strided_slice %153 {offsets = [36, 0], sizes = [1, 8], strides = [1, 1]} : vector<256x8xf32> to vector<1x8xf32>
    %165 = vector.extract_strided_slice %153 {offsets = [38, 0], sizes = [1, 8], strides = [1, 1]} : vector<256x8xf32> to vector<1x8xf32>
    %166 = vector.extract_strided_slice %153 {offsets = [40, 0], sizes = [1, 8], strides = [1, 1]} : vector<256x8xf32> to vector<1x8xf32>
    %167 = vector.extract_strided_slice %153 {offsets = [42, 0], sizes = [1, 8], strides = [1, 1]} : vector<256x8xf32> to vector<1x8xf32>
    %168 = vector.extract_strided_slice %153 {offsets = [44, 0], sizes = [1, 8], strides = [1, 1]} : vector<256x8xf32> to vector<1x8xf32>
    %169 = vector.extract_strided_slice %153 {offsets = [46, 0], sizes = [1, 8], strides = [1, 1]} : vector<256x8xf32> to vector<1x8xf32>
    %170 = vector.extract_strided_slice %153 {offsets = [64, 0], sizes = [1, 8], strides = [1, 1]} : vector<256x8xf32> to vector<1x8xf32>
    %171 = vector.extract_strided_slice %153 {offsets = [66, 0], sizes = [1, 8], strides = [1, 1]} : vector<256x8xf32> to vector<1x8xf32>
    %172 = vector.extract_strided_slice %153 {offsets = [68, 0], sizes = [1, 8], strides = [1, 1]} : vector<256x8xf32> to vector<1x8xf32>
    %173 = vector.extract_strided_slice %153 {offsets = [70, 0], sizes = [1, 8], strides = [1, 1]} : vector<256x8xf32> to vector<1x8xf32>
    %174 = vector.extract_strided_slice %153 {offsets = [72, 0], sizes = [1, 8], strides = [1, 1]} : vector<256x8xf32> to vector<1x8xf32>
    %175 = vector.extract_strided_slice %153 {offsets = [74, 0], sizes = [1, 8], strides = [1, 1]} : vector<256x8xf32> to vector<1x8xf32>
    %176 = vector.extract_strided_slice %153 {offsets = [76, 0], sizes = [1, 8], strides = [1, 1]} : vector<256x8xf32> to vector<1x8xf32>
    %177 = vector.extract_strided_slice %153 {offsets = [78, 0], sizes = [1, 8], strides = [1, 1]} : vector<256x8xf32> to vector<1x8xf32>
    %178 = vector.extract_strided_slice %153 {offsets = [96, 0], sizes = [1, 8], strides = [1, 1]} : vector<256x8xf32> to vector<1x8xf32>
    %179 = vector.extract_strided_slice %153 {offsets = [98, 0], sizes = [1, 8], strides = [1, 1]} : vector<256x8xf32> to vector<1x8xf32>
    %180 = vector.extract_strided_slice %153 {offsets = [100, 0], sizes = [1, 8], strides = [1, 1]} : vector<256x8xf32> to vector<1x8xf32>
    %181 = vector.extract_strided_slice %153 {offsets = [102, 0], sizes = [1, 8], strides = [1, 1]} : vector<256x8xf32> to vector<1x8xf32>
    %182 = vector.extract_strided_slice %153 {offsets = [104, 0], sizes = [1, 8], strides = [1, 1]} : vector<256x8xf32> to vector<1x8xf32>
    %183 = vector.extract_strided_slice %153 {offsets = [106, 0], sizes = [1, 8], strides = [1, 1]} : vector<256x8xf32> to vector<1x8xf32>
    %184 = vector.extract_strided_slice %153 {offsets = [108, 0], sizes = [1, 8], strides = [1, 1]} : vector<256x8xf32> to vector<1x8xf32>
    %185 = vector.extract_strided_slice %153 {offsets = [110, 0], sizes = [1, 8], strides = [1, 1]} : vector<256x8xf32> to vector<1x8xf32>
    %186 = vector.extract_strided_slice %153 {offsets = [128, 0], sizes = [1, 8], strides = [1, 1]} : vector<256x8xf32> to vector<1x8xf32>
    %187 = vector.extract_strided_slice %153 {offsets = [130, 0], sizes = [1, 8], strides = [1, 1]} : vector<256x8xf32> to vector<1x8xf32>
    %188 = vector.extract_strided_slice %153 {offsets = [132, 0], sizes = [1, 8], strides = [1, 1]} : vector<256x8xf32> to vector<1x8xf32>
    %189 = vector.extract_strided_slice %153 {offsets = [134, 0], sizes = [1, 8], strides = [1, 1]} : vector<256x8xf32> to vector<1x8xf32>
    %190 = vector.extract_strided_slice %153 {offsets = [136, 0], sizes = [1, 8], strides = [1, 1]} : vector<256x8xf32> to vector<1x8xf32>
    %191 = vector.extract_strided_slice %153 {offsets = [138, 0], sizes = [1, 8], strides = [1, 1]} : vector<256x8xf32> to vector<1x8xf32>
    %192 = vector.extract_strided_slice %153 {offsets = [140, 0], sizes = [1, 8], strides = [1, 1]} : vector<256x8xf32> to vector<1x8xf32>
    %193 = vector.extract_strided_slice %153 {offsets = [142, 0], sizes = [1, 8], strides = [1, 1]} : vector<256x8xf32> to vector<1x8xf32>
    %194 = vector.extract_strided_slice %153 {offsets = [160, 0], sizes = [1, 8], strides = [1, 1]} : vector<256x8xf32> to vector<1x8xf32>
    %195 = vector.extract_strided_slice %153 {offsets = [162, 0], sizes = [1, 8], strides = [1, 1]} : vector<256x8xf32> to vector<1x8xf32>
    %196 = vector.extract_strided_slice %153 {offsets = [164, 0], sizes = [1, 8], strides = [1, 1]} : vector<256x8xf32> to vector<1x8xf32>
    %197 = vector.extract_strided_slice %153 {offsets = [166, 0], sizes = [1, 8], strides = [1, 1]} : vector<256x8xf32> to vector<1x8xf32>
    %198 = vector.extract_strided_slice %153 {offsets = [168, 0], sizes = [1, 8], strides = [1, 1]} : vector<256x8xf32> to vector<1x8xf32>
    %199 = vector.extract_strided_slice %153 {offsets = [170, 0], sizes = [1, 8], strides = [1, 1]} : vector<256x8xf32> to vector<1x8xf32>
    %200 = vector.extract_strided_slice %153 {offsets = [172, 0], sizes = [1, 8], strides = [1, 1]} : vector<256x8xf32> to vector<1x8xf32>
    %201 = vector.extract_strided_slice %153 {offsets = [174, 0], sizes = [1, 8], strides = [1, 1]} : vector<256x8xf32> to vector<1x8xf32>
    %202 = vector.extract_strided_slice %153 {offsets = [192, 0], sizes = [1, 8], strides = [1, 1]} : vector<256x8xf32> to vector<1x8xf32>
    %203 = vector.extract_strided_slice %153 {offsets = [194, 0], sizes = [1, 8], strides = [1, 1]} : vector<256x8xf32> to vector<1x8xf32>
    %204 = vector.extract_strided_slice %153 {offsets = [196, 0], sizes = [1, 8], strides = [1, 1]} : vector<256x8xf32> to vector<1x8xf32>
    %205 = vector.extract_strided_slice %153 {offsets = [198, 0], sizes = [1, 8], strides = [1, 1]} : vector<256x8xf32> to vector<1x8xf32>
    %206 = vector.extract_strided_slice %153 {offsets = [200, 0], sizes = [1, 8], strides = [1, 1]} : vector<256x8xf32> to vector<1x8xf32>
    %207 = vector.extract_strided_slice %153 {offsets = [202, 0], sizes = [1, 8], strides = [1, 1]} : vector<256x8xf32> to vector<1x8xf32>
    %208 = vector.extract_strided_slice %153 {offsets = [204, 0], sizes = [1, 8], strides = [1, 1]} : vector<256x8xf32> to vector<1x8xf32>
    %209 = vector.extract_strided_slice %153 {offsets = [206, 0], sizes = [1, 8], strides = [1, 1]} : vector<256x8xf32> to vector<1x8xf32>
    %210 = vector.extract_strided_slice %153 {offsets = [224, 0], sizes = [1, 8], strides = [1, 1]} : vector<256x8xf32> to vector<1x8xf32>
    %211 = vector.extract_strided_slice %153 {offsets = [226, 0], sizes = [1, 8], strides = [1, 1]} : vector<256x8xf32> to vector<1x8xf32>
    %212 = vector.extract_strided_slice %153 {offsets = [228, 0], sizes = [1, 8], strides = [1, 1]} : vector<256x8xf32> to vector<1x8xf32>
    %213 = vector.extract_strided_slice %153 {offsets = [230, 0], sizes = [1, 8], strides = [1, 1]} : vector<256x8xf32> to vector<1x8xf32>
    %214 = vector.extract_strided_slice %153 {offsets = [232, 0], sizes = [1, 8], strides = [1, 1]} : vector<256x8xf32> to vector<1x8xf32>
    %215 = vector.extract_strided_slice %153 {offsets = [234, 0], sizes = [1, 8], strides = [1, 1]} : vector<256x8xf32> to vector<1x8xf32>
    %216 = vector.extract_strided_slice %153 {offsets = [236, 0], sizes = [1, 8], strides = [1, 1]} : vector<256x8xf32> to vector<1x8xf32>
    %217 = vector.extract_strided_slice %153 {offsets = [238, 0], sizes = [1, 8], strides = [1, 1]} : vector<256x8xf32> to vector<1x8xf32>
    %218 = tpu.concatenate %154, %155, %156, %157, %158, %159, %160, %161, %162, %163, %164, %165, %166, %167, %168, %169 in 0 : vector<1x8xf32>, vector<1x8xf32>, vector<1x8xf32>, vector<1x8xf32>, vector<1x8xf32>, vector<1x8xf32>, vector<1x8xf32>, vector<1x8xf32>, vector<1x8xf32>, vector<1x8xf32>, vector<1x8xf32>, vector<1x8xf32>, vector<1x8xf32>, vector<1x8xf32>, vector<1x8xf32>, vector<1x8xf32> -> vector<16x8xf32>
    %219 = tpu.concatenate %170, %171, %172, %173, %174, %175, %176, %177, %178, %179, %180, %181, %182, %183, %184, %185 in 0 : vector<1x8xf32>, vector<1x8xf32>, vector<1x8xf32>, vector<1x8xf32>, vector<1x8xf32>, vector<1x8xf32>, vector<1x8xf32>, vector<1x8xf32>, vector<1x8xf32>, vector<1x8xf32>, vector<1x8xf32>, vector<1x8xf32>, vector<1x8xf32>, vector<1x8xf32>, vector<1x8xf32>, vector<1x8xf32> -> vector<16x8xf32>
    %220 = tpu.concatenate %186, %187, %188, %189, %190, %191, %192, %193, %194, %195, %196, %197, %198, %199, %200, %201 in 0 : vector<1x8xf32>, vector<1x8xf32>, vector<1x8xf32>, vector<1x8xf32>, vector<1x8xf32>, vector<1x8xf32>, vector<1x8xf32>, vector<1x8xf32>, vector<1x8xf32>, vector<1x8xf32>, vector<1x8xf32>, vector<1x8xf32>, vector<1x8xf32>, vector<1x8xf32>, vector<1x8xf32>, vector<1x8xf32> -> vector<16x8xf32>
    %221 = tpu.concatenate %202, %203, %204, %205, %206, %207, %208, %209, %210, %211, %212, %213, %214, %215, %216, %217 in 0 : vector<1x8xf32>, vector<1x8xf32>, vector<1x8xf32>, vector<1x8xf32>, vector<1x8xf32>, vector<1x8xf32>, vector<1x8xf32>, vector<1x8xf32>, vector<1x8xf32>, vector<1x8xf32>, vector<1x8xf32>, vector<1x8xf32>, vector<1x8xf32>, vector<1x8xf32>, vector<1x8xf32>, vector<1x8xf32> -> vector<16x8xf32>
    %222 = tpu.concatenate %218, %219, %220, %221 in 0 : vector<16x8xf32>, vector<16x8xf32>, vector<16x8xf32>, vector<16x8xf32> -> vector<64x8xf32>
    %c0_23 = arith.constant 0 : index
    %c0_24 = arith.constant 0 : index
    %223 = vector.load %arg4[%c0_23, %c0_24] : memref<72x8xf32, #tpu.memory_space<vmem>>, vector<72x8xf32>
    %c0_25 = arith.constant 0 : index
    %c0_26 = arith.constant 0 : index
    %224 = vector.load %arg9[%c0_25, %c0_26] : memref<1x8xf32, #tpu.memory_space<vmem>>, vector<1x8xf32>
    %225 = tpu.iota {dimensions = array<i32: 0>} : vector<8x1xi32>
    %226 = tpu.concatenate %225, %225, %225, %225, %225, %225, %225, %225 in 0 : vector<8x1xi32>, vector<8x1xi32>, vector<8x1xi32>, vector<8x1xi32>, vector<8x1xi32>, vector<8x1xi32>, vector<8x1xi32>, vector<8x1xi32> -> vector<64x1xi32>
    %227 = vector.extract_strided_slice %222 {offsets = [63, 0], sizes = [1, 8], strides = [1, 1]} : vector<64x8xf32> to vector<1x8xf32>
    %228 = vector.extract_strided_slice %222 {offsets = [0, 0], sizes = [63, 8], strides = [1, 1]} : vector<64x8xf32> to vector<63x8xf32>
    %229 = tpu.concatenate %227, %228 in 0 : vector<1x8xf32>, vector<63x8xf32> -> vector<64x8xf32>
    %230 = vector.extract_strided_slice %222 {offsets = [7, 0], sizes = [57, 8], strides = [1, 1]} : vector<64x8xf32> to vector<57x8xf32>
    %231 = vector.extract_strided_slice %222 {offsets = [0, 0], sizes = [7, 8], strides = [1, 1]} : vector<64x8xf32> to vector<7x8xf32>
    %232 = tpu.concatenate %230, %231 in 0 : vector<57x8xf32>, vector<7x8xf32> -> vector<64x8xf32>
    %c1_i32_27 = arith.constant 1 : i32
    %233 = vector.broadcast %c1_i32_27 : i32 to vector<64x1xi32>
    %234 = arith.cmpi sge, %226, %233 : vector<64x1xi32>
    %235 = vector.shape_cast %234 : vector<64x1xi1> to vector<64x1xi1>
    %236 = vector.broadcast %235 : vector<64x1xi1> to vector<64x8xi1>
    %237 = arith.select %236, %229, %232 : vector<64x8xi1>, vector<64x8xf32>
    %238 = vector.extract_strided_slice %222 {offsets = [62, 0], sizes = [2, 8], strides = [1, 1]} : vector<64x8xf32> to vector<2x8xf32>
    %239 = vector.extract_strided_slice %222 {offsets = [0, 0], sizes = [62, 8], strides = [1, 1]} : vector<64x8xf32> to vector<62x8xf32>
    %240 = tpu.concatenate %238, %239 in 0 : vector<2x8xf32>, vector<62x8xf32> -> vector<64x8xf32>
    %241 = vector.extract_strided_slice %222 {offsets = [6, 0], sizes = [58, 8], strides = [1, 1]} : vector<64x8xf32> to vector<58x8xf32>
    %242 = vector.extract_strided_slice %222 {offsets = [0, 0], sizes = [6, 8], strides = [1, 1]} : vector<64x8xf32> to vector<6x8xf32>
    %243 = tpu.concatenate %241, %242 in 0 : vector<58x8xf32>, vector<6x8xf32> -> vector<64x8xf32>
    %c2_i32_28 = arith.constant 2 : i32
    %244 = vector.broadcast %c2_i32_28 : i32 to vector<64x1xi32>
    %245 = arith.cmpi sge, %226, %244 : vector<64x1xi32>
    %246 = vector.shape_cast %245 : vector<64x1xi1> to vector<64x1xi1>
    %247 = vector.broadcast %246 : vector<64x1xi1> to vector<64x8xi1>
    %248 = arith.select %247, %240, %243 : vector<64x8xi1>, vector<64x8xf32>
    %249 = vector.extract_strided_slice %222 {offsets = [56, 0], sizes = [8, 8], strides = [1, 1]} : vector<64x8xf32> to vector<8x8xf32>
    %250 = vector.extract_strided_slice %222 {offsets = [0, 0], sizes = [56, 8], strides = [1, 1]} : vector<64x8xf32> to vector<56x8xf32>
    %251 = tpu.concatenate %249, %250 in 0 : vector<8x8xf32>, vector<56x8xf32> -> vector<64x8xf32>
    %252 = vector.extract_strided_slice %222 {offsets = [55, 0], sizes = [9, 8], strides = [1, 1]} : vector<64x8xf32> to vector<9x8xf32>
    %253 = vector.extract_strided_slice %222 {offsets = [0, 0], sizes = [55, 8], strides = [1, 1]} : vector<64x8xf32> to vector<55x8xf32>
    %254 = tpu.concatenate %252, %253 in 0 : vector<9x8xf32>, vector<55x8xf32> -> vector<64x8xf32>
    %255 = vector.extract_strided_slice %222 {offsets = [63, 0], sizes = [1, 8], strides = [1, 1]} : vector<64x8xf32> to vector<1x8xf32>
    %256 = vector.extract_strided_slice %222 {offsets = [0, 0], sizes = [63, 8], strides = [1, 1]} : vector<64x8xf32> to vector<63x8xf32>
    %257 = tpu.concatenate %255, %256 in 0 : vector<1x8xf32>, vector<63x8xf32> -> vector<64x8xf32>
    %c1_i32_29 = arith.constant 1 : i32
    %258 = vector.broadcast %c1_i32_29 : i32 to vector<64x1xi32>
    %259 = arith.cmpi sge, %226, %258 : vector<64x1xi32>
    %260 = vector.shape_cast %259 : vector<64x1xi1> to vector<64x1xi1>
    %261 = vector.broadcast %260 : vector<64x1xi1> to vector<64x8xi1>
    %262 = arith.select %261, %254, %257 : vector<64x8xi1>, vector<64x8xf32>
    %263 = vector.extract_strided_slice %222 {offsets = [54, 0], sizes = [10, 8], strides = [1, 1]} : vector<64x8xf32> to vector<10x8xf32>
    %264 = vector.extract_strided_slice %222 {offsets = [0, 0], sizes = [54, 8], strides = [1, 1]} : vector<64x8xf32> to vector<54x8xf32>
    %265 = tpu.concatenate %263, %264 in 0 : vector<10x8xf32>, vector<54x8xf32> -> vector<64x8xf32>
    %266 = vector.extract_strided_slice %222 {offsets = [62, 0], sizes = [2, 8], strides = [1, 1]} : vector<64x8xf32> to vector<2x8xf32>
    %267 = vector.extract_strided_slice %222 {offsets = [0, 0], sizes = [62, 8], strides = [1, 1]} : vector<64x8xf32> to vector<62x8xf32>
    %268 = tpu.concatenate %266, %267 in 0 : vector<2x8xf32>, vector<62x8xf32> -> vector<64x8xf32>
    %c2_i32_30 = arith.constant 2 : i32
    %269 = vector.broadcast %c2_i32_30 : i32 to vector<64x1xi32>
    %270 = arith.cmpi sge, %226, %269 : vector<64x1xi32>
    %271 = vector.shape_cast %270 : vector<64x1xi1> to vector<64x1xi1>
    %272 = vector.broadcast %271 : vector<64x1xi1> to vector<64x8xi1>
    %273 = arith.select %272, %265, %268 : vector<64x8xi1>, vector<64x8xf32>
    %274 = vector.extract_strided_slice %222 {offsets = [48, 0], sizes = [16, 8], strides = [1, 1]} : vector<64x8xf32> to vector<16x8xf32>
    %275 = vector.extract_strided_slice %222 {offsets = [0, 0], sizes = [48, 8], strides = [1, 1]} : vector<64x8xf32> to vector<48x8xf32>
    %276 = tpu.concatenate %274, %275 in 0 : vector<16x8xf32>, vector<48x8xf32> -> vector<64x8xf32>
    %277 = vector.extract_strided_slice %222 {offsets = [47, 0], sizes = [17, 8], strides = [1, 1]} : vector<64x8xf32> to vector<17x8xf32>
    %278 = vector.extract_strided_slice %222 {offsets = [0, 0], sizes = [47, 8], strides = [1, 1]} : vector<64x8xf32> to vector<47x8xf32>
    %279 = tpu.concatenate %277, %278 in 0 : vector<17x8xf32>, vector<47x8xf32> -> vector<64x8xf32>
    %280 = vector.extract_strided_slice %222 {offsets = [55, 0], sizes = [9, 8], strides = [1, 1]} : vector<64x8xf32> to vector<9x8xf32>
    %281 = vector.extract_strided_slice %222 {offsets = [0, 0], sizes = [55, 8], strides = [1, 1]} : vector<64x8xf32> to vector<55x8xf32>
    %282 = tpu.concatenate %280, %281 in 0 : vector<9x8xf32>, vector<55x8xf32> -> vector<64x8xf32>
    %c1_i32_31 = arith.constant 1 : i32
    %283 = vector.broadcast %c1_i32_31 : i32 to vector<64x1xi32>
    %284 = arith.cmpi sge, %226, %283 : vector<64x1xi32>
    %285 = vector.shape_cast %284 : vector<64x1xi1> to vector<64x1xi1>
    %286 = vector.broadcast %285 : vector<64x1xi1> to vector<64x8xi1>
    %287 = arith.select %286, %279, %282 : vector<64x8xi1>, vector<64x8xf32>
    %288 = vector.extract_strided_slice %222 {offsets = [46, 0], sizes = [18, 8], strides = [1, 1]} : vector<64x8xf32> to vector<18x8xf32>
    %289 = vector.extract_strided_slice %222 {offsets = [0, 0], sizes = [46, 8], strides = [1, 1]} : vector<64x8xf32> to vector<46x8xf32>
    %290 = tpu.concatenate %288, %289 in 0 : vector<18x8xf32>, vector<46x8xf32> -> vector<64x8xf32>
    %291 = vector.extract_strided_slice %222 {offsets = [54, 0], sizes = [10, 8], strides = [1, 1]} : vector<64x8xf32> to vector<10x8xf32>
    %292 = vector.extract_strided_slice %222 {offsets = [0, 0], sizes = [54, 8], strides = [1, 1]} : vector<64x8xf32> to vector<54x8xf32>
    %293 = tpu.concatenate %291, %292 in 0 : vector<10x8xf32>, vector<54x8xf32> -> vector<64x8xf32>
    %c2_i32_32 = arith.constant 2 : i32
    %294 = vector.broadcast %c2_i32_32 : i32 to vector<64x1xi32>
    %295 = arith.cmpi sge, %226, %294 : vector<64x1xi32>
    %296 = vector.shape_cast %295 : vector<64x1xi1> to vector<64x1xi1>
    %297 = vector.broadcast %296 : vector<64x1xi1> to vector<64x8xi1>
    %298 = arith.select %297, %290, %293 : vector<64x8xi1>, vector<64x8xf32>
    %299 = tpu.concatenate %222, %237, %248, %251, %262, %273, %276, %287, %298 in 1 : vector<64x8xf32>, vector<64x8xf32>, vector<64x8xf32>, vector<64x8xf32>, vector<64x8xf32>, vector<64x8xf32>, vector<64x8xf32>, vector<64x8xf32>, vector<64x8xf32> -> vector<64x72xf32>
    %cst_33 = arith.constant dense<0.000000e+00> : vector<64x8xf32>
    %300 = tpu.matmul %299, %223, %cst_33 {dimension_numbers = #tpu.dot_dimension_numbers<[1], [0], [0], [1], [0, 0, 1, 1], [], []>} : vector<64x72xf32>, vector<72x8xf32>, vector<64x8xf32> -> vector<64x8xf32>
    %301 = vector.broadcast %224 : vector<1x8xf32> to vector<64x8xf32>
    %302 = arith.addf %300, %301 : vector<64x8xf32>
    %cst_34 = arith.constant 0.000000e+00 : f32
    %303 = vector.broadcast %cst_34 : f32 to vector<64x8xf32>
    %304 = arith.maximumf %302, %303 : vector<64x8xf32>
    %305 = vector.extract_strided_slice %304 {offsets = [0, 0], sizes = [1, 8], strides = [1, 1]} : vector<64x8xf32> to vector<1x8xf32>
    %306 = vector.extract_strided_slice %304 {offsets = [3, 0], sizes = [1, 8], strides = [1, 1]} : vector<64x8xf32> to vector<1x8xf32>
    %307 = vector.extract_strided_slice %304 {offsets = [6, 0], sizes = [1, 8], strides = [1, 1]} : vector<64x8xf32> to vector<1x8xf32>
    %308 = vector.extract_strided_slice %304 {offsets = [24, 0], sizes = [1, 8], strides = [1, 1]} : vector<64x8xf32> to vector<1x8xf32>
    %309 = vector.extract_strided_slice %304 {offsets = [27, 0], sizes = [1, 8], strides = [1, 1]} : vector<64x8xf32> to vector<1x8xf32>
    %310 = vector.extract_strided_slice %304 {offsets = [30, 0], sizes = [1, 8], strides = [1, 1]} : vector<64x8xf32> to vector<1x8xf32>
    %311 = vector.extract_strided_slice %304 {offsets = [48, 0], sizes = [1, 8], strides = [1, 1]} : vector<64x8xf32> to vector<1x8xf32>
    %312 = vector.extract_strided_slice %304 {offsets = [51, 0], sizes = [1, 8], strides = [1, 1]} : vector<64x8xf32> to vector<1x8xf32>
    %313 = vector.extract_strided_slice %304 {offsets = [54, 0], sizes = [1, 8], strides = [1, 1]} : vector<64x8xf32> to vector<1x8xf32>
    %314 = tpu.concatenate %305, %306, %307, %308, %309, %310, %311, %312, %313 in 0 : vector<1x8xf32>, vector<1x8xf32>, vector<1x8xf32>, vector<1x8xf32>, vector<1x8xf32>, vector<1x8xf32>, vector<1x8xf32>, vector<1x8xf32>, vector<1x8xf32> -> vector<9x8xf32>
    %c0_35 = arith.constant 0 : index
    %c0_36 = arith.constant 0 : index
    %315 = vector.load %arg5[%c0_35, %c0_36] : memref<72x8xf32, #tpu.memory_space<vmem>>, vector<72x8xf32>
    %c0_37 = arith.constant 0 : index
    %c0_38 = arith.constant 0 : index
    %316 = vector.load %arg10[%c0_37, %c0_38] : memref<1x8xf32, #tpu.memory_space<vmem>>, vector<1x8xf32>
    %317 = tpu.iota {dimensions = array<i32: 0>} : vector<3x1xi32>
    %318 = tpu.concatenate %317, %317, %317 in 0 : vector<3x1xi32>, vector<3x1xi32>, vector<3x1xi32> -> vector<9x1xi32>
    %319 = vector.extract_strided_slice %314 {offsets = [8, 0], sizes = [1, 8], strides = [1, 1]} : vector<9x8xf32> to vector<1x8xf32>
    %320 = vector.extract_strided_slice %314 {offsets = [0, 0], sizes = [8, 8], strides = [1, 1]} : vector<9x8xf32> to vector<8x8xf32>
    %321 = tpu.concatenate %319, %320 in 0 : vector<1x8xf32>, vector<8x8xf32> -> vector<9x8xf32>
    %322 = vector.extract_strided_slice %314 {offsets = [2, 0], sizes = [7, 8], strides = [1, 1]} : vector<9x8xf32> to vector<7x8xf32>
    %323 = vector.extract_strided_slice %314 {offsets = [0, 0], sizes = [2, 8], strides = [1, 1]} : vector<9x8xf32> to vector<2x8xf32>
    %324 = tpu.concatenate %322, %323 in 0 : vector<7x8xf32>, vector<2x8xf32> -> vector<9x8xf32>
    %c1_i32_39 = arith.constant 1 : i32
    %325 = vector.broadcast %c1_i32_39 : i32 to vector<9x1xi32>
    %326 = arith.cmpi sge, %318, %325 : vector<9x1xi32>
    %327 = vector.shape_cast %326 : vector<9x1xi1> to vector<9x1xi1>
    %328 = vector.broadcast %327 : vector<9x1xi1> to vector<9x8xi1>
    %329 = arith.select %328, %321, %324 : vector<9x8xi1>, vector<9x8xf32>
    %330 = vector.extract_strided_slice %314 {offsets = [7, 0], sizes = [2, 8], strides = [1, 1]} : vector<9x8xf32> to vector<2x8xf32>
    %331 = vector.extract_strided_slice %314 {offsets = [0, 0], sizes = [7, 8], strides = [1, 1]} : vector<9x8xf32> to vector<7x8xf32>
    %332 = tpu.concatenate %330, %331 in 0 : vector<2x8xf32>, vector<7x8xf32> -> vector<9x8xf32>
    %333 = vector.extract_strided_slice %314 {offsets = [1, 0], sizes = [8, 8], strides = [1, 1]} : vector<9x8xf32> to vector<8x8xf32>
    %334 = vector.extract_strided_slice %314 {offsets = [0, 0], sizes = [1, 8], strides = [1, 1]} : vector<9x8xf32> to vector<1x8xf32>
    %335 = tpu.concatenate %333, %334 in 0 : vector<8x8xf32>, vector<1x8xf32> -> vector<9x8xf32>
    %c2_i32_40 = arith.constant 2 : i32
    %336 = vector.broadcast %c2_i32_40 : i32 to vector<9x1xi32>
    %337 = arith.cmpi sge, %318, %336 : vector<9x1xi32>
    %338 = vector.shape_cast %337 : vector<9x1xi1> to vector<9x1xi1>
    %339 = vector.broadcast %338 : vector<9x1xi1> to vector<9x8xi1>
    %340 = arith.select %339, %332, %335 : vector<9x8xi1>, vector<9x8xf32>
    %341 = vector.extract_strided_slice %314 {offsets = [6, 0], sizes = [3, 8], strides = [1, 1]} : vector<9x8xf32> to vector<3x8xf32>
    %342 = vector.extract_strided_slice %314 {offsets = [0, 0], sizes = [6, 8], strides = [1, 1]} : vector<9x8xf32> to vector<6x8xf32>
    %343 = tpu.concatenate %341, %342 in 0 : vector<3x8xf32>, vector<6x8xf32> -> vector<9x8xf32>
    %344 = vector.extract_strided_slice %314 {offsets = [5, 0], sizes = [4, 8], strides = [1, 1]} : vector<9x8xf32> to vector<4x8xf32>
    %345 = vector.extract_strided_slice %314 {offsets = [0, 0], sizes = [5, 8], strides = [1, 1]} : vector<9x8xf32> to vector<5x8xf32>
    %346 = tpu.concatenate %344, %345 in 0 : vector<4x8xf32>, vector<5x8xf32> -> vector<9x8xf32>
    %347 = vector.extract_strided_slice %314 {offsets = [8, 0], sizes = [1, 8], strides = [1, 1]} : vector<9x8xf32> to vector<1x8xf32>
    %348 = vector.extract_strided_slice %314 {offsets = [0, 0], sizes = [8, 8], strides = [1, 1]} : vector<9x8xf32> to vector<8x8xf32>
    %349 = tpu.concatenate %347, %348 in 0 : vector<1x8xf32>, vector<8x8xf32> -> vector<9x8xf32>
    %c1_i32_41 = arith.constant 1 : i32
    %350 = vector.broadcast %c1_i32_41 : i32 to vector<9x1xi32>
    %351 = arith.cmpi sge, %318, %350 : vector<9x1xi32>
    %352 = vector.shape_cast %351 : vector<9x1xi1> to vector<9x1xi1>
    %353 = vector.broadcast %352 : vector<9x1xi1> to vector<9x8xi1>
    %354 = arith.select %353, %346, %349 : vector<9x8xi1>, vector<9x8xf32>
    %355 = vector.extract_strided_slice %314 {offsets = [4, 0], sizes = [5, 8], strides = [1, 1]} : vector<9x8xf32> to vector<5x8xf32>
    %356 = vector.extract_strided_slice %314 {offsets = [0, 0], sizes = [4, 8], strides = [1, 1]} : vector<9x8xf32> to vector<4x8xf32>
    %357 = tpu.concatenate %355, %356 in 0 : vector<5x8xf32>, vector<4x8xf32> -> vector<9x8xf32>
    %358 = vector.extract_strided_slice %314 {offsets = [7, 0], sizes = [2, 8], strides = [1, 1]} : vector<9x8xf32> to vector<2x8xf32>
    %359 = vector.extract_strided_slice %314 {offsets = [0, 0], sizes = [7, 8], strides = [1, 1]} : vector<9x8xf32> to vector<7x8xf32>
    %360 = tpu.concatenate %358, %359 in 0 : vector<2x8xf32>, vector<7x8xf32> -> vector<9x8xf32>
    %c2_i32_42 = arith.constant 2 : i32
    %361 = vector.broadcast %c2_i32_42 : i32 to vector<9x1xi32>
    %362 = arith.cmpi sge, %318, %361 : vector<9x1xi32>
    %363 = vector.shape_cast %362 : vector<9x1xi1> to vector<9x1xi1>
    %364 = vector.broadcast %363 : vector<9x1xi1> to vector<9x8xi1>
    %365 = arith.select %364, %357, %360 : vector<9x8xi1>, vector<9x8xf32>
    %366 = vector.extract_strided_slice %314 {offsets = [3, 0], sizes = [6, 8], strides = [1, 1]} : vector<9x8xf32> to vector<6x8xf32>
    %367 = vector.extract_strided_slice %314 {offsets = [0, 0], sizes = [3, 8], strides = [1, 1]} : vector<9x8xf32> to vector<3x8xf32>
    %368 = tpu.concatenate %366, %367 in 0 : vector<6x8xf32>, vector<3x8xf32> -> vector<9x8xf32>
    %369 = vector.extract_strided_slice %314 {offsets = [2, 0], sizes = [7, 8], strides = [1, 1]} : vector<9x8xf32> to vector<7x8xf32>
    %370 = vector.extract_strided_slice %314 {offsets = [0, 0], sizes = [2, 8], strides = [1, 1]} : vector<9x8xf32> to vector<2x8xf32>
    %371 = tpu.concatenate %369, %370 in 0 : vector<7x8xf32>, vector<2x8xf32> -> vector<9x8xf32>
    %372 = vector.extract_strided_slice %314 {offsets = [5, 0], sizes = [4, 8], strides = [1, 1]} : vector<9x8xf32> to vector<4x8xf32>
    %373 = vector.extract_strided_slice %314 {offsets = [0, 0], sizes = [5, 8], strides = [1, 1]} : vector<9x8xf32> to vector<5x8xf32>
    %374 = tpu.concatenate %372, %373 in 0 : vector<4x8xf32>, vector<5x8xf32> -> vector<9x8xf32>
    %c1_i32_43 = arith.constant 1 : i32
    %375 = vector.broadcast %c1_i32_43 : i32 to vector<9x1xi32>
    %376 = arith.cmpi sge, %318, %375 : vector<9x1xi32>
    %377 = vector.shape_cast %376 : vector<9x1xi1> to vector<9x1xi1>
    %378 = vector.broadcast %377 : vector<9x1xi1> to vector<9x8xi1>
    %379 = arith.select %378, %371, %374 : vector<9x8xi1>, vector<9x8xf32>
    %380 = vector.extract_strided_slice %314 {offsets = [1, 0], sizes = [8, 8], strides = [1, 1]} : vector<9x8xf32> to vector<8x8xf32>
    %381 = vector.extract_strided_slice %314 {offsets = [0, 0], sizes = [1, 8], strides = [1, 1]} : vector<9x8xf32> to vector<1x8xf32>
    %382 = tpu.concatenate %380, %381 in 0 : vector<8x8xf32>, vector<1x8xf32> -> vector<9x8xf32>
    %383 = vector.extract_strided_slice %314 {offsets = [4, 0], sizes = [5, 8], strides = [1, 1]} : vector<9x8xf32> to vector<5x8xf32>
    %384 = vector.extract_strided_slice %314 {offsets = [0, 0], sizes = [4, 8], strides = [1, 1]} : vector<9x8xf32> to vector<4x8xf32>
    %385 = tpu.concatenate %383, %384 in 0 : vector<5x8xf32>, vector<4x8xf32> -> vector<9x8xf32>
    %c2_i32_44 = arith.constant 2 : i32
    %386 = vector.broadcast %c2_i32_44 : i32 to vector<9x1xi32>
    %387 = arith.cmpi sge, %318, %386 : vector<9x1xi32>
    %388 = vector.shape_cast %387 : vector<9x1xi1> to vector<9x1xi1>
    %389 = vector.broadcast %388 : vector<9x1xi1> to vector<9x8xi1>
    %390 = arith.select %389, %382, %385 : vector<9x8xi1>, vector<9x8xf32>
    %391 = tpu.concatenate %314, %329, %340, %343, %354, %365, %368, %379, %390 in 1 : vector<9x8xf32>, vector<9x8xf32>, vector<9x8xf32>, vector<9x8xf32>, vector<9x8xf32>, vector<9x8xf32>, vector<9x8xf32>, vector<9x8xf32>, vector<9x8xf32> -> vector<9x72xf32>
    %cst_45 = arith.constant dense<0.000000e+00> : vector<9x8xf32>
    %392 = tpu.matmul %391, %315, %cst_45 {dimension_numbers = #tpu.dot_dimension_numbers<[1], [0], [0], [1], [0, 0, 1, 1], [], []>} : vector<9x72xf32>, vector<72x8xf32>, vector<9x8xf32> -> vector<9x8xf32>
    %393 = vector.broadcast %316 : vector<1x8xf32> to vector<9x8xf32>
    %394 = arith.addf %392, %393 : vector<9x8xf32>
    %cst_46 = arith.constant 0.000000e+00 : f32
    %395 = vector.broadcast %cst_46 : f32 to vector<9x8xf32>
    %396 = arith.maximumf %394, %395 : vector<9x8xf32>
    %397 = vector.extract_strided_slice %396 {offsets = [0, 0], sizes = [1, 8], strides = [1, 1]} : vector<9x8xf32> to vector<1x8xf32>
    %398 = vector.extract_strided_slice %396 {offsets = [2, 0], sizes = [1, 8], strides = [1, 1]} : vector<9x8xf32> to vector<1x8xf32>
    %399 = vector.extract_strided_slice %396 {offsets = [6, 0], sizes = [1, 8], strides = [1, 1]} : vector<9x8xf32> to vector<1x8xf32>
    %400 = vector.extract_strided_slice %396 {offsets = [8, 0], sizes = [1, 8], strides = [1, 1]} : vector<9x8xf32> to vector<1x8xf32>
    %401 = tpu.concatenate %397, %398, %399, %400 in 0 : vector<1x8xf32>, vector<1x8xf32>, vector<1x8xf32>, vector<1x8xf32> -> vector<4x8xf32>
    %c0_47 = arith.constant 0 : index
    %c0_48 = arith.constant 0 : index
    %402 = vector.load %arg6[%c0_47, %c0_48] : memref<8x10xf32, #tpu.memory_space<vmem>>, vector<8x10xf32>
    %c0_49 = arith.constant 0 : index
    %c0_50 = arith.constant 0 : index
    %403 = vector.load %arg11[%c0_49, %c0_50] : memref<1x10xf32, #tpu.memory_space<vmem>>, vector<1x10xf32>
    %cst_51 = arith.constant dense<0.000000e+00> : vector<4x10xf32>
    %404 = tpu.matmul %401, %402, %cst_51 {dimension_numbers = #tpu.dot_dimension_numbers<[1], [0], [0], [1], [0, 0, 1, 1], [], []>} : vector<4x8xf32>, vector<8x10xf32>, vector<4x10xf32> -> vector<4x10xf32>
    %405 = vector.broadcast %403 : vector<1x10xf32> to vector<4x10xf32>
    %406 = arith.addf %404, %405 : vector<4x10xf32>
    %cst_52 = arith.constant dense<0.000000e+00> : vector<10xf32>
    %407 = vector.multi_reduction <add>, %406, %cst_52 [0] : vector<4x10xf32> to vector<10xf32>
    %408 = vector.shape_cast %407 : vector<10xf32> to vector<1x10xf32>
    %cst_53 = arith.constant 4.000000e+00 : f32
    %409 = vector.broadcast %cst_53 : f32 to vector<1x10xf32>
    %410 = arith.divf %408, %409 : vector<1x10xf32>
    %cst_54 = arith.constant dense<0xFF800000> : vector<1xf32>
    %411 = vector.multi_reduction <maximumf>, %410, %cst_54 [1] : vector<1x10xf32> to vector<1xf32>
    %412 = vector.shape_cast %411 : vector<1xf32> to vector<1x1xf32>
    %413 = vector.broadcast %412 : vector<1x1xf32> to vector<1x10xf32>
    %414 = arith.subf %410, %413 : vector<1x10xf32>
    %415 = math.exp %414 : vector<1x10xf32>
    %cst_55 = arith.constant dense<0.000000e+00> : vector<1xf32>
    %416 = vector.multi_reduction <add>, %415, %cst_55 [1] : vector<1x10xf32> to vector<1xf32>
    %417 = vector.shape_cast %416 : vector<1xf32> to vector<1x1xf32>
    %418 = math.log %417 : vector<1x1xf32>
    %419 = vector.broadcast %418 : vector<1x1xf32> to vector<1x10xf32>
    %420 = arith.subf %414, %419 : vector<1x10xf32>
    %c0_56 = arith.constant 0 : index
    %c0_57 = arith.constant 0 : index
    %c0_58 = arith.constant 0 : index
    %421 = vector.load %arg12[%c0_56, %c0_57, %c0_58] : memref<1x1x10xf32, #tpu.memory_space<vmem>>, vector<1x1x10xf32>
    %422 = vector.shape_cast %421 : vector<1x1x10xf32> to vector<1x10xf32>
    %423 = vector.shape_cast %420 : vector<1x10xf32> to vector<1x1x10xf32>
    tpu.vector_store %arg12[%c0_56, %c0_57, %c0_58], %423 {strides = array<i32>} : memref<1x1x10xf32, #tpu.memory_space<vmem>>, vector<1x1x10xf32>,
    return
  }
  func.func @transform_0(%arg0: i32) -> (i32, i32, i32) {
    %c0_i32 = arith.constant 0 : i32
    %c0_i32_0 = arith.constant 0 : i32
    %c0_i32_1 = arith.constant 0 : i32
    return %arg0, %c0_i32, %c0_i32_0 : i32, i32, i32
  }
  func.func @transform_1(%arg0: i32) -> (i32, i32) {
    %c0_i32 = arith.constant 0 : i32
    %c0_i32_0 = arith.constant 0 : i32
    %c0_i32_1 = arith.constant 0 : i32
    return %c0_i32, %c0_i32_0 : i32, i32
  }
  func.func @transform_2(%arg0: i32) -> (i32, i32) {
    %c0_i32 = arith.constant 0 : i32
    %c0_i32_0 = arith.constant 0 : i32
    %c0_i32_1 = arith.constant 0 : i32
    return %c0_i32, %c0_i32_0 : i32, i32
  }
  func.func @transform_3(%arg0: i32) -> (i32, i32) {
    %c0_i32 = arith.constant 0 : i32
    %c0_i32_0 = arith.constant 0 : i32
    %c0_i32_1 = arith.constant 0 : i32
    return %c0_i32, %c0_i32_0 : i32, i32
  }
  func.func @transform_4(%arg0: i32) -> (i32, i32) {
    %c0_i32 = arith.constant 0 : i32
    %c0_i32_0 = arith.constant 0 : i32
    %c0_i32_1 = arith.constant 0 : i32
    return %c0_i32, %c0_i32_0 : i32, i32
  }
  func.func @transform_5(%arg0: i32) -> (i32, i32) {
    %c0_i32 = arith.constant 0 : i32
    %c0_i32_0 = arith.constant 0 : i32
    %c0_i32_1 = arith.constant 0 : i32
    return %c0_i32, %c0_i32_0 : i32, i32
  }
  func.func @transform_6(%arg0: i32) -> (i32, i32) {
    %c0_i32 = arith.constant 0 : i32
    %c0_i32_0 = arith.constant 0 : i32
    %c0_i32_1 = arith.constant 0 : i32
    return %c0_i32, %c0_i32_0 : i32, i32
  }
  func.func @transform_7(%arg0: i32) -> (i32, i32) {
    %c0_i32 = arith.constant 0 : i32
    %c0_i32_0 = arith.constant 0 : i32
    %c0_i32_1 = arith.constant 0 : i32
    return %c0_i32, %c0_i32_0 : i32, i32
  }
  func.func @transform_8(%arg0: i32) -> (i32, i32) {
    %c0_i32 = arith.constant 0 : i32
    %c0_i32_0 = arith.constant 0 : i32
    %c0_i32_1 = arith.constant 0 : i32
    return %c0_i32, %c0_i32_0 : i32, i32
  }
  func.func @transform_9(%arg0: i32) -> (i32, i32) {
    %c0_i32 = arith.constant 0 : i32
    %c0_i32_0 = arith.constant 0 : i32
    %c0_i32_1 = arith.constant 0 : i32
    return %c0_i32, %c0_i32_0 : i32, i32
  }
  func.func @transform_10(%arg0: i32) -> (i32, i32) {
    %c0_i32 = arith.constant 0 : i32
    %c0_i32_0 = arith.constant 0 : i32
    %c0_i32_1 = arith.constant 0 : i32
    return %c0_i32, %c0_i32_0 : i32, i32
  }
  func.func @transform_11(%arg0: i32) -> (i32, i32, i32) {
    %c0_i32 = arith.constant 0 : i32
    %c0_i32_0 = arith.constant 0 : i32
    %c0_i32_1 = arith.constant 0 : i32
    return %arg0, %c0_i32, %c0_i32_0 : i32, i32, i32
  }
}

</mosaic_0001>

<bundles_post_ra>
// kernel: _lambda_.1
= control target key start
LH: loop header
LB: loop body
LE: loop exit
PB: predicated region body
PF: predicated region fallthrough
CT: control target
= control target key end

     0   :  { %s10027_s0 = inlined_call_operand.vmem [shape: f32[2,256,1], index: 0, kind: input, shape index: {}]   ;;  %s10028_s1 = inlined_call_operand.vmem [shape: f32[9,8], index: 1, kind: input, shape index: {}]   ;;  %s10029_s2 = inlined_call_operand.vmem [shape: f32[72,8], index: 2, kind: input, shape index: {}]   ;;  %s10030_s3 = inlined_call_operand.vmem [shape: f32[72,8], index: 3, kind: input, shape index: {}]   ;;  %s10031_s4 = inlined_call_operand.vmem [shape: f32[72,8], index: 4, kind: input, shape index: {}]   ;;  %s10032_s5 = inlined_call_operand.vmem [shape: f32[8,10], index: 5, kind: input, shape index: {}]   ;;  %s10033_s6 = inlined_call_operand.vmem [shape: f32[1,8], index: 6, kind: input, shape index: {}]   ;;  %s10034_s7 = inlined_call_operand.vmem [shape: f32[1,8], index: 7, kind: input, shape index: {}]   ;;  %s10035_s8 = inlined_call_operand.vmem [shape: f32[1,8], index: 8, kind: input, shape index: {}]   ;;  %s10036_s9 = inlined_call_operand.vmem [shape: f32[1,8], index: 9, kind: input, shape index: {}]   ;;  %s10037_s10 = inlined_call_operand.vmem [shape: f32[1,10], index: 10, kind: input, shape index: {}]   ;;  %s10038_s11 = inlined_call_operand.hbm [shape: f32[2,1,10], index: 11, kind: output, shape index: {}]  }
   0x1   :  { %10137 = sst [smem:[#allocation33_spill]] %s10027_s0 }
   0x2   :  { %10138 = sst [smem:[#allocation34_spill]] %s10028_s1 }
   0x3   :  { %10139 = sst [smem:[#allocation35_spill]] %s10029_s2 }
   0x4   :  { %16 = vsyncpa [#allocation3], 0 }
   0x5   :  { %18 = vsyncpa [#allocation3 + $0x1], 0  ;;  %s5653_s17 = smov 0   ;;  %s5655_s18 = smov 0  }
   0x6   :  { %s5657_s19 = smov 0   ;;  %s5659_s20 = smov 0  }
   0x7 LB: > { %s5674_s21 = sadd.s32 4294967295, %s5571_s20   ;;  %s5069_s22 = sadd.s32 4294967294, %s5571_s20   ;;  %s5571_s20 = sphi %s5659_s20, %s10330_s20   ;;  %s5567_s19 = sphi %s5657_s19, %s10329_s19   ;;  %s5563_s18 = sphi %s5655_s18, %s10328_s18   ;;  %s5559_s17 = sphi %s5653_s17, %s10327_s17  }
   0x8   : > { %s5678_s23 = sadd.s32 1, %s5571_s20   ;;  %s267_s24 = sadd.s32 1, %s5567_s19 }
   0x9   : > { %s264_s25 = ssub.s32 %s5571_s20, %s5678_s23  ;;  %p277_p0 = scmp.ne.s32.totalorder %s5567_s19, %s5563_s18 }
   0xa   : > { %p265_p1 = scmp.eq.s32.totalorder %s264_s25, 0  ;;  %p278_p2 = scmp.eq.s32.totalorder %s5674_s21, 1 }
   0xb   : > { %p283_p3 = scmp.ne.s32.totalorder %s5563_s18, %s5559_s17  ;;  %p284_p4 = scmp.eq.s32.totalorder %s5069_s22, 1 }
   0xc   : > { %s5689_s26 = scalar_select %p265_p1, %s5567_s19, %s267_s24  }
   0xd   : > { %p5691_p5 = por %p278_p2, %p277_p0  ;;  %p5695_p6 = por %p284_p4, %p283_p3 }
   0xe   : > { %p5072_p7 = scmp.ge.s32.totalorder %s5571_s20, 1  ;;  %p340_p8 = scmp.lt.s32.totalorder %s5571_s20, 3 }
  0x10   : > { %p341_p9 = pnand %p5072_p7, %p340_p8 }
  0x12   : > { %344 = sbr.rel (%p341_p9) target bundleno = 3012 (0xbc4), region = 64 }
  0x17   : > { %p379_p10 = scmp.lt.s32.totalorder %s5674_s21, 1  ;;  %v419_v0 = vlaneseq  ;;  %s10143_s0 = sld [smem:[#allocation33_spill]]  ;;  %vm10119_vm0 = vcmask 1041408   ;;  %vm10118_vm1 = vcmask 1040384   ;;  %vm1550_vm4 = vcmask 7168  }
  0x18   : > { %s5573_s15 = smov 3   ;;  %s10039_s16 = smov 2   ;;  %vm1583_vm5 = vcmask 15360   ;;  %vm1616_vm6 = vcmask 23552   ;;  %vm1649_vm7 = vcmask 31744   ;;  %vm1682_vm8 = vcmask 39936  }
  0x19   : > { %s380_s29 = scalar_select %p379_p10, %s5674_s21, 1  ;;  %v5703_v1 = vshrl.u32 %v419_v0, 7  ;;  %vm1715_vm9 = vcmask 48128   ;;  %vm1748_vm10 = vcmask 56320   ;;  %vm1781_vm11 = vcmask 64512  }
  0x1a   : > { %s10066_s22 = smov 1   ;;  %s5576_s24 = smov 4   ;;  %vm1820_vm12 = vcmask 72704  }
  0x1b   : > { %10142 = vst [vmem:[#allocation5_spill] sm:$0xff] %v5703_v1  ;;  %s5159_s30 = sshll.u32 %s380_s29, 8  ;;  %vm684_vm2 = vcmp.ge.s32.totalorder %v5703_v1, 2  ;;  %vm552_vm3 = vcmp.ge.s32.totalorder %v5703_v1, 1  ;;  %s10041_s25 = smov 5  }
  0x1c   : > { %s5578_s29 = smov 6   ;;  %s10148_s1 = sld [smem:[#allocation34_spill]] }
  0x1d   : > { %s5708_s14 = scalar_lea.vmem %s10143_s0, %s5159_s30  ;;  %s5579_s13 = smov 7  }
  0x1e   : > { %v5711_v2 = vld [vmem:[%s5708_s14 + $0xf8] sm:$0xff]  ;;  %v5714_v3 = vld [vmem:[%s5708_s14 + $0xf0] sm:$0xff]  ;;  %v5717_v4 = vld [vmem:[%s5708_s14] sm:$0xff]  ;;  %s10150_s30 = smov 2   ;;  %s10200_s2 = sld [smem:[#allocation35_spill]] }
  0x1f   : > { %976 = vrot.lane.b32.xlu1 %v5711_v2, %s5573_s15  ;;  %974 = vrot.lane.b32.xlu0 %v5714_v3, %s5573_s15  ;;  %v5726_v5 = vld [vmem:[%s5708_s14 + $0x8] sm:$0xff]  ;;  %v589_v6 = vrot.slane %v5717_v4, 6  ;;  %v457_v7 = vrot.slane %v5717_v4, 7  ;;  %v5731_v8 = vld [vmem:[%s5708_s14 + $0x10] sm:$0xff]  ;;  %v586_v9 = vrot.slane %v5711_v2, 6  ;;  %v423_v10 = vrot.slane %v5711_v2, 7 }
  0x20   : > { %v590_v11 = vrot.slane %v5726_v5, 6  ;;  %v458_v12 = vrot.slane %v5726_v5, 7  ;;  %v592_v13 = vrot.slane %v5731_v8, 6  ;;  %v460_v14 = vrot.slane %v5731_v8, 7  ;;  %v5740_v15 = vld [vmem:[%s5708_s14 + $0x18] sm:$0xff]  ;;  %v5743_v16 = vld [vmem:[%s5708_s14 + $0x20] sm:$0xff] }
  0x21   : > { %v683_v17 = vsel %vm10119_vm0, %v586_v9, %v589_v6  ;;  %v551_v18 = vsel %vm10118_vm1, %v423_v10, %v457_v7  ;;  %v462_v19 = vrot.slane %v5740_v15, 7  ;;  %v464_v20 = vrot.slane %v5743_v16, 7  ;;  %v5750_v21 = vld [vmem:[%s5708_s14 + $0xe8] sm:$0xff]  ;;  %v5823_v44 = vld [vmem:[%s5708_s14 + $0xd8] sm:$0xff]  ;;  %v412_v45 = vld [vmem:[%s5708_s14 + $0xe0] sm:$0xff]  ;;  %s10134_s12 = smov 64  }
  0x22   : > { %v5753_v22 = vsel %vm10119_vm0, %v589_v6, %v590_v11  ;;  %v5756_v23 = vsel %vm10118_vm1, %v457_v7, %v458_v12  ;;  %v593_v24 = vsel %vm10119_vm0, %v590_v11, %v592_v13  ;;  %v461_v25 = vsel %vm10118_vm1, %v458_v12, %v460_v14  ;;  %v5856_v54 = vld [vmem:[%s5708_s14 + $0x28] sm:$0xff]  ;;  %v5859_v55 = vld [vmem:[%s5708_s14 + $0x30] sm:$0xff]  ;;  %v416_v57 = vld [vmem:[%s10148_s1] sm:$0xff] }
  0x23   : > { %880 = vrot.lane.b32.xlu1 %v5753_v22, %s10039_s16  ;;  %752 = vrot.lane.b32.xlu0 %v5756_v23, %s10066_s22  ;;  %v514_v26 = vrot.slane %v5750_v21, 7  ;;  %v5767_v27 = vsel %vm684_vm2, %v683_v17, %v593_v24  ;;  %v5771_v28 = vsel %vm552_vm3, %v551_v18, %v461_v25  ;;  %v516_v29 = vrot.slane %v5714_v3, 7  ;;  %v417_v56 = vld [vmem:[%s10148_s1 + $0x8] sm:$0x1]  ;;  %s10312_s1 = smov 64  }
  0x24   : > { %v465_v30 = vsel %vm10118_vm1, %v462_v19, %v464_v20  ;;  %v646_v31 = vrot.slane %v5750_v21, 6  ;;  %v648_v32 = vrot.slane %v5714_v3, 6  ;;  %v594_v37 = vrot.slane %v5740_v15, 6  ;;  %5265 = vmatprep.subr.msk.mxu0 %vm10118_vm1, %v417_v56 }
  0x25   : > { %v517_v33 = vsel %vm10118_vm1, %v514_v26, %v516_v29  ;;  %v5786_v34 = vsel %vm552_vm3, %v461_v25, %v465_v30  ;;  %v596_v38 = vrot.slane %v5743_v16, 6  ;;  %v5806_v40 = vsel %vm10118_vm1, %v516_v29, %v423_v10  ;;  %5266 = vmatpush3.msk.msra.mxu0 %vm10118_vm1, %v417_v56 }
  0x26   : > { %v5790_v35 = vsel %vm552_vm3, %v517_v33, %v551_v18  ;;  %v649_v36 = vsel %vm10119_vm0, %v646_v31, %v648_v32  ;;  %10146 = vst [vmem:[#allocation8_spill] sm:$0xff] %v5806_v40  ;;  %v5820_v43 = vsel %vm10118_vm1, %v460_v14, %v462_v19  ;;  %v5831_v46 = vsel %vm10119_vm0, %v648_v32, %v586_v9  ;;  %v5944_v14 = vld [vmem:[%s5708_s14 + $0x38] sm:$0xff] }
  0x27   : > { %878 = vrot.lane.b32.xlu1 %v5767_v27, %s10039_s16  ;;  %750 = vrot.lane.b32.xlu0 %v5771_v28, %s10066_s22  ;;  %10144 = vst [vmem:[#allocation6_spill] sm:$0xff] %v5790_v35  ;;  %v5803_v39 = vsel %vm684_vm2, %v649_v36, %v683_v17  ;;  %v597_v41 = vsel %vm10119_vm0, %v594_v37, %v596_v38  ;;  %10147 = vst [vmem:[#allocation9_spill] sm:$0xff] %v5831_v46  ;;  %v10044_v47 = vrot.slane %v5823_v44, 7  ;;  %v5947_v17 = vld [vmem:[%s5708_s14 + $0x40] sm:$0xff] }
  0x28   : > { %10145 = vst [vmem:[#allocation7_spill] sm:$0xff] %v5803_v39  ;;  %v5817_v42 = vsel %vm684_vm2, %v593_v24, %v597_v41  ;;  %v512_v48 = vrot.slane %v412_v45, 7  ;;  %v5838_v49 = vsel %vm10119_vm0, %v592_v13, %v594_v37  ;;  %v10043_v52 = vrot.slane %v5823_v44, 6  ;;  %5267 = vmatprep.subr.mxu0 %v416_v57 }
  0x29   : > { %v644_v53 = vrot.slane %v412_v45, 6  ;;  %v466_v59 = vrot.slane %v5856_v54, 7  ;;  %v468_v60 = vrot.slane %v5859_v55, 7  ;;  %5268 = vmatpush3.msra.mxu0 %v416_v57  ;;  %v598_v6 = vrot.slane %v5856_v54, 6 }
  0x2a   : > { %v5843_v50 = vsel %vm10118_vm1, %v10044_v47, %v512_v48  ;;  %v5890_v62 = vsel %vm10118_vm1, %v512_v48, %v514_v26  ;;  %v600_v7 = vrot.slane %v5859_v55, 6  ;;  %v472_v18 = vrot.slane %v5947_v17, 7 }
  0x2b   : > { %754 = vrot.lane.b32.xlu1 %v5786_v34, %s10066_s22  ;;  %1070 = vrot.lane.b32.xlu0 %v5790_v35, %s5576_s24  ;;  %v5852_v51 = vsel %vm552_vm3, %v5843_v50, %v517_v33  ;;  %v5875_v58 = vsel %vm10119_vm0, %v10043_v52, %v644_v53  ;;  %v469_v63 = vsel %vm10118_vm1, %v466_v59, %v468_v60 }
  0x2c   : > { %v5887_v61 = vsel %vm684_vm2, %v5875_v58, %v649_v36  ;;  %v5899_v0 = vsel %vm552_vm3, %v465_v30, %v469_v63  ;;  %v5910_v9 = vsel %vm10119_vm0, %v644_v53, %v646_v31  ;;  %v601_v10 = vsel %vm10119_vm0, %v598_v6, %v600_v7  ;;  %v6002_v30 = vld [vmem:[%s5708_s14 + $0x48] sm:$0xff]  ;;  %v6005_v31 = vld [vmem:[%s5708_s14 + $0x50] sm:$0xff] }
  0x2d   : > { %v5919_v11 = vsel %vm684_vm2, %v597_v41, %v601_v10  ;;  %v5924_v12 = vsel %vm10118_vm1, %v464_v20, %v466_v59  ;;  %v5937_v13 = vsel %vm10119_vm0, %v596_v38, %v598_v6  ;;  %v602_v20 = vrot.slane %v5944_v14, 6  ;;  %v6070_v6 = vld [vmem:[%s5708_s14 + $0x58] sm:$0xff] }
  0x2e   : > { %v474_v32 = vrot.slane %v6002_v30, 7  ;;  %v476_v33 = vrot.slane %v6005_v31, 7  ;;  %v606_v37 = vrot.slane %v6002_v30, 6  ;;  %v10046_v38 = vrot.slane %v6005_v31, 6 }
  0x2f   : > { %1166 = vrot.lane.b32.xlu1 %v5803_v39, %s10041_s25  ;;  %1072 = vrot.lane.b32.xlu0 %v5806_v40, %s5576_s24  ;;  %v5995_v29 = vsel %vm10119_vm0, %v600_v7, %v602_v20  ;;  %v6073_v7 = vld [vmem:[%s5708_s14 + $0x60] sm:$0xff]  ;;  %v610_v52 = vrot.slane %v6070_v6, 6 }
  0x30   : > { %v477_v36 = vsel %vm10118_vm1, %v474_v32, %v476_v33  ;;  %v6046_v41 = vsel %vm10118_vm1, %v472_v18, %v474_v32  ;;  %v10047_v47 = vrot.slane %v6073_v7, 6 }
  0x33   : > { %882 = vrot.lane.b32.xlu1 %v5817_v42, %s10039_s16  ;;  %756 = vrot.lane.b32.xlu0 %v5820_v43, %s10066_s22 }
  0x37   : > { %1262 = vrot.lane.b32.xlu1 %v412_v45, %s5578_s29  ;;  %1168 = vrot.lane.b32.xlu0 %v5831_v46, %s10041_s25  ;;  %s10149_s25 = smov 5  }
  0x3b   : > { %978 = vrot.lane.b32.xlu1 %v5717_v4, %s5573_s15  ;;  %884 = vrot.lane.b32.xlu0 %v5838_v49, %s10039_s16  ;;  %s10090_s16 = smov 8  }
  0x3f   : > { %1358 = vrot.lane.b32.xlu1 %v5852_v51, %s5579_s13  ;;  %1264 = vrot.lane.b32.xlu0 %v5750_v21, %s5578_s29  ;;  %v604_v21 = vrot.slane %v5947_v17, 6 }
  0x41   : > { %v605_v24 = vsel %vm10119_vm0, %v602_v20, %v604_v21  ;;  %v6061_v56 = vsel %vm10119_vm0, %v604_v21, %v606_v37 }
  0x42   : > { %v5981_v25 = vsel %vm684_vm2, %v601_v10, %v605_v24 }
  0x43   : > { %1074 = vrot.lane.b32.xlu1 %v5771_v28, %s5576_s24  ;;  %980 = vrot.lane.b32.xlu0 %v5726_v5, %s5573_s15 }
  0x47   : > { %1454 = vrot.lane.b32.xlu1 %v5887_v61, %s10090_s16  ;;  %1360 = vrot.lane.b32.xlu0 %v5890_v62, %s5579_s13 }
  0x4b   : > { %1076 = vrot.lane.b32.xlu1 %v5756_v23, %s5576_s24  ;;  %758 = vrot.lane.b32.xlu0 %v5899_v0, %s10066_s22 }
  0x4f   : > { %1456 = vrot.lane.b32.xlu1 %v5910_v9, %s10090_s16  ;;  %1170 = vrot.lane.b32.xlu0 %v5767_v27, %s10149_s25 }
  0x53   : > { %886 = vrot.lane.b32.xlu1 %v5919_v11, %s10150_s30  ;;  %760 = vrot.lane.b32.xlu0 %v5924_v12, %s10066_s22 }
  0x57   : > { %1266 = vrot.lane.b32.xlu1 %v5714_v3, %s5578_s29  ;;  %1172 = vrot.lane.b32.xlu0 %v5753_v22, %s10149_s25  ;;  %v470_v3 = vrot.slane %v5944_v14, 7 }
  0x59   : > { %v473_v19 = vsel %vm10118_vm1, %v470_v3, %v472_v18  ;;  %v5984_v26 = vsel %vm10118_vm1, %v468_v60, %v470_v3  ;;  %v478_v18 = vrot.slane %v6070_v6, 7 }
  0x5b   : > { %982 = vrot.lane.b32.xlu1 %v5731_v8, %s5573_s15  ;;  %888 = vrot.lane.b32.xlu0 %v5937_v13, %s10150_s30 }
  0x5f   : > { %1362 = vrot.lane.b32.xlu1 %v5790_v35, %s5579_s13  ;;  %1268 = vrot.lane.b32.xlu0 %v5711_v2, %s5578_s29  ;;  %v5966_v2 = vsel %vm552_vm3, %v469_v63, %v473_v19 }
  0x63   : > { %1078 = vrot.lane.b32.xlu1 %v5786_v34, %s5576_s24  ;;  %984 = vrot.lane.b32.xlu0 %v5740_v15, %s5573_s15 }
  0x67   : > { %1458 = vrot.lane.b32.xlu1 %v5803_v39, %s10090_s16  ;;  %1364 = vrot.lane.b32.xlu0 %v5806_v40, %s5579_s13 }
  0x6b   : > { %1080 = vrot.lane.b32.xlu1 %v5820_v43, %s5576_s24  ;;  %762 = vrot.lane.b32.xlu0 %v5966_v2, %s10066_s22 }
  0x6f   : > { %1460 = vrot.lane.b32.xlu1 %v5831_v46, %s10090_s16  ;;  %1174 = vrot.lane.b32.xlu0 %v5817_v42, %s10149_s25 }
  0x73   : > { %890 = vrot.lane.b32.xlu1 %v5981_v25, %s10150_s30  ;;  %764 = vrot.lane.b32.xlu0 %v5984_v26, %s10066_s22 }
  0x77   : > { %1270 = vrot.lane.b32.xlu1 %v5717_v4, %s5578_s29  ;;  %1176 = vrot.lane.b32.xlu0 %v5838_v49, %s10149_s25 }
  0x7b   : > { %986 = vrot.lane.b32.xlu1 %v5743_v16, %s5573_s15  ;;  %892 = vrot.lane.b32.xlu0 %v5995_v29, %s10150_s30 }
  0x7f   : > { %1366 = vrot.lane.b32.xlu1 %v5771_v28, %s5579_s13  ;;  %1272 = vrot.lane.b32.xlu0 %v5726_v5, %s5578_s29  ;;  %v6026_v28 = vsel %vm552_vm3, %v473_v19, %v477_v36  ;;  %v10045_v19 = vrot.slane %v6073_v7, 7 }
  0x83   : > { %1082 = vrot.lane.b32.xlu1 %v5899_v0, %s5576_s24  ;;  %988 = vrot.lane.b32.xlu0 %v5856_v54, %s5573_s15 }
  0x87   : > { %1462 = vrot.lane.b32.xlu1 %v5767_v27, %s10090_s16  ;;  %1368 = vrot.lane.b32.xlu0 %v5756_v23, %s5579_s13  ;;  %v609_v27 = vsel %vm10119_vm0, %v606_v37, %v10046_v38 }
  0x88   : > { %v6043_v23 = vsel %vm684_vm2, %v605_v24, %v609_v27 }
  0x8b   : > { %1084 = vrot.lane.b32.xlu1 %v5924_v12, %s5576_s24  ;;  %766 = vrot.lane.b32.xlu0 %v6026_v28, %s10066_s22 }
  0x8f   : > { %1464 = vrot.lane.b32.xlu1 %v5753_v22, %s10090_s16  ;;  %1178 = vrot.lane.b32.xlu0 %v5919_v11, %s10149_s25 }
  0x91   : > { %v6048_v45 = vpop.permute.xlu1 %976  ;;  %v975_v48 = vpop.permute.xlu0 %974 }
  0x93   : > { %894 = vrot.lane.b32.xlu1 %v6043_v23, %s10150_s30  ;;  %768 = vrot.lane.b32.xlu0 %v6046_v41, %s10066_s22 }
  0x95   : > { %v6054_v22 = vpop.permute.xlu1 %880  ;;  %v753_v53 = vpop.permute.xlu0 %752 }
  0x97   : > { %1274 = vrot.lane.b32.xlu1 %v5731_v8, %s5578_s29  ;;  %1180 = vrot.lane.b32.xlu0 %v5937_v13, %s10149_s25 }
  0x99   : > { %v879_v57 = vpop.permute.xlu1 %878  ;;  %v751_v59 = vpop.permute.xlu0 %750 }
  0x9b   : > { %990 = vrot.lane.b32.xlu1 %v5859_v55, %s5573_s15  ;;  %896 = vrot.lane.b32.xlu0 %v6061_v56, %s10150_s30 }
  0x9d   : > { %v6067_v60 = vpop.permute.xlu1 %754  ;;  %v1071_v63 = vpop.permute.xlu0 %1070 }
  0x9f   : > { %1370 = vrot.lane.b32.xlu1 %v5786_v34, %s5579_s13  ;;  %1276 = vrot.lane.b32.xlu0 %v5740_v15, %s5578_s29  ;;  %v6092_v34 = vsel %vm10118_vm1, %v478_v18, %v10045_v19  ;;  %v6118_v19 = vsel %vm10119_vm0, %v610_v52, %v10047_v47 }
  0xa0   : > { %v6101_v24 = vsel %vm552_vm3, %v477_v36, %v6092_v34 }
  0xa1   : > { %v1167_v10 = vpop.permute.xlu1 %1166  ;;  %v1073_v3 = vpop.permute.xlu0 %1072 }
  0xa3   : > { %1086 = vrot.lane.b32.xlu1 %v5966_v2, %s5576_s24  ;;  %992 = vrot.lane.b32.xlu0 %v5944_v14, %s5573_s15 }
  0xa5   : > { %v6085_v20 = vpop.permute.xlu1 %882  ;;  %v6087_v21 = vpop.permute.xlu0 %756 }
  0xa7   : > { %1466 = vrot.lane.b32.xlu1 %v5817_v42, %s10090_s16  ;;  %1372 = vrot.lane.b32.xlu0 %v5820_v43, %s5579_s13  ;;  %v1551_v42 = vsel %vm1550_vm4, %v5717_v4, %v751_v59  ;;  %v6128_v4 = vsel %vm684_vm2, %v609_v27, %v6118_v19  ;;  %v6133_v59 = vsel %vm10118_vm1, %v476_v33, %v478_v18 }
  0xa8   : > { %v1584_v38 = vsel %vm1583_vm5, %v1551_v42, %v879_v57  ;;  %v1552_v18 = vsel %vm1550_vm4, %v5726_v5, %v753_v53  ;;  %v10151_v42 = vrot.slane %v6005_v31, 6 }
  0xa9   : > { %v1263_v32 = vpop.permute.xlu1 %1262  ;;  %v1169_v37 = vpop.permute.xlu0 %1168 }
  0xab   : > { %1088 = vrot.lane.b32.xlu1 %v5984_v26, %s5576_s24  ;;  %770 = vrot.lane.b32.xlu0 %v6101_v24, %s10066_s22 }
  0xad   : > { %v6111_v43 = vpop.permute.xlu1 %978  ;;  %v6113_v36 = vpop.permute.xlu0 %884 }
  0xaf   : > { %1468 = vrot.lane.b32.xlu1 %v5838_v49, %s10090_s16  ;;  %1182 = vrot.lane.b32.xlu0 %v5981_v25, %s10149_s25  ;;  %v1617_v49 = vsel %vm1616_vm6, %v1584_v38, %v975_v48 }
  0xb0   : > { %v1650_v33 = vsel %vm1649_vm7, %v1617_v49, %v1071_v63  ;;  %v6156_v63 = vsel %vm10119_vm0, %v10151_v42, %v610_v52  ;;  %v1585_v49 = vsel %vm1583_vm5, %v1552_v18, %v6054_v22  ;;  %v6175_v22 = vld [vmem:[%s5708_s14 + $0x68] sm:$0xff]  ;;  %v6178_v18 = vld [vmem:[%s5708_s14 + $0x70] sm:$0xff] }
  0xb1   : > { %v1359_v47 = vpop.permute.xlu1 %1358  ;;  %v1265_v46 = vpop.permute.xlu0 %1264  ;;  %v1683_v38 = vsel %vm1682_vm8, %v1650_v33, %v1167_v10  ;;  %v1618_v52 = vsel %vm1616_vm6, %v1585_v49, %v6048_v45  ;;  %v10049_v49 = vrot.slane %v6178_v18, 7 }
  0xb2   : > { %v1716_v48 = vsel %vm1715_vm9, %v1683_v38, %v1263_v32  ;;  %v1651_v38 = vsel %vm1649_vm7, %v1618_v52, %v1073_v3  ;;  %v482_v3 = vrot.slane %v6175_v22, 7 }
  0xb3   : > { %898 = vrot.lane.b32.xlu1 %v6128_v4, %s10150_s30  ;;  %772 = vrot.lane.b32.xlu0 %v6133_v59, %s10066_s22  ;;  %v1749_v5 = vsel %vm1748_vm10, %v1716_v48, %v1359_v47  ;;  %v1684_v48 = vsel %vm1682_vm8, %v1651_v38, %v1169_v37 }
  0xb4   : > { %v1717_v45 = vsel %vm1715_vm9, %v1684_v48, %v1265_v46  ;;  %v6202_v37 = vsel %vm10118_vm1, %v482_v3, %v10049_v49  ;;  %v614_v48 = vrot.slane %v6175_v22, 6 }
  0xb5   : > { %v6140_v27 = vpop.permute.xlu1 %1074  ;;  %v6142_v57 = vpop.permute.xlu0 %980 }
  0xb7   : > { %1278 = vrot.lane.b32.xlu1 %v5743_v16, %s5578_s29  ;;  %1184 = vrot.lane.b32.xlu0 %v5995_v29, %s10149_s25 }
  0xb9   : > { %v1455_v53 = vpop.permute.xlu1 %1454  ;;  %v1361_v10 = vpop.permute.xlu0 %1360 }
  0xba   : > { %v1782_v33 = vsel %vm1781_vm11, %v1749_v5, %v1455_v53  ;;  %v1750_v42 = vsel %vm1748_vm10, %v1717_v45, %v1361_v10  ;;  %v6212_v10 = vsel %vm552_vm3, %v6092_v34, %v6202_v37  ;;  %v10050_v45 = vrot.slane %v6178_v18, 6 }
  0xbb   : > { %994 = vrot.lane.b32.xlu1 %v5947_v17, %s5573_s15  ;;  %900 = vrot.lane.b32.xlu0 %v6156_v63, %s10150_s30 }
  0xbc   : > { %5269 = vmatprep.mubr.msk.f32.mxu0 %vm1820_vm12, %v1782_v33  ;;  %v6227_v34 = vsel %vm10119_vm0, %v614_v48, %v10050_v45 }
  0xbd   : > { %v6169_v47 = vpop.permute.xlu1 %1076  ;;  %v6171_v32 = vpop.permute.xlu0 %758 }
  0xbf   : > { %1374 = vrot.lane.b32.xlu1 %v5899_v0, %s5579_s13  ;;  %1280 = vrot.lane.b32.xlu0 %v5856_v54, %s5578_s29 }
  0xc1   : > { %v1457_v5 = vpop.permute.xlu1 %1456  ;;  %v1171_v53 = vpop.permute.xlu0 %1170 }
  0xc2   : > { %v1783_v33 = vsel %vm1781_vm11, %v1750_v42, %v1457_v5  ;;  %v6237_v42 = vsel %vm684_vm2, %v6118_v19, %v6227_v34  ;;  %v10152_v5 = vrot.slane %v6073_v7, 7 }
  0xc3   : > { %1090 = vrot.lane.b32.xlu1 %v6026_v28, %s5576_s24  ;;  %996 = vrot.lane.b32.xlu0 %v6002_v30, %s5573_s15 }
  0xc4   : > { %5270 = vmatmul.mubr.msk.f32.vlgmr.msra.gmra.mxu0 %vm1820_vm12, %v1783_v33  ;;  %v6242_v33 = vsel %vm10118_vm1, %v10152_v5, %v482_v3 }
  0xc5   : > { %v6195_v0 = vpop.permute.xlu1 %886  ;;  %v6197_v46 = vpop.permute.xlu0 %760 }
  0xc7   : > { %1470 = vrot.lane.b32.xlu1 %v5919_v11, %s10090_s16  ;;  %1376 = vrot.lane.b32.xlu0 %v5924_v12, %s5579_s13 }
  0xc9   : > { %v1267_v52 = vpop.permute.xlu1 %1266  ;;  %v1173_v38 = vpop.permute.xlu0 %1172 }
  0xcb   : > { %1092 = vrot.lane.b32.xlu1 %v6046_v41, %s5576_s24  ;;  %774 = vrot.lane.b32.xlu0 %v6212_v10, %s10066_s22 }
  0xcd   : > { %v6220_v11 = vpop.permute.xlu1 %982  ;;  %v6222_v12 = vpop.permute.xlu0 %888 }
  0xcf   : > { %1472 = vrot.lane.b32.xlu1 %v5937_v13, %s10090_s16  ;;  %1186 = vrot.lane.b32.xlu0 %v6043_v23, %s10149_s25  ;;  %v1553_v13 = vsel %vm1550_vm4, %v5731_v8, %v6067_v60 }
  0xd0   : > { %v1586_v19 = vsel %vm1583_vm5, %v1553_v13, %v6085_v20  ;;  %v10153_v20 = vrot.slane %v6073_v7, 6 }
  0xd1   : > { %v1363_v49 = vpop.permute.xlu1 %1362  ;;  %v1269_v45 = vpop.permute.xlu0 %1268  ;;  %v1619_v40 = vsel %vm1616_vm6, %v1586_v19, %v6111_v43 }
  0xd2   : > { %v1652_v39 = vsel %vm1649_vm7, %v1619_v40, %v6140_v27  ;;  %v6270_v43 = vsel %vm10119_vm0, %v10153_v20, %v614_v48 }
  0xd3   : > { %902 = vrot.lane.b32.xlu1 %v6237_v42, %s10150_s30  ;;  %776 = vrot.lane.b32.xlu0 %v6242_v33, %s10066_s22  ;;  %v1685_v8 = vsel %vm1682_vm8, %v1652_v39, %v1171_v53  ;;  %v1554_v53 = vsel %vm1550_vm4, %v5740_v15, %v6087_v21  ;;  %v6293_v21 = vld [vmem:[%s5708_s14 + $0x78] sm:$0xff] }
  0xd4   : > { %v1718_v60 = vsel %vm1715_vm9, %v1685_v8, %v1267_v52  ;;  %v1587_v52 = vsel %vm1583_vm5, %v1554_v53, %v6113_v36  ;;  %v6296_v8 = vld [vmem:[%s5708_s14 + $0x80] sm:$0xff] }
  0xd5   : > { %v6255_v3 = vpop.permute.xlu1 %1078  ;;  %v6257_v5 = vpop.permute.xlu0 %984  ;;  %v1751_v13 = vsel %vm1748_vm10, %v1718_v60, %v1363_v49  ;;  %v1620_v49 = vsel %vm1616_vm6, %v1587_v52, %v6142_v57 }
  0xd6   : > { %v1653_v15 = vsel %vm1649_vm7, %v1620_v49, %v6169_v47  ;;  %v486_v47 = vrot.slane %v6293_v21, 7  ;;  %v618_v49 = vrot.slane %v6293_v21, 6 }
  0xd7   : > { %1282 = vrot.lane.b32.xlu1 %v5859_v55, %s5578_s29  ;;  %1188 = vrot.lane.b32.xlu0 %v6061_v56, %s10149_s25  ;;  %v1686_v60 = vsel %vm1682_vm8, %v1653_v15, %v1173_v38  ;;  %v10053_v15 = vrot.slane %v6296_v8, 6 }
  0xd8   : > { %v1719_v36 = vsel %vm1715_vm9, %v1686_v60, %v1269_v45 }
  0xd9   : > { %v1459_v40 = vpop.permute.xlu1 %1458  ;;  %v1365_v27 = vpop.permute.xlu0 %1364 }
  0xda   : > { %v1784_v39 = vsel %vm1781_vm11, %v1751_v13, %v1459_v40  ;;  %v1752_v57 = vsel %vm1748_vm10, %v1719_v36, %v1365_v27  ;;  %v10054_v40 = vrot.slane %v6296_v8, 7  ;;  %v10154_v36 = vrot.slane %v6178_v18, 7 }
  0xdb   : > { %998 = vrot.lane.b32.xlu1 %v6005_v31, %s5573_s15  ;;  %904 = vrot.lane.b32.xlu0 %v6270_v43, %s10150_s30 }
  0xdc   : > { %5272 = vmatprep.mubr.msk.f32.mxu0 %vm1820_vm12, %v1784_v39  ;;  %v6320_v45 = vsel %vm10118_vm1, %v486_v47, %v10054_v40 }
  0xdd   : > { %v6286_v48 = vpop.permute.xlu1 %1080  ;;  %v6288_v19 = vpop.permute.xlu0 %762  ;;  %v6330_v27 = vsel %vm552_vm3, %v6202_v37, %v6320_v45  ;;  %v6345_v37 = vsel %vm10119_vm0, %v618_v49, %v10053_v15 }
  0xde   : > { %v6355_v60 = vsel %vm684_vm2, %v6227_v34, %v6345_v37 }
  0xdf   : > { %1378 = vrot.lane.b32.xlu1 %v5966_v2, %s5579_s13  ;;  %1284 = vrot.lane.b32.xlu0 %v5944_v14, %s5578_s29 }
  0xe1   : > { %v1461_v20 = vpop.permute.xlu1 %1460  ;;  %v1175_v13 = vpop.permute.xlu0 %1174 }
  0xe2   : > { %v1785_v39 = vsel %vm1781_vm11, %v1752_v57, %v1461_v20  ;;  %v6360_v57 = vsel %vm10118_vm1, %v10154_v36, %v486_v47 }
  0xe3   : > { %1094 = vrot.lane.b32.xlu1 %v6101_v24, %s5576_s24  ;;  %1000 = vrot.lane.b32.xlu0 %v6070_v6, %s5573_s15 }
  0xe4   : > { %5273 = vmatmul.mubr.msk.f32.gmra.mxu0 %vm1820_vm12, %v1785_v39 }
  0xe5   : > { %v6313_v2 = vpop.permute.xlu1 %890  ;;  %v6315_v38 = vpop.permute.xlu0 %764 }
  0xe7   : > { %1474 = vrot.lane.b32.xlu1 %v5981_v25, %s10090_s16  ;;  %1380 = vrot.lane.b32.xlu0 %v5984_v26, %s5579_s13 }
  0xe9   : > { %v1271_v53 = vpop.permute.xlu1 %1270  ;;  %v1177_v52 = vpop.permute.xlu0 %1176 }
  0xeb   : > { %1096 = vrot.lane.b32.xlu1 %v6133_v59, %s5576_s24  ;;  %778 = vrot.lane.b32.xlu0 %v6330_v27, %s10066_s22 }
  0xed   : > { %v6338_v25 = vpop.permute.xlu1 %986  ;;  %v6340_v26 = vpop.permute.xlu0 %892 }
  0xef   : > { %1476 = vrot.lane.b32.xlu1 %v5995_v29, %s10090_s16  ;;  %1190 = vrot.lane.b32.xlu0 %v6128_v4, %s10149_s25  ;;  %v1555_v29 = vsel %vm1550_vm4, %v5743_v16, %v6171_v32 }
  0xf0   : > { %v1588_v34 = vsel %vm1583_vm5, %v1555_v29, %v6195_v0  ;;  %v10155_v0 = vrot.slane %v6178_v18, 6 }
  0xf1   : > { %v1367_v20 = vpop.permute.xlu1 %1366  ;;  %v1273_v39 = vpop.permute.xlu0 %1272  ;;  %v1621_v15 = vsel %vm1616_vm6, %v1588_v34, %v6220_v11 }
  0xf2   : > { %v1654_v40 = vsel %vm1649_vm7, %v1621_v15, %v6255_v3  ;;  %v6388_v11 = vsel %vm10119_vm0, %v10155_v0, %v618_v49 }
  0xf3   : > { %906 = vrot.lane.b32.xlu1 %v6355_v60, %s10150_s30  ;;  %780 = vrot.lane.b32.xlu0 %v6360_v57, %s10066_s22  ;;  %v1687_v16 = vsel %vm1682_vm8, %v1654_v40, %v1175_v13  ;;  %v1556_v40 = vsel %vm1550_vm4, %v5856_v54, %v6197_v46  ;;  %v6411_v46 = vld [vmem:[%s5708_s14 + $0x88] sm:$0xff] }
  0xf4   : > { %v1720_v32 = vsel %vm1715_vm9, %v1687_v16, %v1271_v53  ;;  %v1589_v53 = vsel %vm1583_vm5, %v1556_v40, %v6222_v12  ;;  %v6414_v16 = vld [vmem:[%s5708_s14 + $0x90] sm:$0xff] }
  0xf5   : > { %v6373_v47 = vpop.permute.xlu1 %1082  ;;  %v6375_v36 = vpop.permute.xlu0 %988  ;;  %v1753_v29 = vsel %vm1748_vm10, %v1720_v32, %v1367_v20  ;;  %v1622_v49 = vsel %vm1616_vm6, %v1589_v53, %v6257_v5 }
  0xf6   : > { %v1655_v54 = vsel %vm1649_vm7, %v1622_v49, %v6286_v48  ;;  %v490_v48 = vrot.slane %v6411_v46, 7  ;;  %v622_v49 = vrot.slane %v6411_v46, 6 }
  0xf7   : > { %1286 = vrot.lane.b32.xlu1 %v5947_v17, %s5578_s29  ;;  %1192 = vrot.lane.b32.xlu0 %v6156_v63, %s10149_s25  ;;  %v1688_v32 = vsel %vm1682_vm8, %v1655_v54, %v1177_v52  ;;  %v10055_v54 = vrot.slane %v6414_v16, 6 }
  0xf8   : > { %v1721_v12 = vsel %vm1715_vm9, %v1688_v32, %v1273_v39 }
  0xf9   : > { %v1463_v3 = vpop.permute.xlu1 %1462  ;;  %v1369_v15 = vpop.permute.xlu0 %1368 }
  0xfa   : > { %v1786_v13 = vsel %vm1781_vm11, %v1753_v29, %v1463_v3  ;;  %v1754_v5 = vsel %vm1748_vm10, %v1721_v12, %v1369_v15  ;;  %v10056_v3 = vrot.slane %v6414_v16, 7  ;;  %v10156_v12 = vrot.slane %v6296_v8, 7 }
  0xfb   : > { %1002 = vrot.lane.b32.xlu1 %v6073_v7, %s5573_s15  ;;  %908 = vrot.lane.b32.xlu0 %v6388_v11, %s10150_s30 }
  0xfc   : > { %5275 = vmatprep.mubr.msk.f32.mxu0 %vm1820_vm12, %v1786_v13  ;;  %v6438_v39 = vsel %vm10118_vm1, %v490_v48, %v10056_v3 }
  0xfd   : > { %v6404_v20 = vpop.permute.xlu1 %1084  ;;  %v6406_v34 = vpop.permute.xlu0 %766  ;;  %v6448_v15 = vsel %vm552_vm3, %v6320_v45, %v6438_v39  ;;  %v6463_v45 = vsel %vm10119_vm0, %v622_v49, %v10055_v54 }
  0xfe   : > { %v6473_v32 = vsel %vm684_vm2, %v6345_v37, %v6463_v45 }
  0xff   : > { %1382 = vrot.lane.b32.xlu1 %v6026_v28, %s5579_s13  ;;  %1288 = vrot.lane.b32.xlu0 %v6002_v30, %s5578_s29 }
 0x101   : > { %v1465_v0 = vpop.permute.xlu1 %1464  ;;  %v1179_v29 = vpop.permute.xlu0 %1178 }
 0x102   : > { %v1787_v13 = vsel %vm1781_vm11, %v1754_v5, %v1465_v0  ;;  %v6478_v5 = vsel %vm10118_vm1, %v10156_v12, %v490_v48 }
 0x103   : > { %1098 = vrot.lane.b32.xlu1 %v6212_v10, %s5576_s24  ;;  %1004 = vrot.lane.b32.xlu0 %v6175_v22, %s5573_s15 }
 0x104   : > { %5276 = vmatmul.mubr.msk.f32.gmra.mxu0 %vm1820_vm12, %v1787_v13 }
 0x105   : > { %v6431_v28 = vpop.permute.xlu1 %894  ;;  %v6433_v52 = vpop.permute.xlu0 %768 }
 0x107   : > { %1478 = vrot.lane.b32.xlu1 %v6043_v23, %s10090_s16  ;;  %1384 = vrot.lane.b32.xlu0 %v6046_v41, %s5579_s13 }
 0x109   : > { %v1275_v40 = vpop.permute.xlu1 %1274  ;;  %v1181_v53 = vpop.permute.xlu0 %1180 }
 0x10b   : > { %1100 = vrot.lane.b32.xlu1 %v6242_v33, %s5576_s24  ;;  %782 = vrot.lane.b32.xlu0 %v6448_v15, %s10066_s22 }
 0x10d   : > { %v6456_v23 = vpop.permute.xlu1 %990  ;;  %v6458_v41 = vpop.permute.xlu0 %896 }
 0x10f   : > { %1480 = vrot.lane.b32.xlu1 %v6061_v56, %s10090_s16  ;;  %1194 = vrot.lane.b32.xlu0 %v6237_v42, %s10149_s25  ;;  %v1557_v56 = vsel %vm1550_vm4, %v5859_v55, %v6288_v19 }
 0x110   : > { %v1590_v37 = vsel %vm1583_vm5, %v1557_v56, %v6313_v2  ;;  %v10157_v2 = vrot.slane %v6296_v8, 6 }
 0x111   : > { %v1371_v0 = vpop.permute.xlu1 %1370  ;;  %v1277_v13 = vpop.permute.xlu0 %1276  ;;  %v1623_v54 = vsel %vm1616_vm6, %v1590_v37, %v6338_v25 }
 0x112   : > { %v1656_v3 = vsel %vm1649_vm7, %v1623_v54, %v6373_v47  ;;  %v6506_v25 = vsel %vm10119_vm0, %v10157_v2, %v622_v49 }
 0x113   : > { %910 = vrot.lane.b32.xlu1 %v6473_v32, %s10150_s30  ;;  %784 = vrot.lane.b32.xlu0 %v6478_v5, %s10066_s22  ;;  %v1689_v55 = vsel %vm1682_vm8, %v1656_v3, %v1179_v29  ;;  %v1558_v3 = vsel %vm1550_vm4, %v5944_v14, %v6315_v38  ;;  %v6529_v38 = vld [vmem:[%s5708_s14 + $0x98] sm:$0xff] }
 0x114   : > { %v1722_v19 = vsel %vm1715_vm9, %v1689_v55, %v1275_v40  ;;  %v1591_v40 = vsel %vm1583_vm5, %v1558_v3, %v6340_v26  ;;  %v6532_v55 = vld [vmem:[%s5708_s14 + $0xa0] sm:$0xff] }
 0x115   : > { %v6491_v48 = vpop.permute.xlu1 %1086  ;;  %v6493_v12 = vpop.permute.xlu0 %992  ;;  %v1755_v56 = vsel %vm1748_vm10, %v1722_v19, %v1371_v0  ;;  %v1624_v49 = vsel %vm1616_vm6, %v1591_v40, %v6375_v36 }
 0x116   : > { %v1657_v14 = vsel %vm1649_vm7, %v1624_v49, %v6404_v20  ;;  %v494_v20 = vrot.slane %v6529_v38, 7  ;;  %v626_v49 = vrot.slane %v6529_v38, 6 }
 0x117   : > { %1290 = vrot.lane.b32.xlu1 %v6005_v31, %s5578_s29  ;;  %1196 = vrot.lane.b32.xlu0 %v6270_v43, %s10149_s25  ;;  %v1690_v19 = vsel %vm1682_vm8, %v1657_v14, %v1181_v53  ;;  %v10057_v14 = vrot.slane %v6532_v55, 6 }
 0x118   : > { %v1723_v26 = vsel %vm1715_vm9, %v1690_v19, %v1277_v13 }
 0x119   : > { %v1467_v47 = vpop.permute.xlu1 %1466  ;;  %v1373_v54 = vpop.permute.xlu0 %1372 }
 0x11a   : > { %v1788_v29 = vsel %vm1781_vm11, %v1755_v56, %v1467_v47  ;;  %v1756_v36 = vsel %vm1748_vm10, %v1723_v26, %v1373_v54  ;;  %v10058_v47 = vrot.slane %v6532_v55, 7  ;;  %v10158_v26 = vrot.slane %v6414_v16, 7 }
 0x11b   : > { %1006 = vrot.lane.b32.xlu1 %v6178_v18, %s5573_s15  ;;  %912 = vrot.lane.b32.xlu0 %v6506_v25, %s10150_s30 }
 0x11c   : > { %5278 = vmatprep.mubr.msk.f32.mxu0 %vm1820_vm12, %v1788_v29  ;;  %v6556_v13 = vsel %vm10118_vm1, %v494_v20, %v10058_v47 }
 0x11d   : > { %v6522_v0 = vpop.permute.xlu1 %1088  ;;  %v6524_v37 = vpop.permute.xlu0 %770  ;;  %v6566_v54 = vsel %vm552_vm3, %v6438_v39, %v6556_v13  ;;  %v6581_v39 = vsel %vm10119_vm0, %v626_v49, %v10057_v14 }
 0x11e   : > { %v6591_v19 = vsel %vm684_vm2, %v6463_v45, %v6581_v39 }
 0x11f   : > { %1386 = vrot.lane.b32.xlu1 %v6101_v24, %s5579_s13  ;;  %1292 = vrot.lane.b32.xlu0 %v6070_v6, %s5578_s29 }
 0x121   : > { %v1469_v2 = vpop.permute.xlu1 %1468  ;;  %v1183_v56 = vpop.permute.xlu0 %1182 }
 0x122   : > { %v1789_v29 = vsel %vm1781_vm11, %v1756_v36, %v1469_v2  ;;  %v6596_v36 = vsel %vm10118_vm1, %v10158_v26, %v494_v20 }
 0x123   : > { %1102 = vrot.lane.b32.xlu1 %v6330_v27, %s5576_s24  ;;  %1008 = vrot.lane.b32.xlu0 %v6293_v21, %s5573_s15 }
 0x124   : > { %5279 = vmatmul.mubr.msk.f32.gmra.mxu0 %vm1820_vm12, %v1789_v29 }
 0x125   : > { %v6549_v24 = vpop.permute.xlu1 %898  ;;  %v6551_v53 = vpop.permute.xlu0 %772 }
 0x127   : > { %1482 = vrot.lane.b32.xlu1 %v6128_v4, %s10090_s16  ;;  %1388 = vrot.lane.b32.xlu0 %v6133_v59, %s5579_s13 }
 0x129   : > { %v1279_v3 = vpop.permute.xlu1 %1278  ;;  %v1185_v40 = vpop.permute.xlu0 %1184 }
 0x12b   : > { %1104 = vrot.lane.b32.xlu1 %v6360_v57, %s5576_s24  ;;  %786 = vrot.lane.b32.xlu0 %v6566_v54, %s10066_s22 }
 0x12d   : > { %v6574_v4 = vpop.permute.xlu1 %994  ;;  %v6576_v59 = vpop.permute.xlu0 %900 }
 0x12f   : > { %1484 = vrot.lane.b32.xlu1 %v6156_v63, %s10090_s16  ;;  %1198 = vrot.lane.b32.xlu0 %v6355_v60, %s10149_s25  ;;  %v1559_v63 = vsel %vm1550_vm4, %v5947_v17, %v6406_v34 }
 0x130   : > { %v1592_v45 = vsel %vm1583_vm5, %v1559_v63, %v6431_v28  ;;  %v10159_v28 = vrot.slane %v6414_v16, 6 }
 0x131   : > { %v1375_v2 = vpop.permute.xlu1 %1374  ;;  %v1281_v29 = vpop.permute.xlu0 %1280  ;;  %v1625_v14 = vsel %vm1616_vm6, %v1592_v45, %v6456_v23 }
 0x132   : > { %v1658_v47 = vsel %vm1649_vm7, %v1625_v14, %v6491_v48  ;;  %v6624_v23 = vsel %vm10119_vm0, %v10159_v28, %v626_v49 }
 0x133   : > { %914 = vrot.lane.b32.xlu1 %v6591_v19, %s10150_s30  ;;  %788 = vrot.lane.b32.xlu0 %v6596_v36, %s10066_s22  ;;  %v1691_v17 = vsel %vm1682_vm8, %v1658_v47, %v1183_v56  ;;  %v1560_v47 = vsel %vm1550_vm4, %v6002_v30, %v6433_v52  ;;  %v6647_v52 = vld [vmem:[%s5708_s14 + $0xa8] sm:$0xff] }
 0x134   : > { %v1724_v34 = vsel %vm1715_vm9, %v1691_v17, %v1279_v3  ;;  %v1593_v3 = vsel %vm1583_vm5, %v1560_v47, %v6458_v41  ;;  %v6650_v17 = vld [vmem:[%s5708_s14 + $0xb0] sm:$0xff] }
 0x135   : > { %v6609_v20 = vpop.permute.xlu1 %1090  ;;  %v6611_v26 = vpop.permute.xlu0 %996  ;;  %v1757_v63 = vsel %vm1748_vm10, %v1724_v34, %v1375_v2  ;;  %v1626_v49 = vsel %vm1616_vm6, %v1593_v3, %v6493_v12 }
 0x136   : > { %v1659_v30 = vsel %vm1649_vm7, %v1626_v49, %v6522_v0  ;;  %v498_v0 = vrot.slane %v6647_v52, 7  ;;  %v630_v49 = vrot.slane %v6647_v52, 6 }
 0x137   : > { %1294 = vrot.lane.b32.xlu1 %v6073_v7, %s5578_s29  ;;  %1200 = vrot.lane.b32.xlu0 %v6388_v11, %s10149_s25  ;;  %v1692_v34 = vsel %vm1682_vm8, %v1659_v30, %v1185_v40  ;;  %v10059_v30 = vrot.slane %v6650_v17, 6 }
 0x138   : > { %v1725_v41 = vsel %vm1715_vm9, %v1692_v34, %v1281_v29 }
 0x139   : > { %v1471_v48 = vpop.permute.xlu1 %1470  ;;  %v1377_v14 = vpop.permute.xlu0 %1376 }
 0x13a   : > { %v1790_v56 = vsel %vm1781_vm11, %v1757_v63, %v1471_v48  ;;  %v1758_v12 = vsel %vm1748_vm10, %v1725_v41, %v1377_v14  ;;  %v10060_v48 = vrot.slane %v6650_v17, 7  ;;  %v10160_v41 = vrot.slane %v6532_v55, 7 }
 0x13b   : > { %1010 = vrot.lane.b32.xlu1 %v6296_v8, %s5573_s15  ;;  %916 = vrot.lane.b32.xlu0 %v6624_v23, %s10150_s30 }
 0x13c   : > { %5281 = vmatprep.mubr.msk.f32.mxu0 %vm1820_vm12, %v1790_v56  ;;  %v6674_v29 = vsel %vm10118_vm1, %v498_v0, %v10060_v48 }
 0x13d   : > { %v6640_v2 = vpop.permute.xlu1 %1092  ;;  %v6642_v45 = vpop.permute.xlu0 %774  ;;  %v6684_v14 = vsel %vm552_vm3, %v6556_v13, %v6674_v29  ;;  %v6699_v13 = vsel %vm10119_vm0, %v630_v49, %v10059_v30 }
 0x13e   : > { %v6709_v34 = vsel %vm684_vm2, %v6581_v39, %v6699_v13 }
 0x13f   : > { %1390 = vrot.lane.b32.xlu1 %v6212_v10, %s5579_s13  ;;  %1296 = vrot.lane.b32.xlu0 %v6175_v22, %s5578_s29 }
 0x141   : > { %v1473_v28 = vpop.permute.xlu1 %1472  ;;  %v1187_v63 = vpop.permute.xlu0 %1186 }
 0x142   : > { %v1791_v56 = vsel %vm1781_vm11, %v1758_v12, %v1473_v28  ;;  %v6714_v12 = vsel %vm10118_vm1, %v10160_v41, %v498_v0 }
 0x143   : > { %1106 = vrot.lane.b32.xlu1 %v6448_v15, %s5576_s24  ;;  %1012 = vrot.lane.b32.xlu0 %v6411_v46, %s5573_s15 }
 0x144   : > { %5282 = vmatmul.mubr.msk.f32.gmra.mxu0 %vm1820_vm12, %v1791_v56 }
 0x145   : > { %v6667_v10 = vpop.permute.xlu1 %902  ;;  %v6669_v40 = vpop.permute.xlu0 %776 }
 0x147   : > { %1486 = vrot.lane.b32.xlu1 %v6237_v42, %s10090_s16  ;;  %1392 = vrot.lane.b32.xlu0 %v6242_v33, %s5579_s13 }
 0x149   : > { %v1283_v47 = vpop.permute.xlu1 %1282  ;;  %v1189_v3 = vpop.permute.xlu0 %1188 }
 0x14b   : > { %1108 = vrot.lane.b32.xlu1 %v6478_v5, %s5576_s24  ;;  %790 = vrot.lane.b32.xlu0 %v6684_v14, %s10066_s22 }
 0x14d   : > { %v6692_v42 = vpop.permute.xlu1 %998  ;;  %v6694_v33 = vpop.permute.xlu0 %904 }
 0x14f   : > { %1488 = vrot.lane.b32.xlu1 %v6270_v43, %s10090_s16  ;;  %1202 = vrot.lane.b32.xlu0 %v6473_v32, %s10149_s25  ;;  %v1561_v43 = vsel %vm1550_vm4, %v6005_v31, %v6524_v37 }
 0x150   : > { %v1594_v39 = vsel %vm1583_vm5, %v1561_v43, %v6549_v24  ;;  %v10161_v24 = vrot.slane %v6532_v55, 6 }
 0x151   : > { %v1379_v28 = vpop.permute.xlu1 %1378  ;;  %v1285_v56 = vpop.permute.xlu0 %1284  ;;  %v1627_v30 = vsel %vm1616_vm6, %v1594_v39, %v6574_v4 }
 0x152   : > { %v1660_v48 = vsel %vm1649_vm7, %v1627_v30, %v6609_v20  ;;  %v6742_v4 = vsel %vm10119_vm0, %v10161_v24, %v630_v49 }
 0x153   : > { %918 = vrot.lane.b32.xlu1 %v6709_v34, %s10150_s30  ;;  %792 = vrot.lane.b32.xlu0 %v6714_v12, %s10066_s22  ;;  %v1693_v31 = vsel %vm1682_vm8, %v1660_v48, %v1187_v63  ;;  %v1562_v48 = vsel %vm1550_vm4, %v6070_v6, %v6551_v53  ;;  %v6765_v53 = vld [vmem:[%s5708_s14 + $0xb8] sm:$0xff] }
 0x154   : > { %v1726_v37 = vsel %vm1715_vm9, %v1693_v31, %v1283_v47  ;;  %v1595_v47 = vsel %vm1583_vm5, %v1562_v48, %v6576_v59  ;;  %v6768_v31 = vld [vmem:[%s5708_s14 + $0xc0] sm:$0xff] }
 0x155   : > { %v6727_v0 = vpop.permute.xlu1 %1094  ;;  %v6729_v41 = vpop.permute.xlu0 %1000  ;;  %v1759_v43 = vsel %vm1748_vm10, %v1726_v37, %v1379_v28  ;;  %v1628_v49 = vsel %vm1616_vm6, %v1595_v47, %v6611_v26 }
 0x156   : > { %v1661_v6 = vsel %vm1649_vm7, %v1628_v49, %v6640_v2  ;;  %v502_v2 = vrot.slane %v6765_v53, 7  ;;  %v634_v49 = vrot.slane %v6765_v53, 6 }
 0x157   : > { %1298 = vrot.lane.b32.xlu1 %v6178_v18, %s5578_s29  ;;  %1204 = vrot.lane.b32.xlu0 %v6506_v25, %s10149_s25  ;;  %v1694_v37 = vsel %vm1682_vm8, %v1661_v6, %v1189_v3  ;;  %v10061_v6 = vrot.slane %v6768_v31, 6 }
 0x158   : > { %v1727_v59 = vsel %vm1715_vm9, %v1694_v37, %v1285_v56 }
 0x159   : > { %v1475_v20 = vpop.permute.xlu1 %1474  ;;  %v1381_v30 = vpop.permute.xlu0 %1380 }
 0x15a   : > { %v1792_v63 = vsel %vm1781_vm11, %v1759_v43, %v1475_v20  ;;  %v1760_v26 = vsel %vm1748_vm10, %v1727_v59, %v1381_v30  ;;  %v10062_v20 = vrot.slane %v6768_v31, 7  ;;  %v10162_v59 = vrot.slane %v6650_v17, 7 }
 0x15b   : > { %1014 = vrot.lane.b32.xlu1 %v6414_v16, %s5573_s15  ;;  %920 = vrot.lane.b32.xlu0 %v6742_v4, %s10150_s30 }
 0x15c   : > { %5284 = vmatprep.mubr.msk.f32.mxu0 %vm1820_vm12, %v1792_v63  ;;  %v6792_v56 = vsel %vm10118_vm1, %v502_v2, %v10062_v20 }
 0x15d   : > { %v6758_v28 = vpop.permute.xlu1 %1096  ;;  %v6760_v39 = vpop.permute.xlu0 %778  ;;  %v6802_v30 = vsel %vm552_vm3, %v6674_v29, %v6792_v56  ;;  %v6817_v29 = vsel %vm10119_vm0, %v634_v49, %v10061_v6 }
 0x15e   : > { %v6827_v37 = vsel %vm684_vm2, %v6699_v13, %v6817_v29 }
 0x15f   : > { %1394 = vrot.lane.b32.xlu1 %v6330_v27, %s5579_s13  ;;  %1300 = vrot.lane.b32.xlu0 %v6293_v21, %s5578_s29 }
 0x161   : > { %v1477_v24 = vpop.permute.xlu1 %1476  ;;  %v1191_v43 = vpop.permute.xlu0 %1190 }
 0x162   : > { %v1793_v63 = vsel %vm1781_vm11, %v1760_v26, %v1477_v24  ;;  %v6832_v26 = vsel %vm10118_vm1, %v10162_v59, %v502_v2 }
 0x163   : > { %1110 = vrot.lane.b32.xlu1 %v6566_v54, %s5576_s24  ;;  %1016 = vrot.lane.b32.xlu0 %v6529_v38, %s5573_s15 }
 0x164   : > { %5285 = vmatmul.mubr.msk.f32.gmra.mxu0 %vm1820_vm12, %v1793_v63 }
 0x165   : > { %v6785_v27 = vpop.permute.xlu1 %906  ;;  %v6787_v3 = vpop.permute.xlu0 %780 }
 0x167   : > { %1490 = vrot.lane.b32.xlu1 %v6355_v60, %s10090_s16  ;;  %1396 = vrot.lane.b32.xlu0 %v6360_v57, %s5579_s13 }
 0x169   : > { %v1287_v48 = vpop.permute.xlu1 %1286  ;;  %v1193_v47 = vpop.permute.xlu0 %1192 }
 0x16b   : > { %1112 = vrot.lane.b32.xlu1 %v6596_v36, %s5576_s24  ;;  %794 = vrot.lane.b32.xlu0 %v6802_v30, %s10066_s22 }
 0x16d   : > { %v6810_v60 = vpop.permute.xlu1 %1002  ;;  %v6812_v57 = vpop.permute.xlu0 %908 }
 0x16f   : > { %1492 = vrot.lane.b32.xlu1 %v6388_v11, %s10090_s16  ;;  %1206 = vrot.lane.b32.xlu0 %v6591_v19, %s10149_s25  ;;  %v1563_v11 = vsel %vm1550_vm4, %v6073_v7, %v6642_v45 }
 0x170   : > { %v1596_v13 = vsel %vm1583_vm5, %v1563_v11, %v6667_v10  ;;  %v10163_v10 = vrot.slane %v6650_v17, 6 }
 0x171   : > { %v1383_v24 = vpop.permute.xlu1 %1382  ;;  %v1289_v63 = vpop.permute.xlu0 %1288  ;;  %v1629_v6 = vsel %vm1616_vm6, %v1596_v13, %v6692_v42 }
 0x172   : > { %v1662_v20 = vsel %vm1649_vm7, %v1629_v6, %v6727_v0  ;;  %v6860_v42 = vsel %vm10119_vm0, %v10163_v10, %v634_v49 }
 0x173   : > { %922 = vrot.lane.b32.xlu1 %v6827_v37, %s10150_s30  ;;  %796 = vrot.lane.b32.xlu0 %v6832_v26, %s10066_s22  ;;  %v1695_v7 = vsel %vm1682_vm8, %v1662_v20, %v1191_v43  ;;  %v1564_v20 = vsel %vm1550_vm4, %v6175_v22, %v6669_v40  ;;  %v6883_v40 = vld [vmem:[%s5708_s14 + $0xc8] sm:$0xff] }
 0x174   : > { %v1728_v45 = vsel %vm1715_vm9, %v1695_v7, %v1287_v48  ;;  %v1597_v48 = vsel %vm1583_vm5, %v1564_v20, %v6694_v33  ;;  %v6886_v7 = vld [vmem:[%s5708_s14 + $0xd0] sm:$0xff] }
 0x175   : > { %v6845_v2 = vpop.permute.xlu1 %1098  ;;  %v6847_v59 = vpop.permute.xlu0 %1004  ;;  %v1761_v11 = vsel %vm1748_vm10, %v1728_v45, %v1383_v24  ;;  %v1630_v49 = vsel %vm1616_vm6, %v1597_v48, %v6729_v41 }
 0x176   : > { %v1663_v22 = vsel %vm1649_vm7, %v1630_v49, %v6758_v28  ;;  %v506_v28 = vrot.slane %v6883_v40, 7  ;;  %v638_v49 = vrot.slane %v6883_v40, 6 }
 0x177   : > { %1302 = vrot.lane.b32.xlu1 %v6296_v8, %s5578_s29  ;;  %1208 = vrot.lane.b32.xlu0 %v6624_v23, %s10149_s25  ;;  %v1696_v45 = vsel %vm1682_vm8, %v1663_v22, %v1193_v47  ;;  %v10063_v22 = vrot.slane %v6886_v7, 6 }
 0x178   : > { %v1729_v33 = vsel %vm1715_vm9, %v1696_v45, %v1289_v63 }
 0x179   : > { %v1479_v0 = vpop.permute.xlu1 %1478  ;;  %v1385_v6 = vpop.permute.xlu0 %1384 }
 0x17a   : > { %v1794_v43 = vsel %vm1781_vm11, %v1761_v11, %v1479_v0  ;;  %v1762_v41 = vsel %vm1748_vm10, %v1729_v33, %v1385_v6  ;;  %v10064_v0 = vrot.slane %v6886_v7, 7  ;;  %v10164_v33 = vrot.slane %v6768_v31, 7 }
 0x17b   : > { %1018 = vrot.lane.b32.xlu1 %v6532_v55, %s5573_s15  ;;  %924 = vrot.lane.b32.xlu0 %v6860_v42, %s10150_s30 }
 0x17c   : > { %5287 = vmatprep.mubr.msk.f32.mxu0 %vm1820_vm12, %v1794_v43  ;;  %v6910_v63 = vsel %vm10118_vm1, %v506_v28, %v10064_v0 }
 0x17d   : > { %v6876_v24 = vpop.permute.xlu1 %1100  ;;  %v6878_v13 = vpop.permute.xlu0 %782  ;;  %v6920_v6 = vsel %vm552_vm3, %v6792_v56, %v6910_v63  ;;  %v6935_v56 = vsel %vm10119_vm0, %v638_v49, %v10063_v22 }
 0x17e   : > { %v6945_v45 = vsel %vm684_vm2, %v6817_v29, %v6935_v56 }
 0x17f   : > { %1398 = vrot.lane.b32.xlu1 %v6448_v15, %s5579_s13  ;;  %1304 = vrot.lane.b32.xlu0 %v6411_v46, %s5578_s29 }
 0x181   : > { %v1481_v10 = vpop.permute.xlu1 %1480  ;;  %v1195_v11 = vpop.permute.xlu0 %1194 }
 0x182   : > { %v1795_v43 = vsel %vm1781_vm11, %v1762_v41, %v1481_v10  ;;  %v6950_v41 = vsel %vm10118_vm1, %v10164_v33, %v506_v28 }
 0x183   : > { %1114 = vrot.lane.b32.xlu1 %v6684_v14, %s5576_s24  ;;  %1020 = vrot.lane.b32.xlu0 %v6647_v52, %s5573_s15 }
 0x184   : > { %5288 = vmatmul.mubr.msk.f32.gmra.mxu0 %vm1820_vm12, %v1795_v43 }
 0x185   : > { %v6903_v15 = vpop.permute.xlu1 %910  ;;  %v6905_v47 = vpop.permute.xlu0 %784 }
 0x187   : > { %1494 = vrot.lane.b32.xlu1 %v6473_v32, %s10090_s16  ;;  %1400 = vrot.lane.b32.xlu0 %v6478_v5, %s5579_s13 }
 0x189   : > { %v1291_v20 = vpop.permute.xlu1 %1290  ;;  %v1197_v48 = vpop.permute.xlu0 %1196 }
 0x18b   : > { %1116 = vrot.lane.b32.xlu1 %v6714_v12, %s5576_s24  ;;  %798 = vrot.lane.b32.xlu0 %v6920_v6, %s10066_s22 }
 0x18d   : > { %v6928_v32 = vpop.permute.xlu1 %1006  ;;  %v6930_v5 = vpop.permute.xlu0 %912 }
 0x18f   : > { %1496 = vrot.lane.b32.xlu1 %v6506_v25, %s10090_s16  ;;  %1210 = vrot.lane.b32.xlu0 %v6709_v34, %s10149_s25  ;;  %v1565_v25 = vsel %vm1550_vm4, %v6178_v18, %v6760_v39 }
 0x190   : > { %v1598_v29 = vsel %vm1583_vm5, %v1565_v25, %v6785_v27  ;;  %v10165_v27 = vrot.slane %v6768_v31, 6 }
 0x191   : > { %v1387_v10 = vpop.permute.xlu1 %1386  ;;  %v1293_v43 = vpop.permute.xlu0 %1292  ;;  %v1631_v22 = vsel %vm1616_vm6, %v1598_v29, %v6810_v60 }
 0x192   : > { %v1664_v0 = vsel %vm1649_vm7, %v1631_v22, %v6845_v2  ;;  %v6978_v60 = vsel %vm10119_vm0, %v10165_v27, %v638_v49 }
 0x193   : > { %926 = vrot.lane.b32.xlu1 %v6945_v45, %s10150_s30  ;;  %800 = vrot.lane.b32.xlu0 %v6950_v41, %s10066_s22  ;;  %v1697_v18 = vsel %vm1682_vm8, %v1664_v0, %v1195_v11  ;;  %v1566_v11 = vsel %vm1550_vm4, %v6293_v21, %v6787_v3  ;;  %v5271_v3 = vpop.f32.mrf.mxu0  ;;  %s10166_s22 = smov 1  }
 0x194   : > { %v1730_v39 = vsel %vm1715_vm9, %v1697_v18, %v1291_v20  ;;  %v1599_v0 = vsel %vm1583_vm5, %v1566_v11, %v6812_v57  ;;  %v7008_v57 = vld [vmem:[%s10033_s6] ss:$0 sm:$0xff]  ;;  %v10072_v18 = vmov 0  }
 0x195   : > { %v6963_v28 = vpop.permute.xlu1 %1102  ;;  %v6965_v33 = vpop.permute.xlu0 %1008  ;;  %v1763_v25 = vsel %vm1748_vm10, %v1730_v39, %v1387_v10  ;;  %v1632_v20 = vsel %vm1616_vm6, %v1599_v0, %v6847_v59  ;;  %5498 = vset.pattern.permute.xlu1 %v10072_v18  ;;  %5497 = vset.pattern.permute.xlu0 %v10072_v18 }
 0x196   : > { %v1665_v21 = vsel %vm1649_vm7, %v1632_v20, %v6876_v24  ;;  %v7040_v20 = vsel %vm552_vm3, %v6910_v63, %v5843_v50 }
 0x197   : > { %1306 = vrot.lane.b32.xlu1 %v6414_v16, %s5578_s29  ;;  %1212 = vrot.lane.b32.xlu0 %v6742_v4, %s10149_s25  ;;  %v1698_v10 = vsel %vm1682_vm8, %v1665_v21, %v1197_v48 }
 0x198   : > { %v1731_v59 = vsel %vm1715_vm9, %v1698_v10, %v1293_v43 }
 0x199   : > { %v1483_v29 = vpop.permute.xlu1 %1482  ;;  %v1389_v35 = vpop.permute.xlu0 %1388 }
 0x19a   : > { %v1796_v2 = vsel %vm1781_vm11, %v1763_v25, %v1483_v29  ;;  %v1764_v24 = vsel %vm1748_vm10, %v1731_v59, %v1389_v35  ;;  %v1992_v25 = vadd.f32 %v5271_v3, %v7008_v57 }
 0x19b   : > { %1022 = vrot.lane.b32.xlu1 %v6650_v17, %s5573_s15  ;;  %928 = vrot.lane.b32.xlu0 %v6978_v60, %s10150_s30 }
 0x19c   : > { %5290 = vmatprep.mubr.msk.f32.mxu0 %vm1820_vm12, %v1796_v2  ;;  %v7029_v11 = vmax.f32 %v1992_v25, 0.0  ;;  %v7078_v25 = vsel %vm684_vm2, %v6935_v56, %v5875_v58 }
 0x19d   : > { %v6994_v49 = vpop.permute.xlu1 %1104  ;;  %v6996_v22 = vpop.permute.xlu0 %786 }
 0x19e   : > { %v10070_v59 = vrot.slane %v7029_v11, 6 }
 0x19f   : > { %1402 = vrot.lane.b32.xlu1 %v6566_v54, %s5579_s13  ;;  %1308 = vrot.lane.b32.xlu0 %v6529_v38, %s5578_s29  ;;  %v7014_v54 = vpop.f32.mrf.mxu0 }
 0x1a1   : > { %v1485_v48 = vpop.permute.xlu1 %1484  ;;  %v1199_v39 = vpop.permute.xlu0 %1198 }
 0x1a2   : > { %v1797_v27 = vsel %vm1781_vm11, %v1764_v24, %v1485_v48 }
 0x1a3   : > { %1118 = vrot.lane.b32.xlu1 %v6802_v30, %s5576_s24  ;;  %1024 = vrot.lane.b32.xlu0 %v6765_v53, %s5573_s15 }
 0x1a4   : > { %v7022_v43 = vpop.f32.mrf.mxu0  ;;  %5291 = vmatmul.mubr.msk.f32.gmra.mxu0 %vm1820_vm12, %v1797_v27 }
 0x1a5   : > { %v7025_v29 = vpop.permute.xlu1 %914  ;;  %v7027_v35 = vpop.permute.xlu0 %788 }
 0x1a6   : > { %v1996_v2 = vpop.f32.mrf.mxu0 }
 0x1a7   : > { %v1997_v0 = vadd.f32 %v7008_v57, %v1996_v2  ;;  %1498 = vrot.lane.b32.xlu1 %v6591_v19, %s10090_s16  ;;  %1404 = vrot.lane.b32.xlu0 %v6596_v36, %s5579_s13  ;;  %v10071_v19 = vrot.slane %v7029_v11, 7  ;;  %v10167_v2 = vrot.slane %v5823_v44, 7 }
 0x1a9   : > { %v7042_v21 = vmax.f32 %v1997_v0, 0.0  ;;  %v1295_v3 = vpop.permute.xlu1 %1294  ;;  %v1201_v10 = vpop.permute.xlu0 %1200  ;;  %v10168_v0 = vrot.slane %v6886_v7, 7 }
 0x1ab   : > { %1120 = vrot.lane.b32.xlu1 %v6832_v26, %s5576_s24  ;;  %802 = vrot.lane.b32.xlu0 %v7040_v20, %s10166_s22  ;;  %v10068_v36 = vrot.slane %v7042_v21, 7  ;;  %v10069_v24 = vrot.slane %v7042_v21, 6 }
 0x1ad   : > { %v7052_v50 = vpop.permute.xlu1 %1010  ;;  %v7054_v63 = vpop.permute.xlu0 %916  ;;  %v7061_v48 = vsel %vm10118_vm1, %v10071_v19, %v10068_v36  ;;  %v7068_v27 = vsel %vm10119_vm0, %v10070_v59, %v10069_v24  ;;  %v7085_v36 = vsel %vm10118_vm1, %v10168_v0, %v10167_v2 }
 0x1af   : > { %1500 = vrot.lane.b32.xlu1 %v6624_v23, %s10090_s16  ;;  %1214 = vrot.lane.b32.xlu0 %v6827_v37, %s10149_s25  ;;  %v1567_v23 = vsel %vm1550_vm4, %v6296_v8, %v6878_v13 }
 0x1b0   : > { %v1600_v58 = vsel %vm1583_vm5, %v1567_v23, %v6903_v15  ;;  %v10169_v15 = vrot.slane %v5823_v44, 6 }
 0x1b1   : > { %v1391_v24 = vpop.permute.xlu1 %1390  ;;  %v1297_v59 = vpop.permute.xlu0 %1296  ;;  %v1633_v56 = vsel %vm1616_vm6, %v1600_v58, %v6928_v32  ;;  %v10170_v32 = vrot.slane %v6886_v7, 6 }
 0x1b2   : > { %v1666_v19 = vsel %vm1649_vm7, %v1633_v56, %v6963_v28 }
 0x1b3   : > { %930 = vrot.lane.b32.xlu1 %v7078_v25, %s10150_s30  ;;  %804 = vrot.lane.b32.xlu0 %v7085_v36, %s10166_s22  ;;  %v1699_v8 = vsel %vm1682_vm8, %v1666_v19, %v1199_v39  ;;  %v7113_v23 = vsel %vm10119_vm0, %v10170_v32, %v10169_v15  ;;  %v1568_v19 = vsel %vm1550_vm4, %v6411_v46, %v6905_v47 }
 0x1b4   : > { %v1732_v13 = vsel %vm1715_vm9, %v1699_v8, %v1295_v3  ;;  %v1601_v44 = vsel %vm1583_vm5, %v1568_v19, %v6930_v5 }
 0x1b5   : > { %v1107_v2 = vpop.permute.xlu1 %1106  ;;  %v7098_v0 = vpop.permute.xlu0 %1012  ;;  %v1765_v58 = vsel %vm1748_vm10, %v1732_v13, %v1391_v24  ;;  %v1634_v3 = vsel %vm1616_vm6, %v1601_v44, %v6965_v33 }
 0x1b6   : > { %v1667_v46 = vsel %vm1649_vm7, %v1634_v3, %v6994_v49 }
 0x1b7   : > { %1310 = vrot.lane.b32.xlu1 %v6532_v55, %s5578_s29  ;;  %1216 = vrot.lane.b32.xlu0 %v6860_v42, %s10149_s25  ;;  %v1700_v47 = vsel %vm1682_vm8, %v1667_v46, %v1201_v10 }
 0x1b8   : > { %v1733_v5 = vsel %vm1715_vm9, %v1700_v47, %v1297_v59 }
 0x1b9   : > { %v1487_v28 = vpop.permute.xlu1 %1486  ;;  %v1393_v56 = vpop.permute.xlu0 %1392 }
 0x1ba   : > { %v1798_v39 = vsel %vm1781_vm11, %v1765_v58, %v1487_v28  ;;  %v1766_v13 = vsel %vm1748_vm10, %v1733_v5, %v1393_v56 }
 0x1bb   : > { %1026 = vrot.lane.b32.xlu1 %v6768_v31, %s5573_s15  ;;  %932 = vrot.lane.b32.xlu0 %v7113_v23, %s10150_s30 }
 0x1bc   : > { %5293 = vmatprep.mubr.msk.f32.mxu0 %vm1820_vm12, %v1798_v39 }
 0x1bd   : > { %v1109_v24 = vpop.permute.xlu1 %1108  ;;  %v7129_v8 = vpop.permute.xlu0 %790 }
 0x1bf   : > { %1406 = vrot.lane.b32.xlu1 %v6684_v14, %s5579_s13  ;;  %1312 = vrot.lane.b32.xlu0 %v6647_v52, %s5578_s29 }
 0x1c1   : > { %v1489_v15 = vpop.permute.xlu1 %1488  ;;  %v1203_v33 = vpop.permute.xlu0 %1202 }
 0x1c2   : > { %v1799_v32 = vsel %vm1781_vm11, %v1766_v13, %v1489_v15 }
 0x1c3   : > { %1122 = vrot.lane.b32.xlu1 %v6920_v6, %s5576_s24  ;;  %1028 = vrot.lane.b32.xlu0 %v6883_v40, %s5573_s15 }
 0x1c4   : > { %5294 = vmatmul.mubr.msk.f32.gmra.mxu0 %vm1820_vm12, %v1799_v32 }
 0x1c5   : > { %v7146_v14 = vpop.permute.xlu1 %918  ;;  %v7148_v49 = vpop.permute.xlu0 %792 }
 0x1c7   : > { %1502 = vrot.lane.b32.xlu1 %v6709_v34, %s10090_s16  ;;  %1408 = vrot.lane.b32.xlu0 %v6714_v12, %s5579_s13  ;;  %v1569_v12 = vsel %vm1550_vm4, %v6414_v16, %v6996_v22 }
 0x1c8   : > { %v1602_v39 = vsel %vm1583_vm5, %v1569_v12, %v7025_v29 }
 0x1c9   : > { %v1299_v10 = vpop.permute.xlu1 %1298  ;;  %v1205_v59 = vpop.permute.xlu0 %1204 }
 0x1cb   : > { %1124 = vrot.lane.b32.xlu1 %v6950_v41, %s5576_s24  ;;  %806 = vrot.lane.b32.xlu0 %v5852_v51, %s10166_s22 }
 0x1cd   : > { %v1015_v58 = vpop.permute.xlu1 %1014  ;;  %v7158_v28 = vpop.permute.xlu0 %920 }
 0x1cf   : > { %1504 = vrot.lane.b32.xlu1 %v6742_v4, %s10090_s16  ;;  %1218 = vrot.lane.b32.xlu0 %v6945_v45, %s10149_s25  ;;  %v1635_v4 = vsel %vm1616_vm6, %v1602_v39, %v7052_v50  ;;  %v10171_v39 = vld [vmem:[#allocation6_spill] sm:$0xff] }
 0x1d0   : > { %v1668_v3 = vsel %vm1649_vm7, %v1635_v4, %v1107_v2  ;;  %v1570_v2 = vsel %vm1550_vm4, %v6529_v38, %v7027_v35 }
 0x1d1   : > { %v1395_v34 = vpop.permute.xlu1 %1394  ;;  %v1301_v56 = vpop.permute.xlu0 %1300  ;;  %v1701_v46 = vsel %vm1682_vm8, %v1668_v3, %v1203_v33  ;;  %v1603_v5 = vsel %vm1583_vm5, %v1570_v2, %v7054_v63 }
 0x1d2   : > { %v1734_v16 = vsel %vm1715_vm9, %v1701_v46, %v1299_v10  ;;  %v1636_v13 = vsel %vm1616_vm6, %v1603_v5, %v7098_v0  ;;  %v1571_v46 = vsel %vm1550_vm4, %v6532_v55, %v7129_v8 }
 0x1d3   : > { %934 = vrot.lane.b32.xlu1 %v5887_v61, %s10150_s30  ;;  %808 = vrot.lane.b32.xlu0 %v5890_v62, %s10166_s22  ;;  %v1767_v22 = vsel %vm1748_vm10, %v1734_v16, %v1395_v34  ;;  %v1669_v38 = vsel %vm1649_vm7, %v1636_v13, %v1109_v24  ;;  %v7212_v24 = vld [vmem:[%s5708_s14 + $0xd8] sm:$0xff] }
 0x1d4   : > { %v1702_v35 = vsel %vm1682_vm8, %v1669_v38, %v1205_v59  ;;  %v10172_v16 = vld [vmem:[#allocation7_spill] sm:$0xff]  ;;  %v7262_v38 = vld [vmem:[%s5708_s14 + $0xe0] sm:$0xff] }
 0x1d5   : > { %v1111_v19 = vpop.permute.xlu1 %1110  ;;  %v7175_v44 = vpop.permute.xlu0 %1016  ;;  %v1735_v63 = vsel %vm1715_vm9, %v1702_v35, %v1301_v56  ;;  %v10174_v35 = vld [vmem:[#allocation9_spill] sm:$0xff] }
 0x1d7   : > { %1314 = vrot.lane.b32.xlu1 %v6650_v17, %s5578_s29  ;;  %1220 = vrot.lane.b32.xlu0 %v6978_v60, %s10149_s25 }
 0x1d9   : > { %v1491_v29 = vpop.permute.xlu1 %1490  ;;  %v1397_v47 = vpop.permute.xlu0 %1396 }
 0x1da   : > { %v1800_v50 = vsel %vm1781_vm11, %v1767_v22, %v1491_v29  ;;  %v1768_v32 = vsel %vm1748_vm10, %v1735_v63, %v1397_v47  ;;  %v10173_v22 = vld [vmem:[#allocation8_spill] sm:$0xff]  ;;  %v1604_v29 = vsel %vm1583_vm5, %v1571_v46, %v7146_v14 }
 0x1db   : > { %1030 = vrot.lane.b32.xlu1 %v6886_v7, %s5573_s15  ;;  %936 = vrot.lane.b32.xlu0 %v5910_v9, %s10150_s30 }
 0x1dc   : > { %5296 = vmatprep.mubr.msk.f32.mxu0 %vm1820_vm12, %v1800_v50 }
 0x1dd   : > { %v1113_v15 = vpop.permute.xlu1 %1112  ;;  %v7198_v33 = vpop.permute.xlu0 %794 }
 0x1df   : > { %1410 = vrot.lane.b32.xlu1 %v6802_v30, %s5579_s13  ;;  %1316 = vrot.lane.b32.xlu0 %v6765_v53, %s5578_s29 }
 0x1e1   : > { %v1493_v10 = vpop.permute.xlu1 %1492  ;;  %v1207_v34 = vpop.permute.xlu0 %1206 }
 0x1e2   : > { %v1801_v0 = vsel %vm1781_vm11, %v1768_v32, %v1493_v10 }
 0x1e3   : > { %1126 = vrot.lane.b32.xlu1 %v7040_v20, %s5576_s24  ;;  %1032 = vrot.lane.b32.xlu0 %v7212_v24, %s5573_s15 }
 0x1e4   : > { %5297 = vmatmul.mubr.msk.f32.gmra.mxu0 %vm1820_vm12, %v1801_v0 }
 0x1e5   : > { %v7217_v30 = vpop.permute.xlu1 %922  ;;  %v7219_v59 = vpop.permute.xlu0 %796 }
 0x1e7   : > { %1506 = vrot.lane.b32.xlu1 %v6827_v37, %s10090_s16  ;;  %1412 = vrot.lane.b32.xlu0 %v6832_v26, %s5579_s13 }
 0x1e9   : > { %v1303_v56 = vpop.permute.xlu1 %1302  ;;  %v1209_v12 = vpop.permute.xlu0 %1208 }
 0x1eb   : > { %1128 = vrot.lane.b32.xlu1 %v7085_v36, %s5576_s24  ;;  %810 = vrot.lane.b32.xlu0 %v10171_v39, %s10166_s22 }
 0x1ed   : > { %v7229_v4 = vpop.permute.xlu1 %1018  ;;  %v7231_v3 = vpop.permute.xlu0 %924 }
 0x1ef   : > { %1508 = vrot.lane.b32.xlu1 %v6860_v42, %s10090_s16  ;;  %1222 = vrot.lane.b32.xlu0 %v7078_v25, %s10149_s25  ;;  %v1637_v42 = vsel %vm1616_vm6, %v1604_v29, %v1015_v58 }
 0x1f0   : > { %v1670_v2 = vsel %vm1649_vm7, %v1637_v42, %v1111_v19  ;;  %v1572_v19 = vsel %vm1550_vm4, %v6647_v52, %v7148_v49 }
 0x1f1   : > { %v1399_v37 = vpop.permute.xlu1 %1398  ;;  %v1305_v26 = vpop.permute.xlu0 %1304  ;;  %v1703_v5 = vsel %vm1682_vm8, %v1670_v2, %v1207_v34  ;;  %v1605_v63 = vsel %vm1583_vm5, %v1572_v19, %v7158_v28 }
 0x1f2   : > { %v1736_v55 = vsel %vm1715_vm9, %v1703_v5, %v1303_v56  ;;  %v1638_v32 = vsel %vm1616_vm6, %v1605_v63, %v7175_v44 }
 0x1f3   : > { %938 = vrot.lane.b32.xlu1 %v10172_v16, %s10150_s30  ;;  %812 = vrot.lane.b32.xlu0 %v10173_v22, %s10166_s22  ;;  %v1769_v8 = vsel %vm1748_vm10, %v1736_v55, %v1399_v37  ;;  %v1671_v52 = vsel %vm1649_vm7, %v1638_v32, %v1113_v15  ;;  %v7287_v15 = vld [vmem:[%s5708_s14 + $0xe8] sm:$0xff]  ;;  %v5582_v55 = vmov 1  }
 0x1f4   : > { %v1704_v49 = vsel %vm1682_vm8, %v1671_v52, %v1209_v12 }
 0x1f5   : > { %v1115_v47 = vpop.permute.xlu1 %1114  ;;  %v7247_v50 = vpop.permute.xlu0 %1020  ;;  %v1737_v28 = vsel %vm1715_vm9, %v1704_v49, %v1305_v26 }
 0x1f7   : > { %1318 = vrot.lane.b32.xlu1 %v6768_v31, %s5578_s29  ;;  %1224 = vrot.lane.b32.xlu0 %v7113_v23, %s10149_s25 }
 0x1f9   : > { %v1495_v14 = vpop.permute.xlu1 %1494  ;;  %v1401_v13 = vpop.permute.xlu0 %1400 }
 0x1fa   : > { %v1802_v58 = vsel %vm1781_vm11, %v1769_v8, %v1495_v14  ;;  %v1770_v0 = vsel %vm1748_vm10, %v1737_v28, %v1401_v13 }
 0x1fb   : > { %1034 = vrot.lane.b32.xlu1 %v7262_v38, %s5573_s15  ;;  %940 = vrot.lane.b32.xlu0 %v10174_v35, %s10150_s30  ;;  %s10124_s30 = smov 48  }
 0x1fc   : > { %5299 = vmatprep.mubr.msk.f32.mxu0 %vm1820_vm12, %v1802_v58 }
 0x1fd   : > { %v1117_v10 = vpop.permute.xlu1 %1116  ;;  %v7273_v34 = vpop.permute.xlu0 %798 }
 0x1fe   : > { %v1575_v28 = vsel %vm1550_vm4, %v6768_v31, %v7273_v34 }
 0x1ff   : > { %1414 = vrot.lane.b32.xlu1 %v6920_v6, %s5579_s13  ;;  %1320 = vrot.lane.b32.xlu0 %v6883_v40, %s5578_s29 }
 0x201   : > { %v1497_v56 = vpop.permute.xlu1 %1496  ;;  %v1211_v39 = vpop.permute.xlu0 %1210 }
 0x202   : > { %v1803_v44 = vsel %vm1781_vm11, %v1770_v0, %v1497_v56 }
 0x203   : > { %1130 = vrot.lane.b32.xlu1 %v5852_v51, %s5576_s24  ;;  %1036 = vrot.lane.b32.xlu0 %v7287_v15, %s5573_s15  ;;  %s10130_s15 = smov 24  }
 0x204   : > { %5300 = vmatmul.mubr.msk.f32.gmra.mxu0 %vm1820_vm12, %v1803_v44 }
 0x205   : > { %v7292_v6 = vpop.permute.xlu1 %926  ;;  %v7294_v12 = vpop.permute.xlu0 %800 }
 0x206   : > { %v1608_v0 = vsel %vm1583_vm5, %v1575_v28, %v7292_v6  ;;  %v1576_v31 = vsel %vm1550_vm4, %v6883_v40, %v7294_v12 }
 0x207   : > { %1510 = vrot.lane.b32.xlu1 %v6945_v45, %s10090_s16  ;;  %1416 = vrot.lane.b32.xlu0 %v6950_v41, %s5579_s13  ;;  %v1573_v41 = vsel %vm1550_vm4, %v6650_v17, %v7198_v33 }
 0x209   : > { %v1307_v37 = vpop.permute.xlu1 %1306  ;;  %v1213_v26 = vpop.permute.xlu0 %1212 }
 0x20b   : > { %1226 = vrot.lane.b32.xlu1 %v5887_v61, %s10149_s25  ;;  %1132 = vrot.lane.b32.xlu0 %v5890_v62, %s5576_s24  ;;  %v1606_v61 = vsel %vm1583_vm5, %v1573_v41, %v7217_v30  ;;  %s10095_s24 = smov 40  }
 0x20c   : > { %v1639_v62 = vsel %vm1616_vm6, %v1606_v61, %v7229_v4 }
 0x20d   : > { %v1023_v51 = vpop.permute.xlu1 %1022  ;;  %v7304_v46 = vpop.permute.xlu0 %928  ;;  %v1672_v22 = vsel %vm1649_vm7, %v1639_v62, %v1115_v47  ;;  %v1574_v47 = vsel %vm1550_vm4, %v6765_v53, %v7219_v59 }
 0x20e   : > { %v1705_v29 = vsel %vm1682_vm8, %v1672_v22, %v1211_v39  ;;  %v1641_v56 = vsel %vm1616_vm6, %v1608_v0, %v1023_v51  ;;  %v1609_v34 = vsel %vm1583_vm5, %v1576_v31, %v7304_v46 }
 0x20f   : > { %1228 = vrot.lane.b32.xlu1 %v5910_v9, %s10149_s25  ;;  %1512 = vrot.lane.b32.xlu0 %v6978_v60, %s10090_s16  ;;  %v1738_v17 = vsel %vm1715_vm9, %v1705_v29, %v1307_v37  ;;  %s10132_s25 = smov 32  }
 0x211   : > { %v1403_v45 = vpop.permute.xlu1 %1402  ;;  %v1309_v16 = vpop.permute.xlu0 %1308 }
 0x212   : > { %v1771_v33 = vsel %vm1748_vm10, %v1738_v17, %v1403_v45 }
 0x213   : > { %1324 = vrot.lane.b32.xlu1 %v7212_v24, %s5578_s29  ;;  %1322 = vrot.lane.b32.xlu0 %v6886_v7, %s5578_s29  ;;  %s10128_s29 = smov 56  }
 0x215   : > { %v1119_v9 = vpop.permute.xlu1 %1118  ;;  %v1025_v60 = vpop.permute.xlu0 %1024 }
 0x216   : > { %v1674_v37 = vsel %vm1649_vm7, %v1641_v56, %v1119_v9  ;;  %v1642_v6 = vsel %vm1616_vm6, %v1609_v34, %v1025_v60 }
 0x217   : > { %1420 = vrot.lane.b32.xlu1 %v7085_v36, %s5579_s13  ;;  %1418 = vrot.lane.b32.xlu0 %v7040_v20, %s5579_s13  ;;  %v1607_v20 = vsel %vm1583_vm5, %v1574_v47, %v7231_v3  ;;  %v2316_v36 = vsel %vm552_vm3, 1, %v10072_v18  ;;  %v2455_v3 = vsel %vm684_vm2, 1, %v10072_v18  ;;  %s10214_s13 = smov 40   ;;  %vm3361_vm3 = vcmask 130048  }
 0x218   : > { %v1640_v2 = vsel %vm1616_vm6, %v1607_v20, %v7247_v50 }
 0x219   : > { %v1499_v30 = vpop.permute.xlu1 %1498  ;;  %v1405_v42 = vpop.permute.xlu0 %1404  ;;  %v1673_v59 = vsel %vm1649_vm7, %v1640_v2, %v1117_v10 }
 0x21a   : > { %v1804_v4 = vsel %vm1781_vm11, %v1771_v33, %v1499_v30 }
 0x21b   : > { %1516 = vrot.lane.b32.xlu1 %v7113_v23, %s10090_s16  ;;  %1514 = vrot.lane.b32.xlu0 %v7078_v25, %s10090_s16  ;;  %v1706_v23 = vsel %vm1682_vm8, %v1673_v59, %v1213_v26 }
 0x21c   : > { %5302 = vmatprep.mubr.msk.f32.mxu0 %vm1820_vm12, %v1804_v4  ;;  %v1739_v25 = vsel %vm1715_vm9, %v1706_v23, %v1309_v16 }
 0x21d   : > { %v1121_v5 = vpop.permute.xlu1 %1120  ;;  %v803_v53 = vpop.permute.xlu0 %802  ;;  %v1772_v8 = vsel %vm1748_vm10, %v1739_v25, %v1405_v42 }
 0x21e   : > { %v1675_v22 = vsel %vm1649_vm7, %v1642_v6, %v1121_v5  ;;  %v1577_v5 = vsel %vm1550_vm4, %v6886_v7, %v803_v53 }
 0x21f   : > { %2322 = vperm.xlu1 %5498, %v5582_v55   ;;  %2319 = vperm.xlu0 %5497, %v2316_v36  }
 0x221   : > { %v1501_v14 = vpop.permute.xlu1 %1500  ;;  %v1215_v13 = vpop.permute.xlu0 %1214 }
 0x222   : > { %v1805_v50 = vsel %vm1781_vm11, %v1772_v8, %v1501_v14  ;;  %v1707_v26 = vsel %vm1682_vm8, %v1674_v37, %v1215_v13 }
 0x223   : > { %2458 = vperm.xlu1 %5498, %v2455_v3   ;;  %2461 = vperm.xlu0 %5497, %v5582_v55  }
 0x224   : > { %5303 = vmatmul.mubr.msk.f32.gmra.mxu0 %vm1820_vm12, %v1805_v50 }
 0x225   : > { %v931_v58 = vpop.permute.xlu1 %930  ;;  %v805_v19 = vpop.permute.xlu0 %804 }
 0x226   : > { %v1610_v59 = vsel %vm1583_vm5, %v1577_v5, %v931_v58  ;;  %v1578_v7 = vsel %vm1550_vm4, %v7212_v24, %v805_v19 }
 0x229   : > { %v1311_v35 = vpop.permute.xlu1 %1310  ;;  %v1217_v63 = vpop.permute.xlu0 %1216 }
 0x22a   : > { %v1740_v45 = vsel %vm1715_vm9, %v1707_v26, %v1311_v35  ;;  %v1708_v29 = vsel %vm1682_vm8, %v1675_v22, %v1217_v63 }
 0x22d   : > { %v1027_v32 = vpop.permute.xlu1 %1026  ;;  %v933_v10 = vpop.permute.xlu0 %932 }
 0x22e   : > { %v1643_v23 = vsel %vm1616_vm6, %v1610_v59, %v1027_v32  ;;  %v1611_v53 = vsel %vm1583_vm5, %v1578_v7, %v933_v10 }
 0x231   : > { %v1407_v52 = vpop.permute.xlu1 %1406  ;;  %v1313_v49 = vpop.permute.xlu0 %1312 }
 0x232   : > { %v1773_v16 = vsel %vm1748_vm10, %v1740_v45, %v1407_v52  ;;  %v1741_v17 = vsel %vm1715_vm9, %v1708_v29, %v1313_v49 }
 0x235   : > { %v1123_v39 = vpop.permute.xlu1 %1122  ;;  %v1029_v44 = vpop.permute.xlu0 %1028 }
 0x236   : > { %v1676_v3 = vsel %vm1649_vm7, %v1643_v23, %v1123_v39  ;;  %v1644_v58 = vsel %vm1616_vm6, %v1611_v53, %v1029_v44 }
 0x239   : > { %v1503_v41 = vpop.permute.xlu1 %1502  ;;  %v1409_v61 = vpop.permute.xlu0 %1408 }
 0x23a   : > { %v1806_v62 = vsel %vm1781_vm11, %v1773_v16, %v1503_v41  ;;  %v1774_v33 = vsel %vm1748_vm10, %v1741_v17, %v1409_v61 }
 0x23b   : > { %5305 = vmatprep.mubr.msk.f32.mxu0 %vm1820_vm12, %v1806_v62 }
 0x23d   : > { %v1125_v51 = vpop.permute.xlu1 %1124  ;;  %v807_v9 = vpop.permute.xlu0 %806 }
 0x23e   : > { %v1677_v49 = vsel %vm1649_vm7, %v1644_v58, %v1125_v51  ;;  %v1579_v62 = vsel %vm1550_vm4, %v7262_v38, %v807_v9 }
 0x241   : > { %v1505_v30 = vpop.permute.xlu1 %1504  ;;  %v1219_v42 = vpop.permute.xlu0 %1218 }
 0x242   : > { %v1807_v40 = vsel %vm1781_vm11, %v1774_v33, %v1505_v30  ;;  %v1709_v8 = vsel %vm1682_vm8, %v1676_v3, %v1219_v42  ;;  %v5507_v3 = vld [vmem:[%s5708_s14 + $0xf8] sm:$0xff] }
 0x243   : > { %5306 = vmatmul.mubr.msk.f32.gmra.mxu0 %vm1820_vm12, %v1807_v40 }
 0x245   : > { %v935_v12 = vpop.permute.xlu1 %934  ;;  %v809_v46 = vpop.permute.xlu0 %808 }
 0x246   : > { %v1612_v31 = vsel %vm1583_vm5, %v1579_v62, %v935_v12  ;;  %v1580_v38 = vsel %vm1550_vm4, %v7287_v15, %v809_v46 }
 0x249   : > { %v1315_v4 = vpop.permute.xlu1 %1314  ;;  %v1221_v60 = vpop.permute.xlu0 %1220 }
 0x24a   : > { %v1742_v14 = vsel %vm1715_vm9, %v1709_v8, %v1315_v4  ;;  %v1710_v28 = vsel %vm1682_vm8, %v1677_v49, %v1221_v60 }
 0x24d   : > { %v1031_v47 = vpop.permute.xlu1 %1030  ;;  %v937_v20 = vpop.permute.xlu0 %936 }
 0x24e   : > { %v1645_v34 = vsel %vm1616_vm6, %v1612_v31, %v1031_v47  ;;  %v1613_v9 = vsel %vm1583_vm5, %v1580_v38, %v937_v20 }
 0x251   : > { %v1411_v36 = vpop.permute.xlu1 %1410  ;;  %v1317_v2 = vpop.permute.xlu0 %1316 }
 0x252   : > { %v1775_v13 = vsel %vm1748_vm10, %v1742_v14, %v1411_v36  ;;  %v1743_v0 = vsel %vm1715_vm9, %v1710_v28, %v1317_v2  ;;  %v7422_v14 = vpop.f32.mrf.mxu0 }
 0x254   : > { %v2006_v28 = vpop.f32.mrf.mxu0 }
 0x255   : > { %v1127_v55 = vpop.permute.xlu1 %1126  ;;  %v1033_v25 = vpop.permute.xlu0 %1032 }
 0x256   : > { %v1678_v22 = vsel %vm1649_vm7, %v1645_v34, %v1127_v55  ;;  %v1646_v12 = vsel %vm1616_vm6, %v1613_v9, %v1033_v25  ;;  %v5506_v55 = vld [vmem:[%s5708_s14 + $0xf0] sm:$0xff]  ;;  %s10126_s14 = smov 16  }
 0x259   : > { %v1507_v50 = vpop.permute.xlu1 %1506  ;;  %v1413_v35 = vpop.permute.xlu0 %1412 }
 0x25a   : > { %v1808_v63 = vsel %vm1781_vm11, %v1775_v13, %v1507_v50  ;;  %v1776_v56 = vsel %vm1748_vm10, %v1743_v0, %v1413_v35 }
 0x25b   : > { %5308 = vmatprep.mubr.msk.f32.mxu0 %vm1820_vm12, %v1808_v63 }
 0x25d   : > { %v1129_v32 = vpop.permute.xlu1 %1128  ;;  %v811_v52 = vpop.permute.xlu0 %810 }
 0x25e   : > { %v1679_v47 = vsel %vm1649_vm7, %v1646_v12, %v1129_v32  ;;  %v1581_v25 = vsel %vm1550_vm4, %v5506_v55, %v811_v52 }
 0x261   : > { %v1509_v39 = vpop.permute.xlu1 %1508  ;;  %v1223_v37 = vpop.permute.xlu0 %1222 }
 0x262   : > { %v1809_v24 = vsel %vm1781_vm11, %v1776_v56, %v1509_v39  ;;  %v1711_v29 = vsel %vm1682_vm8, %v1678_v22, %v1223_v37 }
 0x263   : > { %5309 = vmatmul.mubr.msk.f32.gmra.mxu0 %vm1820_vm12, %v1809_v24 }
 0x265   : > { %v939_v19 = vpop.permute.xlu1 %938  ;;  %v813_v10 = vpop.permute.xlu0 %812 }
 0x266   : > { %v1582_v8 = vsel %vm1550_vm4, %v5507_v3, %v813_v10  ;;  %v1614_v13 = vsel %vm1583_vm5, %v1581_v25, %v939_v19  ;;  %v1987_v10 = vadd.f32 %v7008_v57, %v7014_v54  ;;  %vm3427_vm4 = vcmask 261120  }
 0x269   : > { %v1319_v26 = vpop.permute.xlu1 %1318  ;;  %v1225_v44 = vpop.permute.xlu0 %1224 }
 0x26a   : > { %v1744_v17 = vsel %vm1715_vm9, %v1711_v29, %v1319_v26  ;;  %v1712_v36 = vsel %vm1682_vm8, %v1679_v47, %v1225_v44  ;;  %v10176_v29 = vrot.slane %v7042_v21, 7 }
 0x26d   : > { %v1035_v45 = vpop.permute.xlu1 %1034  ;;  %v941_v16 = vpop.permute.xlu0 %940 }
 0x26e   : > { %v1615_v50 = vsel %vm1583_vm5, %v1582_v8, %v941_v16  ;;  %v1647_v35 = vsel %vm1616_vm6, %v1614_v13, %v1035_v45  ;;  %v2007_v45 = vadd.f32 %v7008_v57, %v2006_v28  ;;  %v2002_v16 = vadd.f32 %v7022_v43, %v7008_v57 }
 0x26f   : > { %v10175_v43 = vrot.slane %v7029_v11, 7  ;;  %vm3394_vm5 = vcmask 195584  }
 0x270   : > { %v7449_v62 = vmax.f32 %v2002_v16, 0.0 }
 0x271   : > { %v1415_v41 = vpop.permute.xlu1 %1414  ;;  %v1321_v61 = vpop.permute.xlu0 %1320 }
 0x272   : > { %v1777_v33 = vsel %vm1748_vm10, %v1744_v17, %v1415_v41  ;;  %v1745_v2 = vsel %vm1715_vm9, %v1712_v36, %v1321_v61  ;;  %v7445_v41 = vmax.f32 %v1987_v10, 0.0  ;;  %v7447_v61 = vmax.f32 %v2007_v45, 0.0 }
 0x273   : > { %v2226_v34 = vrot.slane %v7449_v62, 7  ;;  %v2365_v9 = vrot.slane %v7449_v62, 6  ;;  %v10178_v36 = vrot.slane %v7042_v21, 6 }
 0x274   : > { %v10079_v54 = vrot.slane %v7445_v41, 7  ;;  %v10077_v31 = vrot.slane %v7447_v61, 7 }
 0x275   : > { %v1131_v6 = vpop.permute.xlu1 %1130  ;;  %v1037_v51 = vpop.permute.xlu0 %1036  ;;  %v7468_v17 = vsel %vm10118_vm1, %v10176_v29, %v2226_v34 }
 0x276   : > { %v1648_v63 = vsel %vm1616_vm6, %v1615_v50, %v1037_v51  ;;  %v1680_v58 = vsel %vm1649_vm7, %v1647_v35, %v1131_v6  ;;  %v7463_v22 = vsel %vm10118_vm1, %v10079_v54, %v10175_v43  ;;  %vm3460_vm6 = vcmask 326656  }
 0x279   : > { %v1511_v30 = vpop.permute.xlu1 %1510  ;;  %v1417_v42 = vpop.permute.xlu0 %1416 }
 0x27a   : > { %v1810_v40 = vsel %vm1781_vm11, %v1777_v33, %v1511_v30  ;;  %v1778_v5 = vsel %vm1748_vm10, %v1745_v2, %v1417_v42  ;;  %v10078_v33 = vrot.slane %v7445_v41, 6  ;;  %v7476_v30 = vsel %vm10118_vm1, %v2226_v34, %v10077_v31 }
 0x27b   : > { %5311 = vmatprep.mubr.msk.f32.mxu0 %vm1820_vm12, %v1810_v40  ;;  %v10075_v42 = vrot.slane %v7447_v61, 6  ;;  %v7510_v2 = vsel %vm10119_vm0, %v10178_v36, %v2365_v9 }
 0x27d   : > { %v1227_v4 = vpop.permute.xlu1 %1226  ;;  %v1133_v60 = vpop.permute.xlu0 %1132 }
 0x27e   : > { %v1681_v32 = vsel %vm1649_vm7, %v1648_v63, %v1133_v60  ;;  %v1713_v52 = vsel %vm1682_vm8, %v1680_v58, %v1227_v4  ;;  %v10177_v60 = vrot.slane %v7029_v11, 6  ;;  %vm3493_vm7 = vcmask 392192  }
 0x280   : > { %v7503_v47 = vsel %vm10119_vm0, %v10078_v33, %v10177_v60 }
 0x281   : > { %v1229_v59 = vpop.permute.xlu1 %1228  ;;  %v1513_v15 = vpop.permute.xlu0 %1512 }
 0x282   : > { %v1811_v46 = vsel %vm1781_vm11, %v1778_v5, %v1513_v15  ;;  %v1714_v49 = vsel %vm1682_vm8, %v1681_v32, %v1229_v59  ;;  %v7515_v5 = vsel %vm10119_vm0, %v2365_v9, %v10075_v42  ;;  %vm3526_vm8 = vcmask 457728  }
 0x283   : > { %5312 = vmatmul.mubr.msk.f32.gmra.mxu0 %vm1820_vm12, %v1811_v46  ;;  %v7531_v46 = vpop.f32.mrf.mxu0 }
 0x285   : > { %v1325_v20 = vpop.permute.xlu1 %1324  ;;  %v1323_v23 = vpop.permute.xlu0 %1322 }
 0x286   : > { %v1747_v0 = vsel %vm1715_vm9, %v1714_v49, %v1325_v20  ;;  %v1746_v56 = vsel %vm1715_vm9, %v1713_v52, %v1323_v23  ;;  %v7533_v20 = vpop.f32.mrf.mxu0  ;;  %vm10136_vm9 = vcmask 523264  }
 0x288   : > { %v7535_v23 = vpop.f32.mrf.mxu0 }
 0x289   : > { %v1421_v7 = vpop.permute.xlu1 %1420  ;;  %v1419_v53 = vpop.permute.xlu0 %1418 }
 0x28a   : > { %v1780_v39 = vsel %vm1748_vm10, %v1747_v0, %v1421_v7  ;;  %v1779_v37 = vsel %vm1748_vm10, %v1746_v56, %v1419_v53  ;;  %v7537_v55 = vpop.f32.mrf.mxu0  ;;  %vm10123_vm10 = vcmask 588800  }
 0x28c   : > { %v7539_v25 = vpop.f32.mrf.mxu0 }
 0x28d   : > { %v1517_v24 = vpop.permute.xlu1 %1516  ;;  %v1515_v19 = vpop.permute.xlu0 %1514 }
 0x28e   : > { %v1813_v26 = vsel %vm1781_vm11, %v1780_v39, %v1517_v24  ;;  %v1812_v44 = vsel %vm1781_vm11, %v1779_v37, %v1515_v19  ;;  %v7541_v3 = vpop.f32.mrf.mxu0 }
 0x28f   : > { %5314 = vmatprep.mubr.msk.f32.mxu0 %vm1820_vm12, %v1812_v44 }
 0x290   : > { %5315 = vmatmul.mubr.msk.f32.gmra.mxu0 %vm1820_vm12, %v1813_v26  ;;  %v7543_v8 = vpop.f32.mrf.mxu0  ;;  %vm3954_vm12 = vcmask 1042432  }
 0x292   : > { %v7545_v13 = vpop.f32.mrf.mxu0 }
 0x294   : > { %v7547_v50 = vpop.f32.mrf.mxu0 }
 0x296   : > { %v7549_v35 = vpop.f32.mrf.mxu0 }
 0x298   : > { %v7551_v63 = vpop.f32.mrf.mxu0 }
 0x29a   : > { %v7454_v6 = vpop.permute.xlu1 %2322  ;;  %v7456_v51 = vpop.permute.xlu0 %2319 }
 0x29b   : > { %vm2325_vm13 = vcmp.eq.s32.totalorder %v7454_v6, 1  ;;  %vm10120_vm14 = vcmp.eq.s32.totalorder %v7456_v51, 1  ;;  %v7553_v7 = vpop.f32.mrf.mxu0 }
 0x29c   : > { %v7483_v40 = vsel %vm2325_vm13, %v7463_v22, %v7468_v17  ;;  %v7489_v38 = vsel %vm10120_vm14, %v7061_v48, %v7476_v30 }
 0x29d   : > { %2531 = vrot.lane.b32.xlu0 %v7483_v40, %s10090_s16 }
 0x29e   : > { %v7494_v12 = vpop.permute.xlu1 %2458  ;;  %v7496_v4 = vpop.permute.xlu0 %2461 }
 0x29f   : > { %vm10117_vm15 = vcmp.eq.s32.totalorder %v7494_v12, 1  ;;  %vm10116_vm2 = vcmp.eq.s32.totalorder %v7496_v4, 1 }
 0x2a0   : > { %v7521_v59 = vsel %vm10116_vm2, %v7503_v47, %v7510_v2  ;;  %v7527_v15 = vsel %vm10117_vm15, %v7068_v27, %v7515_v5 }
 0x2a1   : > { %2659 = vrot.lane.b32.xlu0 %v7521_v59, %s10126_s14 }
 0x2a4   : > { %v7555_v53 = vpop.f32.mrf.mxu0 }
 0x2a5   : > { %10179 = vst [vmem:[#allocation6_spill] sm:$0xff] %v7555_v53 }
 0x2a6   : > { %v7557_v58 = vpop.f32.mrf.mxu0 }
 0x2c4   : > { %v7559_v32 = vpop.f32.mrf.mxu0 }
 0x2c5   : > { %10180 = vst [vmem:[#allocation7_spill] sm:$0xff] %v7559_v32 }
 0x2c6   : > { %v7561_v52 = vpop.f32.mrf.mxu0 }
 0x2c7   : > { %10181 = vst [vmem:[#allocation8_spill] sm:$0xff] %v7561_v52 }
 0x2e4   : > { %v7563_v49 = vpop.f32.mrf.mxu0 }
 0x2e5   : > { %10182 = vst [vmem:[#allocation9_spill] sm:$0xff] %v7563_v49 }
 0x2e6   : > { %v7565_v28 = vpop.f32.mrf.mxu0 }
 0x2e7   : > { %10183 = vst [vmem:[#allocation10_spill] sm:$0xff] %v7565_v28 }
 0x303   : > { %v7567_v0 = vpop.f32.mrf.mxu0 }
 0x304   : > { %10184 = vst [vmem:[#allocation11_spill] sm:$0xff] %v7567_v0 }
 0x305   : > { %v7569_v56 = vpop.f32.mrf.mxu0 }
 0x306   : > { %10185 = vst [vmem:[#allocation12_spill] sm:$0xff] %v7569_v56  ;;  %v2182_v56 = vld [vmem:[%s10200_s2 + $0x28] sm:$0xff] }
 0x323   : > { %v5310_v39 = vpop.f32.mrf.mxu0 }
 0x324   : > { %v2122_v19 = vadd.f32 %v5310_v39, %v7008_v57 }
 0x325   : > { %v2116_v37 = vpop.f32.mrf.mxu0 }
 0x326   : > { %v2117_v24 = vadd.f32 %v7008_v57, %v2116_v37  ;;  %v7576_v45 = vmax.f32 %v2122_v19, 0.0 }
 0x328   : > { %v7573_v26 = vmax.f32 %v2117_v24, 0.0  ;;  %10187 = vst [vmem:[#allocation14_spill] sm:$0xff] %v7576_v45  ;;  %v2274_v36 = vrot.slane %v7576_v45, 7  ;;  %v10081_v39 = vrot.slane %v7576_v45, 6 }
 0x32a   : > { %10186 = vst [vmem:[#allocation13_spill] sm:$0xff] %v7573_v26  ;;  %v10080_v9 = vrot.slane %v7573_v26, 6  ;;  %v10076_v60 = vrot.slane %v7573_v26, 7  ;;  %v2185_v26 = vld [vmem:[%s10200_s2 + $0x40] sm:$0xff] }
 0x32b   : > { %5317 = vmatprep.subr.mxu1 %v2185_v26 }
 0x32c   : > { %v7609_v18 = vsel %vm10119_vm0, %v10080_v9, %v10081_v39  ;;  %5318 = vmatpush3.msra.mxu1 %v2185_v26  ;;  %v10202_v26 = vrot.slane %v7447_v61, 7 }
 0x32d   : > { %10191 = vst [vmem:[#allocation18_spill] sm:$0xff] %v7609_v18 }
 0x343   : > { %v5313_v10 = vpop.f32.mrf.mxu0 }
 0x344   : > { %v2132_v44 = vadd.f32 %v5313_v10, %v7008_v57 }
 0x345   : > { %v2126_v16 = vpop.f32.mrf.mxu0 }
 0x346   : > { %v7578_v34 = vmax.f32 %v2132_v44, 0.0  ;;  %v2127_v43 = vadd.f32 %v7008_v57, %v2126_v16 }
 0x348   : > { %10188 = vst [vmem:[#allocation15_spill] sm:$0xff] %v7578_v34  ;;  %v7581_v29 = vmax.f32 %v2127_v43, 0.0  ;;  %v2417_v37 = vrot.slane %v7578_v34, 6  ;;  %v2278_v24 = vrot.slane %v7578_v34, 7  ;;  %v7602_v43 = vsel %vm10118_vm1, %v10076_v60, %v2274_v36 }
 0x349   : > { %10190 = vst [vmem:[#allocation17_spill] sm:$0xff] %v7602_v43 }
 0x34a   : > { %10189 = vst [vmem:[#allocation16_spill] sm:$0xff] %v7581_v29  ;;  %v2276_v19 = vrot.slane %v7581_v29, 7  ;;  %v10074_v10 = vrot.slane %v7581_v29, 6 }
 0x34c   : > { %v7594_v44 = vsel %vm10119_vm0, %v10074_v10, %v2417_v37  ;;  %v7597_v16 = vsel %vm10118_vm1, %v2276_v19, %v2278_v24 }
 0x34d   : > { %v7615_v10 = vsel %vm2325_vm13, %v7602_v43, %v7597_v16  ;;  %v7621_v42 = vsel %vm10116_vm2, %v7609_v18, %v7594_v44 }
 0x34e   : > { %10192 = vst [vmem:[#allocation19_spill] sm:$0xff] %v7615_v10  ;;  %10193 = vst [vmem:[#allocation20_spill] sm:$0xff] %v7621_v42  ;;  %v10196_v42 = vrot.slane %v7445_v41, 7 }
 0x350   : > { %v5316_v60 = vpop.f32.mrf.mxu0 }
 0x351   : > { %v2142_v31 = vadd.f32 %v5316_v60, %v7008_v57 }
 0x352   : > { %v2136_v33 = vpop.f32.mrf.mxu0 }
 0x353   : > { %v7624_v54 = vmax.f32 %v2142_v31, 0.0  ;;  %v2137_v9 = vadd.f32 %v7008_v57, %v2136_v33  ;;  %v10197_v33 = vrot.slane %v7445_v41, 6 }
 0x355   : > { %10194 = vst [vmem:[#allocation21_spill] sm:$0xff] %v7624_v54  ;;  %v7627_v39 = vmax.f32 %v2137_v9, 0.0  ;;  %2755 = vrot.lane.b32.xlu0 %v7624_v54, %s10130_s15  ;;  %v2188_v1 = vrot.slane %v7624_v54, 7  ;;  %v2358_v10 = vrot.slane %v7624_v54, 6 }
 0x357   : > { %10195 = vst [vmem:[#allocation22_spill] sm:$0xff] %v7627_v39  ;;  %v2315_v18 = vsel %vm10118_vm1, %v2188_v1, %v10196_v42  ;;  %v2419_v60 = vrot.slane %v7627_v39, 6  ;;  %v2454_v9 = vsel %vm10119_vm0, %v2358_v10, %v10197_v33  ;;  %v2280_v33 = vrot.slane %v7627_v39, 7 }
 0x358   : > { %v7640_v31 = vsel %vm10120_vm14, %v2315_v18, %v7061_v48  ;;  %v7653_v42 = vsel %vm10117_vm15, %v2454_v9, %v7068_v27 }
 0x359   : > { %2529 = vrot.lane.b32.xlu1 %v7640_v31, %s10090_s16  ;;  %2533 = vrot.lane.b32.xlu0 %v7489_v38, %s10090_s16  ;;  %v2420_v43 = vsel %vm10119_vm0, %v2417_v37, %v2419_v60  ;;  %v2012_v37 = vadd.f32 %v7422_v14, %v7008_v57  ;;  %v2281_v27 = vsel %vm10118_vm1, %v2278_v24, %v2280_v33 }
 0x35a   : > { %v7657_v48 = vsel %vm10117_vm15, %v2420_v43, %v2454_v9  ;;  %v7673_v9 = vsel %vm10120_vm14, %v2281_v27, %v2315_v18  ;;  %v2282_v14 = vsel %vm10118_vm1, %v2280_v33, %v2188_v1  ;;  %v2184_v18 = vld [vmem:[%s10200_s2 + $0x38] sm:$0xff] }
 0x35b   : > { %10198 = vst [vmem:[#allocation23_spill] sm:$0xff] %v7657_v48  ;;  %10199 = vst [vmem:[#allocation24_spill] sm:$0xff] %v7673_v9  ;;  %v7678_v0 = vmax.f32 %v2012_v37, 0.0  ;;  %v7691_v24 = vsel %vm2325_vm13, %v2282_v14, %v7463_v22  ;;  %5319 = vmatprep.subr.mxu1 %v2184_v18  ;;  %v2183_v37 = vld [vmem:[%s10200_s2 + $0x30] sm:$0xff]  ;;  %v7707_v22 = vsel %vm10118_vm1, %v2274_v36, %v2276_v19 }
 0x35c   : > { %10201 = vst [vmem:[#allocation25_spill] sm:$0xff] %v7691_v24  ;;  %5320 = vmatpush3.msra.mxu1 %v2184_v18  ;;  %10203 = vst [vmem:[#allocation26_spill] sm:$0xff] %v7707_v22  ;;  %v7721_v18 = vsel %vm10120_vm14, %v7707_v22, %v2281_v27  ;;  %v2421_v36 = vsel %vm10119_vm0, %v2419_v60, %v2358_v10  ;;  %v2180_v27 = vld [vmem:[%s10200_s2 + $0x18] sm:$0xff]  ;;  %v2179_v22 = vld [vmem:[%s10200_s2 + $0x10] sm:$0xff] }
 0x35d   : > { %2657 = vrot.lane.b32.xlu1 %v7653_v42, %s10126_s14  ;;  %2945 = vrot.lane.b32.xlu0 %v7657_v48, %s10095_s24  ;;  %v2230_v1 = vrot.slane %v7678_v0, 7  ;;  %10204 = vst [vmem:[#allocation27_spill] sm:$0xff] %v7721_v18  ;;  %v7734_v19 = vsel %vm10116_vm2, %v2421_v36, %v7503_v47  ;;  %v2369_v10 = vrot.slane %v7678_v0, 6  ;;  %v10206_v47 = vrot.slane %v7447_v61, 6 }
 0x35e   : > { %5321 = vmatprep.subr.mxu1 %v2183_v37  ;;  %10205 = vst [vmem:[#allocation28_spill] sm:$0xff] %v7734_v19 }
 0x35f   : > { %v7704_v33 = vsel %vm10118_vm1, %v10202_v26, %v2230_v1  ;;  %5322 = vmatpush3.msra.mxu1 %v2183_v37  ;;  %v2370_v60 = vsel %vm10119_vm0, %v10206_v47, %v2369_v10  ;;  %v10207_v37 = vrot.slane %v7581_v29, 6  ;;  %v10208_v26 = vrot.slane %v7576_v45, 6 }
 0x360   : > { %v7716_v49 = vsel %vm2325_vm13, %v7468_v17, %v7704_v33  ;;  %v2181_v17 = vld [vmem:[%s10200_s2 + $0x20] sm:$0xff]  ;;  %5323 = vmatprep.subr.mxu1 %v2182_v56 }
 0x361   : > { %2753 = vrot.lane.b32.xlu1 %v7627_v39, %s10130_s15  ;;  %2661 = vrot.lane.b32.xlu0 %v7527_v15, %s10126_s14 }
 0x362   : > { %5324 = vmatpush3.msra.mxu1 %v2182_v56  ;;  %v2017_v56 = vadd.f32 %v7008_v57, %v7533_v20  ;;  %v7762_v57 = vsel %vm10116_vm2, %v7510_v2, %v2370_v60 }
 0x363   : > { %5325 = vmatprep.subr.mxu1 %v2181_v17 }
 0x364   : > { %5326 = vmatpush3.msra.mxu1 %v2181_v17  ;;  %v2178_v17 = vld [vmem:[%s10200_s2 + $0x8] sm:$0xff]  ;;  %v7776_v2 = vmax.f32 %v2017_v56, 0.0  ;;  %v7789_v56 = vsel %vm10116_vm2, %v7594_v44, %v2421_v36  ;;  %v7810_v36 = vld [vmem:[%s10033_s6] ss:$0 sm:$0xff] }
 0x365   : > { %2849 = vrot.lane.b32.xlu1 %v7673_v9, %s10132_s25  ;;  %3041 = vrot.lane.b32.xlu0 %v7581_v29, %s10124_s30  ;;  %10211 = vst [vmem:[#allocation31_spill] sm:$0xff] %v7789_v56 }
 0x366   : > { %5327 = vmatprep.subr.mxu1 %v2180_v27  ;;  %v2232_v47 = vrot.slane %v7776_v2, 7 }
 0x367   : > { %5328 = vmatpush3.msra.mxu1 %v2180_v27  ;;  %v2371_v27 = vrot.slane %v7776_v2, 6 }
 0x368   : > { %5329 = vmatprep.subr.mxu1 %v2179_v22 }
 0x369   : > { %2851 = vrot.lane.b32.xlu1 %v7691_v24, %s10132_s25  ;;  %2757 = vrot.lane.b32.xlu0 %v7445_v41, %s10130_s15 }
 0x36a   : > { %5330 = vmatpush3.msra.mxu1 %v2179_v22  ;;  %v2372_v22 = vsel %vm10119_vm0, %v2369_v10, %v2371_v27  ;;  %v2022_v10 = vadd.f32 %v7810_v36, %v7531_v46 }
 0x36b   : > { %5331 = vmatprep.subr.mxu1 %v2178_v17  ;;  %v7805_v44 = vsel %vm10117_vm15, %v7515_v5, %v2372_v22 }
 0x36c   : > { %5332 = vmatpush3.msra.mxu1 %v2178_v17  ;;  %v2027_v17 = vadd.f32 %v7810_v36, %v7537_v55 }
 0x36d   : > { %2535 = vrot.lane.b32.xlu1 %v7716_v49, %s10090_s16  ;;  %3137 = vrot.lane.b32.xlu0 %v7721_v18, %s10128_s29  ;;  %v7754_v18 = vsel %vm10119_vm0, %v10208_v26, %v10207_v37  ;;  %v7800_v37 = vsel %vm2325_vm13, %v7597_v16, %v2282_v14  ;;  %v2233_v16 = vsel %vm10118_vm1, %v2230_v1, %v2232_v47  ;;  %v7824_v14 = vmax.f32 %v2022_v10, 0.0  ;;  %s10213_s16 = smov 8  }
 0x36e   : > { %10209 = vst [vmem:[#allocation29_spill] sm:$0xff] %v7754_v18  ;;  %v7767_v20 = vsel %vm10117_vm15, %v7754_v18, %v2420_v43  ;;  %v2177_v43 = vld [vmem:[%s10200_s2] sm:$0xff]  ;;  %10212 = vst [vmem:[#allocation32_spill] sm:$0xff] %v7800_v37  ;;  %v7822_v5 = vsel %vm10120_vm14, %v7476_v30, %v2233_v16 }
 0x36f   : > { %10210 = vst [vmem:[#allocation30_spill] sm:$0xff] %v7767_v20  ;;  %5333 = vmatprep.subr.mxu1 %v2177_v43  ;;  %v2234_v46 = vrot.slane %v7824_v14, 7  ;;  %v2373_v26 = vrot.slane %v7824_v14, 6 }
 0x370   : > { %5334 = vmatpush3.msra.mxu1 %v2177_v43 }
 0x371   : > { %2947 = vrot.lane.b32.xlu1 %v7734_v19, %s10095_s24  ;;  %2853 = vrot.lane.b32.xlu0 %v7640_v31, %s10132_s25  ;;  %v2235_v1 = vsel %vm10118_vm1, %v2232_v47, %v2234_v46  ;;  %v7861_v47 = vmax.f32 %v2027_v17, 0.0  ;;  %v2032_v17 = vadd.f32 %v7810_v36, %v7535_v23  ;;  %s377_s24 = sand.u32 1, %s5563_s18  }
 0x372   : > { %v7839_v30 = vsel %vm2325_vm13, %v7704_v33, %v2235_v1  ;;  %v2374_v33 = vsel %vm10119_vm0, %v2371_v27, %v2373_v26  ;;  %s378_s0 = scalar_lea.vmem [#allocation2], %s377_s24 }
 0x373   : > { %v7855_v43 = vsel %vm10116_vm2, %v2370_v60, %v2374_v33  ;;  %v2375_v55 = vrot.slane %v7861_v47, 6  ;;  %v2236_v27 = vrot.slane %v7861_v47, 7 }
 0x375   : > { %2663 = vrot.lane.b32.xlu1 %v7762_v57, %s10126_s14  ;;  %3233 = vrot.lane.b32.xlu0 %v7767_v20, %s10134_s12  ;;  %v2376_v60 = vsel %vm10119_vm0, %v2373_v26, %v2375_v55 }
 0x376   : > { %v7876_v10 = vsel %vm10117_vm15, %v2372_v22, %v2376_v60 }
 0x379   : > { %3043 = vrot.lane.b32.xlu1 %v7578_v34, %s10124_s30  ;;  %2855 = vrot.lane.b32.xlu0 %v7483_v40, %s10132_s25 }
 0x37d   : > { %2759 = vrot.lane.b32.xlu1 %v7029_v11, %s10130_s15  ;;  %3235 = vrot.lane.b32.xlu0 %v7789_v56, %s10134_s12 }
 0x381   : > { %3139 = vrot.lane.b32.xlu1 %v7800_v37, %s10128_s29  ;;  %2665 = vrot.lane.b32.xlu0 %v7805_v44, %s10126_s14 }
 0x385   : > { %2537 = vrot.lane.b32.xlu1 %v7822_v5, %s10213_s16  ;;  %3045 = vrot.lane.b32.xlu0 %v7627_v39, %s10124_s30  ;;  %v7889_v39 = vmax.f32 %v2032_v17, 0.0 }
 0x387   : > { %v2238_v23 = vrot.slane %v7889_v39, 7 }
 0x389   : > { %2949 = vrot.lane.b32.xlu1 %v7653_v42, %s10214_s13  ;;  %2761 = vrot.lane.b32.xlu0 %v7042_v21, %s10130_s15  ;;  %v2239_v22 = vsel %vm10118_vm1, %v2236_v27, %v2238_v23 }
 0x38d   : > { %2539 = vrot.lane.b32.xlu1 %v7839_v30, %s10213_s16  ;;  %3141 = vrot.lane.b32.xlu0 %v7673_v9, %s10128_s29 }
 0x391   : > { %2951 = vrot.lane.b32.xlu1 %v7521_v59, %s10214_s13  ;;  %2857 = vrot.lane.b32.xlu0 %v7489_v38, %s10132_s25 }
 0x395   : > { %2667 = vrot.lane.b32.xlu1 %v7855_v43, %s10126_s14  ;;  %3237 = vrot.lane.b32.xlu0 %v7657_v48, %s10134_s12  ;;  %v2042_v48 = vadd.f32 %v7810_v36, %v7539_v25 }
 0x399   : > { %3047 = vrot.lane.b32.xlu1 %v7624_v54, %s10124_s30  ;;  %2859 = vrot.lane.b32.xlu0 %v7716_v49, %s10132_s25  ;;  %v2237_v54 = vsel %vm10118_vm1, %v2234_v46, %v2236_v27  ;;  %v2377_v46 = vrot.slane %v7889_v39, 6  ;;  %v2037_v27 = vadd.f32 %v7810_v36, %v7541_v3 }
 0x39a   : > { %v7887_v26 = vsel %vm10120_vm14, %v2233_v16, %v2237_v54  ;;  %v7903_v16 = vsel %vm2325_vm13, %v2235_v1, %v2239_v22 }
 0x39b   : > { %v2378_v1 = vsel %vm10119_vm0, %v2375_v55, %v2377_v46  ;;  %v7932_v55 = vpop.permute.xlu0 %2531 }
 0x39c   : > { %v7919_v17 = vsel %vm10116_vm2, %v2374_v33, %v2378_v1 }
 0x39d   : > { %2763 = vrot.lane.b32.xlu1 %v7449_v62, %s10130_s15  ;;  %3239 = vrot.lane.b32.xlu0 %v7734_v19, %s10134_s12  ;;  %v7957_v19 = vmax.f32 %v2042_v48, 0.0 }
 0x39f   : > { %v7950_v9 = vpop.permute.xlu0 %2659  ;;  %v2242_v25 = vrot.slane %v7957_v19, 7 }
 0x3a1   : > { %3143 = vrot.lane.b32.xlu1 %v7691_v24, %s10128_s29  ;;  %2669 = vrot.lane.b32.xlu0 %v7876_v10, %s10126_s14 }
 0x3a5   : > { %2541 = vrot.lane.b32.xlu1 %v7887_v26, %s10213_s16  ;;  %3049 = vrot.lane.b32.xlu0 %v7445_v41, %s10124_s30 }
 0x3a9   : > { %2953 = vrot.lane.b32.xlu1 %v7527_v15, %s10214_s13  ;;  %2765 = vrot.lane.b32.xlu0 %v7447_v61, %s10130_s15 }
 0x3ad   : > { %2543 = vrot.lane.b32.xlu1 %v7903_v16, %s10213_s16  ;;  %3145 = vrot.lane.b32.xlu0 %v7640_v31, %s10128_s29  ;;  %v7925_v31 = vmax.f32 %v2037_v27, 0.0 }
 0x3af   : > { %v2379_v3 = vrot.slane %v7925_v31, 6  ;;  %v2240_v33 = vrot.slane %v7925_v31, 7 }
 0x3b1   : > { %2955 = vrot.lane.b32.xlu1 %v7762_v57, %s10214_s13  ;;  %2861 = vrot.lane.b32.xlu0 %v7822_v5, %s10132_s25  ;;  %v7973_v48 = vsel %vm10118_vm1, %v2240_v33, %v2242_v25 }
 0x3b5   : > { %2671 = vrot.lane.b32.xlu1 %v7919_v17, %s10126_s14  ;;  %3241 = vrot.lane.b32.xlu0 %v7653_v42, %s10134_s12  ;;  %v2380_v42 = vsel %vm10119_vm0, %v2377_v46, %v2379_v3 }
 0x3b6   : > { %v7942_v27 = vsel %vm10117_vm15, %v2376_v60, %v2380_v42 }
 0x3b9   : > { %3051 = vrot.lane.b32.xlu1 %v7029_v11, %s10124_s30  ;;  %2863 = vrot.lane.b32.xlu0 %v7839_v30, %s10132_s25 }
 0x3bd   : > { %2767 = vrot.lane.b32.xlu1 %v7678_v0, %s10130_s15  ;;  %3243 = vrot.lane.b32.xlu0 %v7521_v59, %s10134_s12  ;;  %v2241_v59 = vsel %vm10118_vm1, %v2238_v23, %v2240_v33  ;;  %v7978_v23 = vsel %vm2325_vm13, %v2239_v22, %v7973_v48  ;;  %v2381_v33 = vrot.slane %v7957_v19, 6  ;;  %v2047_v22 = vadd.f32 %v7810_v36, %v7545_v13 }
 0x3be   : > { %v7955_v46 = vsel %vm10120_vm14, %v2237_v54, %v2241_v59 }
 0x3bf   : > { %v7994_v56 = vsel %vm10119_vm0, %v2379_v3, %v2381_v33  ;;  %v8005_v37 = vmax.f32 %v2047_v22, 0.0 }
 0x3c1   : > { %3147 = vrot.lane.b32.xlu1 %v7483_v40, %s10128_s29  ;;  %2673 = vrot.lane.b32.xlu0 %v7942_v27, %s10126_s14 }
 0x3c5   : > { %2545 = vrot.lane.b32.xlu1 %v7955_v46, %s10213_s16  ;;  %3053 = vrot.lane.b32.xlu0 %v7042_v21, %s10124_s30 }
 0x3c7   : > { %v7963_v40 = vpop.permute.xlu0 %2755 }
 0x3c9   : > { %2957 = vrot.lane.b32.xlu1 %v7805_v44, %s10214_s13  ;;  %2769 = vrot.lane.b32.xlu0 %v7776_v2, %s10130_s15 }
 0x3cb   : > { %v2530_v54 = vpop.permute.xlu1 %2529  ;;  %v7970_v60 = vpop.permute.xlu0 %2533 }
 0x3cc   : > { %v3329_v28 = vsel %vm1781_vm11, %v7445_v41, %v2530_v54  ;;  %v2244_v41 = vrot.slane %v8005_v37, 7 }
 0x3cd   : > { %2547 = vrot.lane.b32.xlu1 %v7978_v23, %s10213_s16  ;;  %3149 = vrot.lane.b32.xlu0 %v7489_v38, %s10128_s29  ;;  %v7999_v38 = vsel %vm10116_vm2, %v2378_v1, %v7994_v56  ;;  %v2383_v1 = vrot.slane %v8005_v37, 6 }
 0x3cf   : > { %v2658_v24 = vpop.permute.xlu1 %2657  ;;  %v2946_v29 = vpop.permute.xlu0 %2945  ;;  %v8025_v53 = vsel %vm10119_vm0, %v2381_v33, %v2383_v1 }
 0x3d1   : > { %2959 = vrot.lane.b32.xlu1 %v7855_v43, %s10214_s13  ;;  %2865 = vrot.lane.b32.xlu0 %v7887_v26, %s10132_s25 }
 0x3d3   : > { %v2754_v34 = vpop.permute.xlu1 %2753  ;;  %v7991_v45 = vpop.permute.xlu0 %2661 }
 0x3d5   : > { %2675 = vrot.lane.b32.xlu1 %v7999_v38, %s10126_s14  ;;  %3245 = vrot.lane.b32.xlu0 %v7527_v15, %s10134_s12  ;;  %v3362_v15 = vsel %vm3361_vm3, %v3329_v28, %v2658_v24  ;;  %v2052_v28 = vadd.f32 %v7810_v36, %v7543_v8 }
 0x3d6   : > { %v3395_v22 = vsel %vm3394_vm5, %v3362_v15, %v2754_v34 }
 0x3d7   : > { %v2850_v13 = vpop.permute.xlu1 %2849  ;;  %v3042_v20 = vpop.permute.xlu0 %3041 }
 0x3d8   : > { %v3428_v54 = vsel %vm3427_vm4, %v3395_v22, %v2850_v13  ;;  %v8044_v13 = vsel %vm10118_vm1, %v2242_v25, %v2244_v41 }
 0x3d9   : > { %3055 = vrot.lane.b32.xlu1 %v7449_v62, %s10124_s30  ;;  %2867 = vrot.lane.b32.xlu0 %v7903_v16, %s10132_s25  ;;  %v3461_v34 = vsel %vm3460_vm6, %v3428_v54, %v2946_v29  ;;  %v8049_v8 = vsel %vm10120_vm14, %v2241_v59, %v8044_v13 }
 0x3db   : > { %v2852_v3 = vpop.permute.xlu1 %2851  ;;  %v8011_v18 = vpop.permute.xlu0 %2757 }
 0x3dd   : > { %2771 = vrot.lane.b32.xlu1 %v7824_v14, %s10130_s15  ;;  %3247 = vrot.lane.b32.xlu0 %v7762_v57, %s10134_s12  ;;  %v8032_v57 = vsel %vm10117_vm15, %v2380_v42, %v8025_v53  ;;  %v8051_v42 = vmax.f32 %v2052_v28, 0.0 }
 0x3df   : > { %v8022_v32 = vpop.permute.xlu1 %2535  ;;  %v3138_v52 = vpop.permute.xlu0 %3137  ;;  %v2246_v22 = vrot.slane %v8051_v42, 7 }
 0x3e1   : > { %3151 = vrot.lane.b32.xlu1 %v7716_v49, %s10128_s29  ;;  %2677 = vrot.lane.b32.xlu0 %v8032_v57, %s10126_s14  ;;  %v3494_v49 = vsel %vm3493_vm7, %v3461_v34, %v3042_v20  ;;  %v3330_v34 = vsel %vm1781_vm11, %v7029_v11, %v7932_v55 }
 0x3e2   : > { %v3527_v29 = vsel %vm3526_vm8, %v3494_v49, %v3138_v52  ;;  %v8071_v52 = vsel %vm10118_vm1, %v2244_v41, %v2246_v22  ;;  %v3363_v41 = vsel %vm3361_vm3, %v3330_v34, %v7950_v9  ;;  %v2057_v9 = vadd.f32 %v7810_v36, %v7549_v35 }
 0x3e3   : > { %v2948_v24 = vpop.permute.xlu1 %2947  ;;  %v8041_v33 = vpop.permute.xlu0 %2853  ;;  %v8077_v28 = vsel %vm2325_vm13, %v7973_v48, %v8071_v52  ;;  %v3396_v48 = vsel %vm3394_vm5, %v3363_v41, %v7963_v40 }
 0x3e5   : > { %2549 = vrot.lane.b32.xlu1 %v8049_v8, %s10213_s16  ;;  %3057 = vrot.lane.b32.xlu0 %v7447_v61, %s10124_s30 }
 0x3e7   : > { %v8059_v25 = vpop.permute.xlu1 %2663  ;;  %v3234_v15 = vpop.permute.xlu0 %3233 }
 0x3e8   : > { %v3560_v59 = vsel %vm10136_vm9, %v3527_v29, %v3234_v15  ;;  %v3429_v15 = vsel %vm3427_vm4, %v3396_v48, %v2852_v3 }
 0x3e9   : > { %2961 = vrot.lane.b32.xlu1 %v7876_v10, %s10214_s13  ;;  %2773 = vrot.lane.b32.xlu0 %v7861_v47, %s10130_s15  ;;  %v3462_v11 = vsel %vm3460_vm6, %v3429_v15, %v2948_v24 }
 0x3ea   : > { %5335 = vmatprep.mubr.msk.f32.mxu1 %vm10123_vm10, %v3560_v59 }
 0x3eb   : > { %v3044_v54 = vpop.permute.xlu1 %3043  ;;  %v8068_v20 = vpop.permute.xlu0 %2855 }
 0x3ec   : > { %v3495_v55 = vsel %vm3493_vm7, %v3462_v11, %v3044_v54 }
 0x3ed   : > { %2551 = vrot.lane.b32.xlu1 %v8077_v28, %s10213_s16  ;;  %3153 = vrot.lane.b32.xlu0 %v7822_v5, %s10128_s29  ;;  %v2385_v5 = vrot.slane %v8051_v42, 6 }
 0x3ef   : > { %v8088_v49 = vpop.permute.xlu1 %2759  ;;  %v3236_v29 = vpop.permute.xlu0 %3235  ;;  %v8105_v40 = vsel %vm10119_vm0, %v2383_v1, %v2385_v5  ;;  %v8120_v1 = vmax.f32 %v2057_v9, 0.0 }
 0x3f0   : > { %v8112_v41 = vsel %vm10116_vm2, %v7994_v56, %v8105_v40 }
 0x3f1   : > { %2963 = vrot.lane.b32.xlu1 %v7919_v17, %s10214_s13  ;;  %2869 = vrot.lane.b32.xlu0 %v7955_v46, %s10132_s25 }
 0x3f3   : > { %v3140_v59 = vpop.permute.xlu1 %3139  ;;  %v8102_v34 = vpop.permute.xlu0 %2665 }
 0x3f4   : > { %v3528_v3 = vsel %vm3526_vm8, %v3495_v55, %v3140_v59  ;;  %v2248_v55 = vrot.slane %v8120_v1, 7 }
 0x3f5   : > { %2679 = vrot.lane.b32.xlu1 %v8112_v41, %s10126_s14  ;;  %3249 = vrot.lane.b32.xlu0 %v7805_v44, %s10134_s12  ;;  %v3561_v35 = vsel %vm10136_vm9, %v3528_v3, %v3236_v29  ;;  %v2387_v44 = vrot.slane %v8120_v1, 6  ;;  %v3331_v29 = vsel %vm1781_vm11, %v7042_v21, %v7970_v60  ;;  %v2062_v21 = vadd.f32 %v7810_v36, %v7547_v50 }
 0x3f6   : > { %5336 = vmatmul.mubr.msk.f32.vlgmr.msra.gmra.mxu1 %vm10123_vm10, %v3561_v35  ;;  %v3364_v59 = vsel %vm3361_vm3, %v3331_v29, %v7991_v45  ;;  %v8166_v35 = vsel %vm10118_vm1, %v2246_v22, %v2248_v55 }
 0x3f7   : > { %v8122_v24 = vpop.permute.xlu1 %2537  ;;  %v3046_v54 = vpop.permute.xlu0 %3045  ;;  %v8141_v9 = vsel %vm10119_vm0, %v2385_v5, %v2387_v44  ;;  %v3397_v60 = vsel %vm3394_vm5, %v3364_v59, %v8011_v18  ;;  %v8172_v50 = vsel %vm10120_vm14, %v8044_v13, %v8166_v35  ;;  %v8174_v18 = vmax.f32 %v2062_v21, 0.0 }
 0x3f8   : > { %v3430_v45 = vsel %vm3427_vm4, %v3397_v60, %v8041_v33 }
 0x3f9   : > { %3059 = vrot.lane.b32.xlu1 %v7678_v0, %s10124_s30  ;;  %2871 = vrot.lane.b32.xlu0 %v7978_v23, %s10132_s25  ;;  %v2250_v13 = vrot.slane %v8174_v18, 7 }
 0x3fb   : > { %v2950_v56 = vpop.permute.xlu1 %2949  ;;  %v8128_v48 = vpop.permute.xlu0 %2761 }
 0x3fc   : > { %v3463_v5 = vsel %vm3460_vm6, %v3430_v45, %v2950_v56 }
 0x3fd   : > { %2775 = vrot.lane.b32.xlu1 %v7889_v39, %s10130_s15  ;;  %3251 = vrot.lane.b32.xlu0 %v7855_v43, %s10134_s12  ;;  %v8150_v43 = vsel %vm10117_vm15, %v8025_v53, %v8141_v9 }
 0x3ff   : > { %v8138_v15 = vpop.permute.xlu1 %2539  ;;  %v3142_v11 = vpop.permute.xlu0 %3141 }
 0x401   : > { %3155 = vrot.lane.b32.xlu1 %v7839_v30, %s10128_s29  ;;  %2681 = vrot.lane.b32.xlu0 %v8150_v43, %s10126_s14  ;;  %v3496_v30 = vsel %vm3493_vm7, %v3463_v5, %v3046_v54  ;;  %v8194_v54 = vsel %vm10118_vm1, %v2248_v55, %v2250_v13 }
 0x402   : > { %v3529_v33 = vsel %vm3526_vm8, %v3496_v30, %v3142_v11  ;;  %v3332_v11 = vsel %vm1781_vm11, %v7449_v62, %v8022_v32  ;;  %v8203_v60 = vsel %vm2325_vm13, %v8071_v52, %v8194_v54 }
 0x403   : > { %v2952_v3 = vpop.permute.xlu1 %2951  ;;  %v8163_v53 = vpop.permute.xlu0 %2857  ;;  %v3365_v45 = vsel %vm3361_vm3, %v3332_v11, %v8059_v25  ;;  %v2389_v25 = vrot.slane %v8174_v18, 6 }
 0x404   : > { %v3398_v55 = vsel %vm3394_vm5, %v3365_v45, %v8088_v49  ;;  %v3333_v45 = vsel %vm1781_vm11, %v7447_v61, %v8122_v24 }
 0x405   : > { %2553 = vrot.lane.b32.xlu1 %v8172_v50, %s10213_s16  ;;  %3061 = vrot.lane.b32.xlu0 %v7776_v2, %s10124_s30  ;;  %v3431_v32 = vsel %vm3427_vm4, %v3398_v55, %v8068_v20  ;;  %v8229_v20 = vsel %vm10119_vm0, %v2387_v44, %v2389_v25 }
 0x406   : > { %v3464_v52 = vsel %vm3460_vm6, %v3431_v32, %v2952_v3 }
 0x407   : > { %v8182_v22 = vpop.permute.xlu1 %2667  ;;  %v3238_v56 = vpop.permute.xlu0 %3237 }
 0x408   : > { %v3562_v29 = vsel %vm10136_vm9, %v3529_v33, %v3238_v56 }
 0x409   : > { %2965 = vrot.lane.b32.xlu1 %v7942_v27, %s10214_s13  ;;  %2777 = vrot.lane.b32.xlu0 %v7925_v31, %s10130_s15 }
 0x40a   : > { %5338 = vmatprep.mubr.msk.f32.mxu1 %vm10123_vm10, %v3562_v29  ;;  %v8236_v29 = vsel %vm10116_vm2, %v8105_v40, %v8229_v20 }
 0x40b   : > { %v3048_v59 = vpop.permute.xlu1 %3047  ;;  %v8191_v21 = vpop.permute.xlu0 %2859 }
 0x40c   : > { %v3497_v49 = vsel %vm3493_vm7, %v3464_v52, %v3048_v59 }
 0x40d   : > { %2555 = vrot.lane.b32.xlu1 %v8203_v60, %s10213_s16  ;;  %3157 = vrot.lane.b32.xlu0 %v7887_v26, %s10128_s29  ;;  %v2067_v26 = vadd.f32 %v7810_v36, %v7553_v7 }
 0x40f   : > { %v8213_v5 = vpop.permute.xlu1 %2763  ;;  %v3240_v62 = vpop.permute.xlu0 %3239  ;;  %v8244_v44 = vmax.f32 %v2067_v26, 0.0  ;;  %v3366_v26 = vsel %vm3361_vm3, %v3333_v45, %v8102_v34 }
 0x410   : > { %v3399_v24 = vsel %vm3394_vm5, %v3366_v26, %v8128_v48 }
 0x411   : > { %2967 = vrot.lane.b32.xlu1 %v7999_v38, %s10214_s13  ;;  %2873 = vrot.lane.b32.xlu0 %v8049_v8, %s10132_s25  ;;  %v2252_v52 = vrot.slane %v8244_v44, 7  ;;  %v3432_v34 = vsel %vm3427_vm4, %v3399_v24, %v8163_v53 }
 0x413   : > { %v3144_v30 = vpop.permute.xlu1 %3143  ;;  %v8226_v33 = vpop.permute.xlu0 %2669 }
 0x414   : > { %v3530_v56 = vsel %vm3526_vm8, %v3497_v49, %v3144_v30  ;;  %v8290_v30 = vsel %vm10118_vm1, %v2250_v13, %v2252_v52 }
 0x415   : > { %2683 = vrot.lane.b32.xlu1 %v8236_v29, %s10126_s14  ;;  %3253 = vrot.lane.b32.xlu0 %v7876_v10, %s10134_s12  ;;  %v3563_v7 = vsel %vm10136_vm9, %v3530_v56, %v3240_v62  ;;  %v2391_v10 = vrot.slane %v8244_v44, 6 }
 0x416   : > { %5339 = vmatmul.mubr.msk.f32.gmra.mxu1 %vm10123_vm10, %v3563_v7 }
 0x417   : > { %v8246_v3 = vpop.permute.xlu1 %2541  ;;  %v3050_v59 = vpop.permute.xlu0 %3049  ;;  %v8265_v32 = vsel %vm10119_vm0, %v2389_v25, %v2391_v10 }
 0x418   : > { %v8274_v61 = vsel %vm10117_vm15, %v8141_v9, %v8265_v32 }
 0x419   : > { %3063 = vrot.lane.b32.xlu1 %v7824_v14, %s10124_s30  ;;  %2875 = vrot.lane.b32.xlu0 %v8077_v28, %s10132_s25 }
 0x41b   : > { %v2954_v40 = vpop.permute.xlu1 %2953  ;;  %v8252_v11 = vpop.permute.xlu0 %2765 }
 0x41c   : > { %v3465_v25 = vsel %vm3460_vm6, %v3432_v34, %v2954_v40 }
 0x41d   : > { %2779 = vrot.lane.b32.xlu1 %v7957_v19, %s10130_s15  ;;  %3255 = vrot.lane.b32.xlu0 %v7919_v17, %s10134_s12  ;;  %v2072_v17 = vadd.f32 %v7810_v36, %v7551_v63  ;;  %v8296_v63 = vsel %vm10120_vm14, %v8166_v35, %v8290_v30  ;;  %v3498_v48 = vsel %vm3493_vm7, %v3465_v25, %v3050_v59 }
 0x41f   : > { %v8262_v55 = vpop.permute.xlu1 %2543  ;;  %v3146_v62 = vpop.permute.xlu0 %3145 }
 0x420   : > { %v3531_v53 = vsel %vm3526_vm8, %v3498_v48, %v3146_v62  ;;  %v3334_v62 = vsel %vm1781_vm11, %v7678_v0, %v8138_v15  ;;  %v2077_v15 = vadd.f32 %v7810_v36, %v7557_v58 }
 0x421   : > { %3159 = vrot.lane.b32.xlu1 %v7903_v16, %s10128_s29  ;;  %2685 = vrot.lane.b32.xlu0 %v8274_v61, %s10126_s14  ;;  %v8298_v16 = vmax.f32 %v2072_v17, 0.0  ;;  %v3367_v17 = vsel %vm3361_vm3, %v3334_v62, %v8182_v22 }
 0x423   : > { %v2956_v49 = vpop.permute.xlu1 %2955  ;;  %v8287_v9 = vpop.permute.xlu0 %2861  ;;  %v2254_v35 = vrot.slane %v8298_v16, 7 }
 0x425   : > { %2557 = vrot.lane.b32.xlu1 %v8296_v63, %s10213_s16  ;;  %3065 = vrot.lane.b32.xlu0 %v7861_v47, %s10124_s30  ;;  %v8318_v59 = vsel %vm10118_vm1, %v2252_v52, %v2254_v35  ;;  %v3400_v52 = vsel %vm3394_vm5, %v3367_v17, %v8213_v5 }
 0x426   : > { %v8327_v26 = vsel %vm2325_vm13, %v8194_v54, %v8318_v59  ;;  %v3433_v54 = vsel %vm3427_vm4, %v3400_v52, %v8191_v21  ;;  %v10215_v52 = vld [vmem:[#allocation6_spill] sm:$0xff] }
 0x427   : > { %v8306_v13 = vpop.permute.xlu1 %2671  ;;  %v3242_v56 = vpop.permute.xlu0 %3241  ;;  %v3466_v22 = vsel %vm3460_vm6, %v3433_v54, %v2956_v49 }
 0x428   : > { %v3564_v7 = vsel %vm10136_vm9, %v3531_v53, %v3242_v56  ;;  %v8362_v53 = vmax.f32 %v2077_v15, 0.0 }
 0x429   : > { %2969 = vrot.lane.b32.xlu1 %v8032_v57, %s10214_s13  ;;  %2781 = vrot.lane.b32.xlu0 %v8005_v37, %s10130_s15 }
 0x42a   : > { %5341 = vmatprep.mubr.msk.f32.mxu1 %vm10123_vm10, %v3564_v7  ;;  %v2256_v17 = vrot.slane %v8362_v53, 7 }
 0x42b   : > { %v3052_v40 = vpop.permute.xlu1 %3051  ;;  %v8315_v45 = vpop.permute.xlu0 %2863 }
 0x42c   : > { %v3499_v5 = vsel %vm3493_vm7, %v3466_v22, %v3052_v40 }
 0x42d   : > { %2559 = vrot.lane.b32.xlu1 %v8327_v26, %s10213_s16  ;;  %3161 = vrot.lane.b32.xlu0 %v7955_v46, %s10128_s29  ;;  %v2393_v46 = vrot.slane %v8298_v16, 6 }
 0x42f   : > { %v8337_v24 = vpop.permute.xlu1 %2767  ;;  %v3244_v0 = vpop.permute.xlu0 %3243  ;;  %v8353_v58 = vsel %vm10119_vm0, %v2391_v10, %v2393_v46 }
 0x430   : > { %v8360_v48 = vsel %vm10116_vm2, %v8229_v20, %v8353_v58  ;;  %v2395_v20 = vrot.slane %v8362_v53, 6 }
 0x431   : > { %2971 = vrot.lane.b32.xlu1 %v8112_v41, %s10214_s13  ;;  %2877 = vrot.lane.b32.xlu0 %v8172_v50, %s10132_s25 }
 0x432   : > { %v8387_v62 = vsel %vm10119_vm0, %v2393_v46, %v2395_v20  ;;  %v8409_v46 = vsel %vm10118_vm1, %v2254_v35, %v2256_v17 }
 0x433   : > { %v3148_v34 = vpop.permute.xlu1 %3147  ;;  %v8350_v25 = vpop.permute.xlu0 %2673 }
 0x434   : > { %v3532_v21 = vsel %vm3526_vm8, %v3499_v5, %v3148_v34 }
 0x435   : > { %2687 = vrot.lane.b32.xlu1 %v8360_v48, %s10126_s14  ;;  %3257 = vrot.lane.b32.xlu0 %v7942_v27, %s10134_s12  ;;  %v3565_v49 = vsel %vm10136_vm9, %v3532_v21, %v3244_v0  ;;  %v3335_v27 = vsel %vm1781_vm11, %v7776_v2, %v8246_v3  ;;  %v2082_v0 = vadd.f32 %v7810_v36, %v10215_v52 }
 0x436   : > { %5342 = vmatmul.mubr.msk.f32.gmra.mxu1 %vm10123_vm10, %v3565_v49  ;;  %v3368_v2 = vsel %vm3361_vm3, %v3335_v27, %v8226_v33  ;;  %v8400_v3 = vsel %vm10117_vm15, %v8265_v32, %v8387_v62  ;;  %v3336_v52 = vsel %vm1781_vm11, %v7824_v14, %v8262_v55 }
 0x437   : > { %v8370_v10 = vpop.permute.xlu1 %2545  ;;  %v3054_v56 = vpop.permute.xlu0 %3053  ;;  %v8413_v22 = vmax.f32 %v2082_v0, 0.0 }
 0x439   : > { %3067 = vrot.lane.b32.xlu1 %v7889_v39, %s10124_s30  ;;  %2879 = vrot.lane.b32.xlu0 %v8203_v60, %s10132_s25  ;;  %v2258_v49 = vrot.slane %v8413_v22, 7  ;;  %v2397_v55 = vrot.slane %v8413_v22, 6 }
 0x43b   : > { %v2958_v7 = vpop.permute.xlu1 %2957  ;;  %v8377_v40 = vpop.permute.xlu0 %2769 }
 0x43d   : > { %2783 = vrot.lane.b32.xlu1 %v8051_v42, %s10130_s15  ;;  %3259 = vrot.lane.b32.xlu0 %v7999_v38, %s10134_s12  ;;  %v3401_v38 = vsel %vm3394_vm5, %v3368_v2, %v8252_v11 }
 0x43e   : > { %v3434_v33 = vsel %vm3427_vm4, %v3401_v38, %v8287_v9  ;;  %v10216_v38 = vld [vmem:[#allocation8_spill] sm:$0xff] }
 0x43f   : > { %v8392_v15 = vpop.permute.xlu1 %2547  ;;  %v3150_v54 = vpop.permute.xlu0 %3149  ;;  %v3467_v32 = vsel %vm3460_vm6, %v3434_v33, %v2958_v7 }
 0x440   : > { %v3500_v11 = vsel %vm3493_vm7, %v3467_v32, %v3054_v56 }
 0x441   : > { %3163 = vrot.lane.b32.xlu1 %v7978_v23, %s10128_s29  ;;  %2689 = vrot.lane.b32.xlu0 %v8400_v3, %s10126_s14  ;;  %v8422_v23 = vsel %vm10120_vm14, %v8290_v30, %v8409_v46  ;;  %v3533_v9 = vsel %vm3526_vm8, %v3500_v11, %v3150_v54  ;;  %v8439_v30 = vsel %vm10118_vm1, %v2256_v17, %v2258_v49 }
 0x442   : > { %v8451_v0 = vsel %vm2325_vm13, %v8318_v59, %v8439_v30  ;;  %v3369_v54 = vsel %vm3361_vm3, %v3336_v52, %v8306_v13  ;;  %v2087_v59 = vadd.f32 %v7810_v36, %v10216_v38 }
 0x443   : > { %v2960_v5 = vpop.permute.xlu1 %2959  ;;  %v8416_v34 = vpop.permute.xlu0 %2865  ;;  %v3402_v17 = vsel %vm3394_vm5, %v3369_v54, %v8337_v24 }
 0x444   : > { %v3435_v13 = vsel %vm3427_vm4, %v3402_v17, %v8315_v45 }
 0x445   : > { %2561 = vrot.lane.b32.xlu1 %v8422_v23, %s10213_s16  ;;  %3069 = vrot.lane.b32.xlu0 %v7925_v31, %s10124_s30  ;;  %v3468_v24 = vsel %vm3460_vm6, %v3435_v13, %v2960_v5 }
 0x447   : > { %v8430_v35 = vpop.permute.xlu1 %2675  ;;  %v3246_v21 = vpop.permute.xlu0 %3245 }
 0x448   : > { %v3566_v7 = vsel %vm10136_vm9, %v3533_v9, %v3246_v21  ;;  %v8486_v21 = vmax.f32 %v2087_v59, 0.0 }
 0x449   : > { %2973 = vrot.lane.b32.xlu1 %v8150_v43, %s10214_s13  ;;  %2785 = vrot.lane.b32.xlu0 %v8120_v1, %s10130_s15 }
 0x44a   : > { %5344 = vmatprep.mubr.msk.f32.mxu1 %vm10123_vm10, %v3566_v7  ;;  %v2260_v17 = vrot.slane %v8486_v21, 7 }
 0x44b   : > { %v3056_v56 = vpop.permute.xlu1 %3055  ;;  %v8442_v27 = vpop.permute.xlu0 %2867 }
 0x44c   : > { %v3501_v33 = vsel %vm3493_vm7, %v3468_v24, %v3056_v56 }
 0x44d   : > { %2563 = vrot.lane.b32.xlu1 %v8451_v0, %s10213_s16  ;;  %3165 = vrot.lane.b32.xlu0 %v8049_v8, %s10128_s29  ;;  %v8473_v8 = vsel %vm10119_vm0, %v2395_v20, %v2397_v55 }
 0x44e   : > { %v8484_v45 = vsel %vm10116_vm2, %v8353_v58, %v8473_v8  ;;  %v2399_v58 = vrot.slane %v8486_v21, 6 }
 0x44f   : > { %v8461_v2 = vpop.permute.xlu1 %2771  ;;  %v3248_v14 = vpop.permute.xlu0 %3247 }
 0x450   : > { %v8511_v54 = vsel %vm10119_vm0, %v2397_v55, %v2399_v58  ;;  %v8533_v55 = vsel %vm10118_vm1, %v2258_v49, %v2260_v17 }
 0x451   : > { %2975 = vrot.lane.b32.xlu1 %v8236_v29, %s10214_s13  ;;  %2881 = vrot.lane.b32.xlu0 %v8296_v63, %s10132_s25 }
 0x453   : > { %v3152_v32 = vpop.permute.xlu1 %3151  ;;  %v8477_v11 = vpop.permute.xlu0 %2677 }
 0x454   : > { %v3534_v9 = vsel %vm3526_vm8, %v3501_v33, %v3152_v32 }
 0x455   : > { %2691 = vrot.lane.b32.xlu1 %v8484_v45, %s10126_s14  ;;  %3261 = vrot.lane.b32.xlu0 %v8032_v57, %s10134_s12  ;;  %v3567_v20 = vsel %vm10136_vm9, %v3534_v9, %v3248_v14  ;;  %v3337_v57 = vsel %vm1781_vm11, %v7861_v47, %v8370_v10  ;;  %v10217_v14 = vld [vmem:[#allocation7_spill] sm:$0xff]  ;;  %v8524_v10 = vsel %vm10117_vm15, %v8387_v62, %v8511_v54 }
 0x456   : > { %5345 = vmatmul.mubr.msk.f32.gmra.mxu1 %vm10123_vm10, %v3567_v20  ;;  %v2092_v38 = vadd.f32 %v7810_v36, %v10217_v14  ;;  %v3370_v47 = vsel %vm3361_vm3, %v3337_v57, %v8350_v25  ;;  %v3338_v14 = vsel %vm1781_vm11, %v7889_v39, %v8392_v15 }
 0x457   : > { %v8494_v5 = vpop.permute.xlu1 %2549  ;;  %v3058_v7 = vpop.permute.xlu0 %3057 }
 0x458   : > { %v8537_v24 = vmax.f32 %v2092_v38, 0.0 }
 0x459   : > { %3071 = vrot.lane.b32.xlu1 %v7957_v19, %s10124_s30  ;;  %2883 = vrot.lane.b32.xlu0 %v8327_v26, %s10132_s25 }
 0x45a   : > { %v2262_v20 = vrot.slane %v8537_v24, 7  ;;  %v2401_v15 = vrot.slane %v8537_v24, 6 }
 0x45b   : > { %v2962_v56 = vpop.permute.xlu1 %2961  ;;  %v8501_v52 = vpop.permute.xlu0 %2773 }
 0x45d   : > { %2787 = vrot.lane.b32.xlu1 %v8174_v18, %s10130_s15  ;;  %3263 = vrot.lane.b32.xlu0 %v8112_v41, %s10134_s12  ;;  %v3403_v41 = vsel %vm3394_vm5, %v3370_v47, %v8377_v40 }
 0x45e   : > { %v3436_v25 = vsel %vm3427_vm4, %v3403_v41, %v8416_v34  ;;  %v10218_v41 = vld [vmem:[#allocation10_spill] sm:$0xff] }
 0x45f   : > { %v8516_v59 = vpop.permute.xlu1 %2551  ;;  %v3154_v13 = vpop.permute.xlu0 %3153  ;;  %v3469_v62 = vsel %vm3460_vm6, %v3436_v25, %v2962_v56 }
 0x460   : > { %v3502_v40 = vsel %vm3493_vm7, %v3469_v62, %v3058_v7 }
 0x461   : > { %3167 = vrot.lane.b32.xlu1 %v8077_v28, %s10128_s29  ;;  %2693 = vrot.lane.b32.xlu0 %v8524_v10, %s10126_s14  ;;  %v8546_v28 = vsel %vm10120_vm14, %v8409_v46, %v8533_v55  ;;  %v3535_v34 = vsel %vm3526_vm8, %v3502_v40, %v3154_v13  ;;  %v8563_v46 = vsel %vm10118_vm1, %v2260_v17, %v2262_v20 }
 0x462   : > { %v8575_v38 = vsel %vm2325_vm13, %v8439_v30, %v8563_v46  ;;  %v3371_v13 = vsel %vm3361_vm3, %v3338_v14, %v8430_v35  ;;  %v2097_v30 = vadd.f32 %v7810_v36, %v10218_v41 }
 0x463   : > { %v2964_v33 = vpop.permute.xlu1 %2963  ;;  %v8540_v32 = vpop.permute.xlu0 %2869  ;;  %v3404_v17 = vsel %vm3394_vm5, %v3371_v13, %v8461_v2 }
 0x464   : > { %v3437_v35 = vsel %vm3427_vm4, %v3404_v17, %v8442_v27 }
 0x465   : > { %2565 = vrot.lane.b32.xlu1 %v8546_v28, %s10213_s16  ;;  %3073 = vrot.lane.b32.xlu0 %v8005_v37, %s10124_s30  ;;  %v3470_v2 = vsel %vm3460_vm6, %v3437_v35, %v2964_v33 }
 0x467   : > { %v8554_v49 = vpop.permute.xlu1 %2679  ;;  %v3250_v9 = vpop.permute.xlu0 %3249 }
 0x468   : > { %v3568_v56 = vsel %vm10136_vm9, %v3535_v34, %v3250_v9  ;;  %v8610_v9 = vmax.f32 %v2097_v30, 0.0 }
 0x469   : > { %2977 = vrot.lane.b32.xlu1 %v8274_v61, %s10214_s13  ;;  %2789 = vrot.lane.b32.xlu0 %v8244_v44, %s10130_s15 }
 0x46a   : > { %5347 = vmatprep.mubr.msk.f32.mxu1 %vm10123_vm10, %v3568_v56  ;;  %v2264_v17 = vrot.slane %v8610_v9, 7 }
 0x46b   : > { %v3060_v7 = vpop.permute.xlu1 %3059  ;;  %v8566_v57 = vpop.permute.xlu0 %2871 }
 0x46c   : > { %v3503_v25 = vsel %vm3493_vm7, %v3470_v2, %v3060_v7 }
 0x46d   : > { %2567 = vrot.lane.b32.xlu1 %v8575_v38, %s10213_s16  ;;  %3169 = vrot.lane.b32.xlu0 %v8172_v50, %s10128_s29  ;;  %v8597_v50 = vsel %vm10119_vm0, %v2399_v58, %v2401_v15 }
 0x46e   : > { %v8608_v27 = vsel %vm10116_vm2, %v8473_v8, %v8597_v50  ;;  %v2403_v8 = vrot.slane %v8610_v9, 6 }
 0x46f   : > { %v8585_v47 = vpop.permute.xlu1 %2775  ;;  %v3252_v39 = vpop.permute.xlu0 %3251 }
 0x470   : > { %v8635_v13 = vsel %vm10119_vm0, %v2401_v15, %v2403_v8  ;;  %v8657_v15 = vsel %vm10118_vm1, %v2262_v20, %v2264_v17 }
 0x471   : > { %2979 = vrot.lane.b32.xlu1 %v8360_v48, %s10214_s13  ;;  %2885 = vrot.lane.b32.xlu0 %v8422_v23, %s10132_s25 }
 0x473   : > { %v3156_v62 = vpop.permute.xlu1 %3155  ;;  %v8601_v40 = vpop.permute.xlu0 %2681 }
 0x474   : > { %v3536_v34 = vsel %vm3526_vm8, %v3503_v25, %v3156_v62 }
 0x475   : > { %2695 = vrot.lane.b32.xlu1 %v8608_v27, %s10126_s14  ;;  %3265 = vrot.lane.b32.xlu0 %v8150_v43, %s10134_s12  ;;  %v3569_v58 = vsel %vm10136_vm9, %v3536_v34, %v3252_v39  ;;  %v3339_v43 = vsel %vm1781_vm11, %v7925_v31, %v8494_v5  ;;  %v10219_v39 = vld [vmem:[#allocation9_spill] sm:$0xff]  ;;  %v8648_v5 = vsel %vm10117_vm15, %v8511_v54, %v8635_v13 }
 0x476   : > { %5348 = vmatmul.mubr.msk.f32.gmra.mxu1 %vm10123_vm10, %v3569_v58  ;;  %v2102_v41 = vadd.f32 %v7810_v36, %v10219_v39  ;;  %v3372_v31 = vsel %vm3361_vm3, %v3339_v43, %v8477_v11  ;;  %v3340_v39 = vsel %vm1781_vm11, %v7957_v19, %v8516_v59 }
 0x477   : > { %v8618_v33 = vpop.permute.xlu1 %2553  ;;  %v3062_v56 = vpop.permute.xlu0 %3061 }
 0x478   : > { %v8661_v2 = vmax.f32 %v2102_v41, 0.0 }
 0x479   : > { %3075 = vrot.lane.b32.xlu1 %v8051_v42, %s10124_s30  ;;  %2887 = vrot.lane.b32.xlu0 %v8451_v0, %s10132_s25 }
 0x47a   : > { %v2266_v58 = vrot.slane %v8661_v2, 7  ;;  %v2405_v59 = vrot.slane %v8661_v2, 6 }
 0x47b   : > { %v2966_v7 = vpop.permute.xlu1 %2965  ;;  %v8625_v14 = vpop.permute.xlu0 %2777 }
 0x47d   : > { %2791 = vrot.lane.b32.xlu1 %v8298_v16, %s10130_s15  ;;  %3267 = vrot.lane.b32.xlu0 %v8236_v29, %s10134_s12  ;;  %v3405_v29 = vsel %vm3394_vm5, %v3372_v31, %v8501_v52 }
 0x47e   : > { %v3438_v11 = vsel %vm3427_vm4, %v3405_v29, %v8540_v32  ;;  %v10220_v29 = vld [vmem:[#allocation12_spill] sm:$0xff] }
 0x47f   : > { %v8640_v30 = vpop.permute.xlu1 %2555  ;;  %v3158_v35 = vpop.permute.xlu0 %3157  ;;  %v3471_v54 = vsel %vm3460_vm6, %v3438_v11, %v2966_v7 }
 0x480   : > { %v3504_v52 = vsel %vm3493_vm7, %v3471_v54, %v3062_v56 }
 0x481   : > { %3171 = vrot.lane.b32.xlu1 %v8203_v60, %s10128_s29  ;;  %2697 = vrot.lane.b32.xlu0 %v8648_v5, %s10126_s14  ;;  %v8670_v60 = vsel %vm10120_vm14, %v8533_v55, %v8657_v15  ;;  %v3537_v32 = vsel %vm3526_vm8, %v3504_v52, %v3158_v35  ;;  %v8687_v55 = vsel %vm10118_vm1, %v2264_v17, %v2266_v58 }
 0x482   : > { %v8699_v41 = vsel %vm2325_vm13, %v8563_v46, %v8687_v55  ;;  %v3373_v35 = vsel %vm3361_vm3, %v3340_v39, %v8554_v49  ;;  %v2107_v46 = vadd.f32 %v7810_v36, %v10220_v29 }
 0x483   : > { %v2968_v25 = vpop.permute.xlu1 %2967  ;;  %v8664_v62 = vpop.permute.xlu0 %2873  ;;  %v3406_v17 = vsel %vm3394_vm5, %v3373_v35, %v8585_v47 }
 0x484   : > { %v3439_v49 = vsel %vm3427_vm4, %v3406_v17, %v8566_v57  ;;  %v5509_v17 = vld [vmem:[%s10033_s6] ss:$0 sm:$0xff] }
 0x485   : > { %2569 = vrot.lane.b32.xlu1 %v8670_v60, %s10213_s16  ;;  %3077 = vrot.lane.b32.xlu0 %v8120_v1, %s10124_s30  ;;  %v3472_v47 = vsel %vm3460_vm6, %v3439_v49, %v2968_v25 }
 0x487   : > { %v8678_v20 = vpop.permute.xlu1 %2683  ;;  %v3254_v34 = vpop.permute.xlu0 %3253 }
 0x488   : > { %v3570_v7 = vsel %vm10136_vm9, %v3537_v32, %v3254_v34  ;;  %v8734_v32 = vmax.f32 %v2107_v46, 0.0 }
 0x489   : > { %2981 = vrot.lane.b32.xlu1 %v8400_v3, %s10214_s13  ;;  %2793 = vrot.lane.b32.xlu0 %v8362_v53, %s10130_s15 }
 0x48a   : > { %5350 = vmatprep.mubr.msk.f32.mxu1 %vm10123_vm10, %v3570_v7  ;;  %v2268_v35 = vrot.slane %v8734_v32, 7 }
 0x48b   : > { %v3064_v56 = vpop.permute.xlu1 %3063  ;;  %v8690_v43 = vpop.permute.xlu0 %2875 }
 0x48c   : > { %v3505_v11 = vsel %vm3493_vm7, %v3472_v47, %v3064_v56  ;;  %v8783_v49 = vsel %vm10118_vm1, %v2266_v58, %v2268_v35 }
 0x48d   : > { %2571 = vrot.lane.b32.xlu1 %v8699_v41, %s10213_s16  ;;  %3173 = vrot.lane.b32.xlu0 %v8296_v63, %s10128_s29  ;;  %v8721_v63 = vsel %vm10119_vm0, %v2403_v8, %v2405_v59 }
 0x48e   : > { %v8732_v57 = vsel %vm10116_vm2, %v8597_v50, %v8721_v63  ;;  %v2407_v50 = vrot.slane %v8734_v32, 6 }
 0x48f   : > { %v8709_v31 = vpop.permute.xlu1 %2779  ;;  %v3256_v19 = vpop.permute.xlu0 %3255 }
 0x490   : > { %v8759_v39 = vsel %vm10119_vm0, %v2405_v59, %v2407_v50 }
 0x491   : > { %2983 = vrot.lane.b32.xlu1 %v8484_v45, %s10214_s13  ;;  %2889 = vrot.lane.b32.xlu0 %v8546_v28, %s10132_s25 }
 0x493   : > { %v3160_v54 = vpop.permute.xlu1 %3159  ;;  %v8725_v52 = vpop.permute.xlu0 %2685 }
 0x494   : > { %v3538_v36 = vsel %vm3526_vm8, %v3505_v11, %v3160_v54 }
 0x495   : > { %2699 = vrot.lane.b32.xlu1 %v8732_v57, %s10126_s14  ;;  %3269 = vrot.lane.b32.xlu0 %v8274_v61, %s10134_s12  ;;  %v3571_v8 = vsel %vm10136_vm9, %v3538_v36, %v3256_v19  ;;  %v3341_v61 = vsel %vm1781_vm11, %v8005_v37, %v8618_v33  ;;  %v10221_v19 = vld [vmem:[#allocation11_spill] sm:$0xff] }
 0x496   : > { %5351 = vmatmul.mubr.msk.f32.gmra.mxu1 %vm10123_vm10, %v3571_v8  ;;  %v2112_v29 = vadd.f32 %v5509_v17, %v10221_v19  ;;  %v3374_v33 = vsel %vm3361_vm3, %v3341_v61, %v8601_v40  ;;  %v3342_v17 = vsel %vm1781_vm11, %v8051_v42, %v8640_v30 }
 0x497   : > { %v8742_v25 = vpop.permute.xlu1 %2557  ;;  %v3066_v34 = vpop.permute.xlu0 %3065  ;;  %v3407_v59 = vsel %vm3394_vm5, %v3374_v33, %v8625_v14 }
 0x498   : > { %v3440_v40 = vsel %vm3427_vm4, %v3407_v59, %v8664_v62  ;;  %v8787_v47 = vmax.f32 %v2112_v29, 0.0  ;;  %v3375_v29 = vsel %vm3361_vm3, %v3342_v17, %v8678_v20 }
 0x499   : > { %3079 = vrot.lane.b32.xlu1 %v8174_v18, %s10124_s30  ;;  %2891 = vrot.lane.b32.xlu0 %v8575_v38, %s10132_s25 }
 0x49a   : > { %v2270_v8 = vrot.slane %v8787_v47, 7  ;;  %v2409_v30 = vrot.slane %v8787_v47, 6 }
 0x49b   : > { %v2970_v7 = vpop.permute.xlu1 %2969  ;;  %v8749_v56 = vpop.permute.xlu0 %2781 }
 0x49c   : > { %v8845_v20 = vsel %vm10119_vm0, %v2407_v50, %v2409_v30 }
 0x49d   : > { %2795 = vrot.lane.b32.xlu1 %v8413_v22, %s10130_s15  ;;  %3271 = vrot.lane.b32.xlu0 %v8360_v48, %s10134_s12  ;;  %v8774_v48 = vsel %vm10117_vm15, %v8635_v13, %v8759_v39  ;;  %v3473_v13 = vsel %vm3460_vm6, %v3440_v40, %v2970_v7 }
 0x49e   : > { %v3506_v14 = vsel %vm3493_vm7, %v3473_v13, %v3066_v34 }
 0x49f   : > { %v8766_v46 = vpop.permute.xlu1 %2559  ;;  %v3162_v37 = vpop.permute.xlu0 %3161 }
 0x4a0   : > { %v3539_v62 = vsel %vm3526_vm8, %v3506_v14, %v3162_v37 }
 0x4a1   : > { %3175 = vrot.lane.b32.xlu1 %v8327_v26, %s10128_s29  ;;  %2701 = vrot.lane.b32.xlu0 %v8774_v48, %s10126_s14  ;;  %v8796_v26 = vsel %vm10120_vm14, %v8657_v15, %v8783_v49  ;;  %v8813_v15 = vsel %vm10118_vm1, %v2268_v35, %v2270_v8  ;;  %v3408_v35 = vsel %vm3394_vm5, %v3375_v29, %v8709_v31  ;;  %v10222_v29 = vld [vmem:[#allocation13_spill] sm:$0xff] }
 0x4a2   : > { %v8825_v19 = vsel %vm2325_vm13, %v8687_v55, %v8813_v15  ;;  %v3441_v55 = vsel %vm3427_vm4, %v3408_v35, %v8690_v43  ;;  %v8856_v43 = vsel %vm10116_vm2, %v8721_v63, %v8845_v20  ;;  %v10223_v35 = vrot.slane %v10222_v29, 6 }
 0x4a3   : > { %v2972_v11 = vpop.permute.xlu1 %2971  ;;  %v8790_v54 = vpop.permute.xlu0 %2877  ;;  %vm3956_vm2 = vcmask 1043456  }
 0x4a5   : > { %2573 = vrot.lane.b32.xlu1 %v8796_v26, %s10213_s16  ;;  %3081 = vrot.lane.b32.xlu0 %v8244_v44, %s10124_s30 }
 0x4a7   : > { %v8804_v58 = vpop.permute.xlu1 %2687  ;;  %v3258_v36 = vpop.permute.xlu0 %3257 }
 0x4a8   : > { %v3572_v7 = vsel %vm10136_vm9, %v3539_v62, %v3258_v36 }
 0x4a9   : > { %2985 = vrot.lane.b32.xlu1 %v8524_v10, %s10214_s13  ;;  %2797 = vrot.lane.b32.xlu0 %v8486_v21, %s10130_s15 }
 0x4aa   : > { %5353 = vmatprep.mubr.msk.f32.mxu1 %vm10123_vm10, %v3572_v7 }
 0x4ab   : > { %v3068_v34 = vpop.permute.xlu1 %3067  ;;  %v8816_v61 = vpop.permute.xlu0 %2879 }
 0x4ad   : > { %2575 = vrot.lane.b32.xlu1 %v8825_v19, %s10213_s16  ;;  %3177 = vrot.lane.b32.xlu0 %v8422_v23, %s10128_s29  ;;  %v3474_v23 = vsel %vm3460_vm6, %v3441_v55, %v2972_v11  ;;  %v8866_v11 = vld [vmem:[%s10034_s7] ss:$0 sm:$0xff]  ;;  %v3343_v55 = vsel %vm1781_vm11, %v8120_v1, %v8742_v25  ;;  %v10224_v1 = vrot.slane %v10222_v29, 7 }
 0x4ae   : > { %v3507_v31 = vsel %vm3493_vm7, %v3474_v23, %v3068_v34 }
 0x4af   : > { %v8835_v37 = vpop.permute.xlu1 %2783  ;;  %v3260_v42 = vpop.permute.xlu0 %3259  ;;  %v8902_v25 = vsel %vm10118_vm1, %v2270_v8, %v10224_v1 }
 0x4b1   : > { %2987 = vrot.lane.b32.xlu1 %v8608_v27, %s10214_s13  ;;  %2893 = vrot.lane.b32.xlu0 %v8670_v60, %s10132_s25 }
 0x4b3   : > { %v3164_v33 = vpop.permute.xlu1 %3163  ;;  %v8849_v59 = vpop.permute.xlu0 %2689 }
 0x4b4   : > { %v3540_v40 = vsel %vm3526_vm8, %v3507_v31, %v3164_v33 }
 0x4b5   : > { %2703 = vrot.lane.b32.xlu1 %v8856_v43, %s10126_s14  ;;  %3273 = vrot.lane.b32.xlu0 %v8400_v3, %s10134_s12  ;;  %v3573_v50 = vsel %vm10136_vm9, %v3540_v40, %v3260_v42  ;;  %v8882_v42 = vsel %vm10119_vm0, %v2409_v30, %v10223_v35 }
 0x4b6   : > { %v5337_v13 = vpop.f32.mrf.mxu1  ;;  %5354 = vmatmul.mubr.msk.f32.gmra.mxu1 %vm10123_vm10, %v3573_v50  ;;  %v8897_v30 = vsel %vm10117_vm15, %v8759_v39, %v8882_v42  ;;  %vm3958_vm15 = vcmask 1044480  }
 0x4b7   : > { %v8869_v14 = vpop.permute.xlu1 %2561  ;;  %v3070_v63 = vpop.permute.xlu0 %3069  ;;  %v3767_v36 = vadd.f32 %v5337_v13, %v8866_v11 }
 0x4b8   : > { %v3761_v62 = vpop.f32.mrf.mxu1 }
 0x4b9   : > { %v3762_v7 = vadd.f32 %v8866_v11, %v3761_v62  ;;  %3083 = vrot.lane.b32.xlu1 %v8298_v16, %s10124_s30  ;;  %2895 = vrot.lane.b32.xlu0 %v8699_v41, %s10132_s25  ;;  %v3905_v23 = vmax.f32 %v3767_v36, 0.0 }
 0x4bb   : > { %v2974_v3 = vpop.permute.xlu1 %2973  ;;  %v8877_v34 = vpop.permute.xlu0 %2785  ;;  %v3904_v17 = vmax.f32 %v3762_v7, 0.0  ;;  %v3928_v7 = vrot.slane %v3905_v23, 4  ;;  %v3930_v39 = vrot.slane %v3905_v23, 5  ;;  %v3934_v1 = vrot.slane %v3905_v23, 7 }
 0x4bd   : > { %2799 = vrot.lane.b32.xlu1 %v8537_v24, %s10130_s15  ;;  %3275 = vrot.lane.b32.xlu0 %v8484_v45, %s10134_s12  ;;  %v3921_v31 = vrot.slane %v3904_v17, 1  ;;  %v3923_v33 = vrot.slane %v3904_v17, 2  ;;  %v3376_v45 = vsel %vm3361_vm3, %v3343_v55, %v8725_v52  ;;  %v3925_v13 = vrot.slane %v3904_v17, 3 }
 0x4be   : > { %v3409_v36 = vsel %vm3394_vm5, %v3376_v45, %v8749_v56 }
 0x4bf   : > { %v8891_v40 = vpop.permute.xlu1 %2563  ;;  %v3166_v50 = vpop.permute.xlu0 %3165  ;;  %v3952_v62 = vsel %vm10118_vm1, %v3904_v17, %v3921_v31  ;;  %v3442_v52 = vsel %vm3427_vm4, %v3409_v36, %v8790_v54  ;;  %vm10122_vm1 = vcmask 1045504   ;;  %v3932_v17 = vrot.slane %v3905_v23, 6 }
 0x4c0   : > { %v3953_v35 = vsel %vm10119_vm0, %v3952_v62, %v3923_v33  ;;  %v3475_v55 = vsel %vm3460_vm6, %v3442_v52, %v2974_v3  ;;  %vm10121_vm0 = vcmask 1046528   ;;  %v8924_v54 = vsel %vm10120_vm14, %v8783_v49, %v8902_v25 }
 0x4c1   : > { %3179 = vrot.lane.b32.xlu1 %v8451_v0, %s10128_s29  ;;  %2705 = vrot.lane.b32.xlu0 %v8897_v30, %s10126_s14  ;;  %v3955_v8 = vsel %vm3954_vm12, %v3953_v35, %v3925_v13  ;;  %v3508_v45 = vsel %vm3493_vm7, %v3475_v55, %v3070_v63  ;;  %v10225_v35 = vld [vmem:[#allocation17_spill] sm:$0xff] }
 0x4c2   : > { %v3957_v56 = vsel %vm3956_vm2, %v3955_v8, %v3928_v7  ;;  %v3541_v13 = vsel %vm3526_vm8, %v3508_v45, %v3166_v50  ;;  %v3344_v50 = vsel %vm1781_vm11, %v8174_v18, %v8766_v46  ;;  %v8953_v52 = vsel %vm2325_vm13, %v8813_v15, %v10225_v35  ;;  %v10230_v35 = vld [vmem:[#allocation26_spill] sm:$0xff] }
 0x4c3   : > { %v2976_v31 = vpop.permute.xlu1 %2975  ;;  %v2882_v33 = vpop.permute.xlu0 %2881  ;;  %v3959_v0 = vsel %vm3958_vm15, %v3957_v56, %v3930_v39  ;;  %v3377_v39 = vsel %vm3361_vm3, %v3344_v50, %v8804_v58  ;;  %v10226_v56 = vld [vmem:[#allocation18_spill] sm:$0xff]  ;;  %vm10227_vm13 = vcmp.eq.s32.totalorder %v7496_v4, 1 }
 0x4c4   : > { %v3961_v3 = vsel %vm10122_vm1, %v3959_v0, %v3932_v17  ;;  %v3410_v8 = vsel %vm3394_vm5, %v3377_v39, %v8835_v37 }
 0x4c5   : > { %2577 = vrot.lane.b32.xlu1 %v8924_v54, %s10213_s16  ;;  %3085 = vrot.lane.b32.xlu0 %v8362_v53, %s10124_s30  ;;  %v8933_v23 = vsel %vm10121_vm0, %v3961_v3, %v3934_v1  ;;  %v3443_v46 = vsel %vm3427_vm4, %v3410_v8, %v8816_v61  ;;  %v8978_v61 = vsel %vm10227_vm13, %v8845_v20, %v10226_v56  ;;  %vm10229_vm13 = vcmp.eq.s32.totalorder %v7494_v12, 1 }
 0x4c6   : > { %v3476_v6 = vsel %vm3460_vm6, %v3443_v46, %v2976_v31  ;;  %v3346_v46 = vsel %vm1781_vm11, %v8298_v16, %v8891_v40 }
 0x4c7   : > { %v8936_v62 = vpop.permute.xlu1 %2691  ;;  %v3262_v36 = vpop.permute.xlu0 %3261 }
 0x4c8   : > { %v3574_v49 = vsel %vm10136_vm9, %v3541_v13, %v3262_v36 }
 0x4c9   : > { %2989 = vrot.lane.b32.xlu1 %v8648_v5, %s10214_s13  ;;  %2801 = vrot.lane.b32.xlu0 %v8610_v9, %s10130_s15 }
 0x4ca   : > { %5356 = vmatprep.mubr.msk.f32.mxu1 %vm10123_vm10, %v3574_v49  ;;  %v10228_v49 = vld [vmem:[#allocation29_spill] sm:$0xff] }
 0x4cb   : > { %v3072_v7 = vpop.permute.xlu1 %3071  ;;  %v8944_v63 = vpop.permute.xlu0 %2883 }
 0x4cc   : > { %v3509_v58 = vsel %vm3493_vm7, %v3476_v6, %v3072_v7  ;;  %v9005_v7 = vsel %vm10229_vm13, %v8882_v42, %v10228_v49  ;;  %v9019_v42 = vsel %vm10120_vm14, %v8902_v25, %v10230_v35  ;;  %v3379_v6 = vsel %vm3361_vm3, %v3346_v46, %v8936_v62 }
 0x4cd   : > { %2579 = vrot.lane.b32.xlu1 %v8953_v52, %s10213_s16  ;;  %3181 = vrot.lane.b32.xlu0 %v8546_v28, %s10128_s29  ;;  %vm10238_vm13 = vcmask 1040384   ;;  %vm10239_vm14 = vcmask 1041408  }
 0x4cf   : > { %v2788_v17 = vpop.permute.xlu1 %2787  ;;  %v3264_v18 = vpop.permute.xlu0 %3263 }
 0x4d1   : > { %2991 = vrot.lane.b32.xlu1 %v8732_v57, %s10214_s13  ;;  %2897 = vrot.lane.b32.xlu0 %v8796_v26, %s10132_s25 }
 0x4d3   : > { %v3168_v15 = vpop.permute.xlu1 %3167  ;;  %v8971_v28 = vpop.permute.xlu0 %2693 }
 0x4d4   : > { %v3542_v37 = vsel %vm3526_vm8, %v3509_v58, %v3168_v15  ;;  %v10231_v58 = vld [vmem:[#allocation19_spill] sm:$0xff]  ;;  %v3412_v15 = vsel %vm3394_vm5, %v3379_v6, %v2788_v17  ;;  %v10232_v17 = vld [vmem:[#allocation20_spill] sm:$0xff] }
 0x4d5   : > { %2707 = vrot.lane.b32.xlu1 %v8978_v61, %s10126_s14  ;;  %3277 = vrot.lane.b32.xlu0 %v8524_v10, %s10134_s12  ;;  %v3575_v55 = vsel %vm10136_vm9, %v3542_v37, %v3264_v18  ;;  %v3345_v10 = vsel %vm1781_vm11, %v8244_v44, %v8869_v14 }
 0x4d6   : > { %v5340_v31 = vpop.f32.mrf.mxu1  ;;  %5357 = vmatmul.mubr.msk.f32.gmra.mxu1 %vm10123_vm10, %v3575_v55  ;;  %v3378_v36 = vsel %vm3361_vm3, %v3345_v10, %v8849_v59  ;;  %v3445_v55 = vsel %vm3427_vm4, %v3412_v15, %v8944_v63 }
 0x4d7   : > { %v2566_v1 = vpop.permute.xlu1 %2565  ;;  %v3074_v0 = vpop.permute.xlu0 %3073  ;;  %v3411_v44 = vsel %vm3394_vm5, %v3378_v36, %v8877_v34 }
 0x4d8   : > { %v3771_v3 = vpop.f32.mrf.mxu1 }
 0x4d9   : > { %3087 = vrot.lane.b32.xlu1 %v8413_v22, %s10124_s30  ;;  %2899 = vrot.lane.b32.xlu0 %v8825_v19, %s10132_s25 }
 0x4db   : > { %v2978_v4 = vpop.permute.xlu1 %2977  ;;  %v2790_v20 = vpop.permute.xlu0 %2789 }
 0x4dd   : > { %2803 = vrot.lane.b32.xlu1 %v8661_v2, %s10130_s15  ;;  %3279 = vrot.lane.b32.xlu0 %v8608_v27, %s10134_s12  ;;  %v3444_v27 = vsel %vm3427_vm4, %v3411_v44, %v2882_v33 }
 0x4de   : > { %v3477_v14 = vsel %vm3460_vm6, %v3444_v27, %v2978_v4  ;;  %v10233_v27 = vld [vmem:[#allocation30_spill] sm:$0xff] }
 0x4df   : > { %v8997_v45 = vpop.permute.xlu1 %2567  ;;  %v3170_v13 = vpop.permute.xlu0 %3169 }
 0x4e1   : > { %3183 = vrot.lane.b32.xlu1 %v8575_v38, %s10128_s29  ;;  %2709 = vrot.lane.b32.xlu0 %v9005_v7, %s10126_s14  ;;  %v3510_v38 = vsel %vm3493_vm7, %v3477_v14, %v3074_v0 }
 0x4e2   : > { %v3543_v34 = vsel %vm3526_vm8, %v3510_v38, %v3170_v13  ;;  %v3347_v13 = vsel %vm1781_vm11, %v8362_v53, %v2566_v1 }
 0x4e3   : > { %v2980_v59 = vpop.permute.xlu1 %2979  ;;  %v2886_v50 = vpop.permute.xlu0 %2885  ;;  %v3380_v49 = vsel %vm3361_vm3, %v3347_v13, %v8971_v28 }
 0x4e4   : > { %v3478_v16 = vsel %vm3460_vm6, %v3445_v55, %v2980_v59  ;;  %v3413_v44 = vsel %vm3394_vm5, %v3380_v49, %v2790_v20  ;;  %v10234_v59 = vld [vmem:[#allocation27_spill] sm:$0xff] }
 0x4e5   : > { %2581 = vrot.lane.b32.xlu1 %v9019_v42, %s10213_s16  ;;  %3089 = vrot.lane.b32.xlu0 %v8486_v21, %s10124_s30  ;;  %v3446_v53 = vsel %vm3427_vm4, %v3413_v44, %v2886_v50 }
 0x4e7   : > { %v2696_v33 = vpop.permute.xlu1 %2695  ;;  %v3266_v39 = vpop.permute.xlu0 %3265 }
 0x4e8   : > { %v3576_v8 = vsel %vm10136_vm9, %v3543_v34, %v3266_v39  ;;  %v3348_v39 = vsel %vm1781_vm11, %v8413_v22, %v8997_v45 }
 0x4e9   : > { %2993 = vrot.lane.b32.xlu1 %v8774_v48, %s10214_s13  ;;  %2805 = vrot.lane.b32.xlu0 %v8734_v32, %s10130_s15 }
 0x4ea   : > { %5359 = vmatprep.mubr.msk.f32.mxu1 %vm10123_vm10, %v3576_v8  ;;  %v3381_v8 = vsel %vm3361_vm3, %v3348_v39, %v2696_v33 }
 0x4eb   : > { %v3076_v25 = vpop.permute.xlu1 %3075  ;;  %v2888_v18 = vpop.permute.xlu0 %2887 }
 0x4ec   : > { %v3511_v40 = vsel %vm3493_vm7, %v3478_v16, %v3076_v25  ;;  %v10235_v25 = vld [vmem:[#allocation32_spill] sm:$0xff] }
 0x4ed   : > { %2583 = vrot.lane.b32.xlu1 %v10231_v58, %s10213_s16  ;;  %3185 = vrot.lane.b32.xlu0 %v8670_v60, %s10128_s29 }
 0x4ef   : > { %v2792_v37 = vpop.permute.xlu1 %2791  ;;  %v3268_v56 = vpop.permute.xlu0 %3267 }
 0x4f0   : > { %v3414_v46 = vsel %vm3394_vm5, %v3381_v8, %v2792_v37 }
 0x4f1   : > { %2995 = vrot.lane.b32.xlu1 %v8856_v43, %s10214_s13  ;;  %2901 = vrot.lane.b32.xlu0 %v8924_v54, %s10132_s25  ;;  %v3447_v55 = vsel %vm3427_vm4, %v3414_v46, %v2888_v18 }
 0x4f3   : > { %v3172_v62 = vpop.permute.xlu1 %3171  ;;  %v9051_v31 = vpop.permute.xlu0 %2697 }
 0x4f4   : > { %v3544_v60 = vsel %vm3526_vm8, %v3511_v40, %v3172_v62  ;;  %v10236_v40 = vld [vmem:[#allocation31_spill] sm:$0xff] }
 0x4f5   : > { %2711 = vrot.lane.b32.xlu1 %v10232_v17, %s10126_s14  ;;  %3281 = vrot.lane.b32.xlu0 %v8648_v5, %s10134_s12  ;;  %v3577_v63 = vsel %vm10136_vm9, %v3544_v60, %v3268_v56 }
 0x4f6   : > { %5360 = vmatmul.mubr.msk.f32.gmra.mxu1 %vm10123_vm10, %v3577_v63  ;;  %v5343_v56 = vpop.f32.mrf.mxu1 }
 0x4f7   : > { %v2570_v0 = vpop.permute.xlu1 %2569  ;;  %v3078_v3 = vpop.permute.xlu0 %3077 }
 0x4f9   : > { %3091 = vrot.lane.b32.xlu1 %v8537_v24, %s10124_s30  ;;  %2903 = vrot.lane.b32.xlu0 %v8953_v52, %s10132_s25 }
 0x4fb   : > { %v2982_v4 = vpop.permute.xlu1 %2981  ;;  %v2794_v10 = vpop.permute.xlu0 %2793 }
 0x4fc   : > { %v3479_v1 = vsel %vm3460_vm6, %v3446_v53, %v2982_v4 }
 0x4fd   : > { %2807 = vrot.lane.b32.xlu1 %v8787_v47, %s10130_s15  ;;  %3283 = vrot.lane.b32.xlu0 %v8732_v57, %s10134_s12  ;;  %v3512_v28 = vsel %vm3493_vm7, %v3479_v1, %v3078_v3 }
 0x4ff   : > { %v9070_v5 = vpop.permute.xlu1 %2571  ;;  %v3174_v36 = vpop.permute.xlu0 %3173 }
 0x500   : > { %v3545_v20 = vsel %vm3526_vm8, %v3512_v28, %v3174_v36  ;;  %v10237_v36 = vld [vmem:[#allocation14_spill] sm:$0xff]  ;;  %v3350_v8 = vsel %vm1781_vm11, %v8537_v24, %v9070_v5 }
 0x501   : > { %3187 = vrot.lane.b32.xlu1 %v8699_v41, %s10128_s29  ;;  %2713 = vrot.lane.b32.xlu0 %v10233_v27, %s10126_s14 }
 0x503   : > { %v2984_v14 = vpop.permute.xlu1 %2983  ;;  %v2890_v57 = vpop.permute.xlu0 %2889 }
 0x504   : > { %v3480_v22 = vsel %vm3460_vm6, %v3447_v55, %v2984_v14 }
 0x505   : > { %2585 = vrot.lane.b32.xlu1 %v10234_v59, %s10213_s16  ;;  %3093 = vrot.lane.b32.xlu0 %v8610_v9, %s10124_s30 }
 0x507   : > { %v9087_v41 = vpop.permute.xlu1 %2699  ;;  %v3270_v35 = vpop.permute.xlu0 %3269 }
 0x508   : > { %v3578_v38 = vsel %vm10136_vm9, %v3545_v20, %v3270_v35  ;;  %v3383_v46 = vsel %vm3361_vm3, %v3350_v8, %v9087_v41 }
 0x509   : > { %2997 = vrot.lane.b32.xlu1 %v8897_v30, %s10214_s13  ;;  %2809 = vrot.lane.b32.xlu0 %v10222_v29, %s10130_s15 }
 0x50a   : > { %5362 = vmatprep.mubr.msk.f32.mxu1 %vm10123_vm10, %v3578_v38 }
 0x50b   : > { %v3080_v50 = vpop.permute.xlu1 %3079  ;;  %v9095_v34 = vpop.permute.xlu0 %2891 }
 0x50c   : > { %v3513_v45 = vsel %vm3493_vm7, %v3480_v22, %v3080_v50 }
 0x50d   : > { %2587 = vrot.lane.b32.xlu1 %v10235_v25, %s10213_s16  ;;  %3189 = vrot.lane.b32.xlu0 %v8796_v26, %s10128_s29  ;;  %v3779_v26 = vpop.f32.mrf.mxu1 }
 0x50e   : > { %v3780_v20 = vadd.f32 %v8866_v11, %v3779_v26 }
 0x50f   : > { %v2796_v6 = vpop.permute.xlu1 %2795  ;;  %v3272_v15 = vpop.permute.xlu0 %3271 }
 0x510   : > { %v3906_v35 = vmax.f32 %v3780_v20, 0.0 }
 0x511   : > { %2999 = vrot.lane.b32.xlu1 %v8978_v61, %s10214_s13  ;;  %2905 = vrot.lane.b32.xlu0 %v9019_v42, %s10132_s25 }
 0x512   : > { %v3937_v39 = vrot.slane %v3906_v35, 1 }
 0x513   : > { %v3176_v33 = vpop.permute.xlu1 %3175  ;;  %v9113_v16 = vpop.permute.xlu0 %2701 }
 0x514   : > { %v3546_v37 = vsel %vm3526_vm8, %v3513_v45, %v3176_v33  ;;  %v3964_v45 = vsel %vm10238_vm13, %v3906_v35, %v3937_v39 }
 0x515   : > { %2715 = vrot.lane.b32.xlu1 %v10236_v40, %s10126_s14  ;;  %3285 = vrot.lane.b32.xlu0 %v8774_v48, %s10134_s12  ;;  %v3579_v18 = vsel %vm10136_vm9, %v3546_v37, %v3272_v15  ;;  %v3349_v48 = vsel %vm1781_vm11, %v8486_v21, %v2570_v0  ;;  %v3939_v15 = vrot.slane %v3906_v35, 2  ;;  %v3941_v37 = vrot.slane %v3906_v35, 3 }
 0x516   : > { %v5346_v62 = vpop.f32.mrf.mxu1  ;;  %5363 = vmatmul.mubr.msk.f32.gmra.mxu1 %vm10123_vm10, %v3579_v18  ;;  %v3382_v53 = vsel %vm3361_vm3, %v3349_v48, %v9051_v31 }
 0x517   : > { %v9122_v60 = vpop.permute.xlu1 %2573  ;;  %v3082_v63 = vpop.permute.xlu0 %3081  ;;  %v3415_v1 = vsel %vm3394_vm5, %v3382_v53, %v2794_v10  ;;  %v3965_v41 = vsel %vm10239_vm14, %v3964_v45, %v3939_v15  ;;  %vm10240_vm14 = vmmov %vm10238_vm13  ;;  %vm10241_vm13 = vcmask 1041408  }
 0x518   : > { %v3789_v3 = vpop.f32.mrf.mxu1  ;;  %v3448_v21 = vsel %vm3427_vm4, %v3415_v1, %v2890_v57 }
 0x519   : > { %3095 = vrot.lane.b32.xlu1 %v8661_v2, %s10124_s30  ;;  %3001 = vrot.lane.b32.xlu0 %v9005_v7, %s10214_s13 }
 0x51b   : > { %v2986_v4 = vpop.permute.xlu1 %2985  ;;  %v9128_v13 = vpop.permute.xlu0 %2797 }
 0x51c   : > { %v3481_v0 = vsel %vm3460_vm6, %v3448_v21, %v2986_v4 }
 0x51d   : > { %2811 = vrot.lane.b32.xlu1 %v10237_v36, %s10130_s15  ;;  %3003 = vrot.lane.b32.xlu0 %v10232_v17, %s10214_s13 }
 0x51f   : > { %v9136_v49 = vpop.permute.xlu1 %2575  ;;  %v3178_v44 = vpop.permute.xlu0 %3177 }
 0x521   : > { %3191 = vrot.lane.b32.xlu1 %v8825_v19, %s10128_s29  ;;  %3099 = vrot.lane.b32.xlu0 %v8787_v47, %s10124_s30  ;;  %v3514_v19 = vsel %vm3493_vm7, %v3481_v0, %v3082_v63 }
 0x522   : > { %v3547_v31 = vsel %vm3526_vm8, %v3514_v19, %v3178_v44 }
 0x523   : > { %v2988_v14 = vpop.permute.xlu1 %2987  ;;  %v9147_v28 = vpop.permute.xlu0 %2893 }
 0x525   : > { %2907 = vrot.lane.b32.xlu1 %v10231_v58, %s10132_s25  ;;  %3195 = vrot.lane.b32.xlu0 %v8953_v52, %s10128_s29 }
 0x527   : > { %v9156_v10 = vpop.permute.xlu1 %2703  ;;  %v3274_v57 = vpop.permute.xlu0 %3273 }
 0x528   : > { %v3580_v38 = vsel %vm10136_vm9, %v3547_v31, %v3274_v57  ;;  %v3351_v31 = vsel %vm1781_vm11, %v8610_v9, %v9122_v60 }
 0x529   : > { %3287 = vrot.lane.b32.xlu1 %v8856_v43, %s10134_s12  ;;  %3291 = vrot.lane.b32.xlu0 %v8978_v61, %s10134_s12  ;;  %v3416_v43 = vsel %vm3394_vm5, %v3383_v46, %v2796_v6  ;;  %v3785_v61 = vadd.f32 %v5343_v56, %v8866_v11 }
 0x52a   : > { %5365 = vmatprep.mubr.msk.f32.mxu1 %vm10123_vm10, %v3580_v38  ;;  %v3449_v33 = vsel %vm3427_vm4, %v3416_v43, %v9095_v34  ;;  %v3384_v43 = vsel %vm3361_vm3, %v3351_v31, %v9113_v16 }
 0x52b   : > { %v3084_v50 = vpop.permute.xlu1 %3083  ;;  %v9164_v52 = vpop.permute.xlu0 %2895  ;;  %v3482_v24 = vsel %vm3460_vm6, %v3449_v33, %v2988_v14  ;;  %v3907_v5 = vmax.f32 %v3785_v61, 0.0 }
 0x52c   : > { %v3515_v6 = vsel %vm3493_vm7, %v3482_v24, %v3084_v50 }
 0x52d   : > { %3097 = vrot.lane.b32.xlu1 %v8734_v32, %s10124_s30  ;;  %v3944_v63 = vrot.slane %v3907_v5, 4  ;;  %v3946_v21 = vrot.slane %v3907_v5, 5  ;;  %v3948_v19 = vrot.slane %v3907_v5, 6  ;;  %v3950_v46 = vrot.slane %v3907_v5, 7 }
 0x52f   : > { %v9175_v55 = vpop.permute.xlu1 %2799  ;;  %v3276_v22 = vpop.permute.xlu0 %3275 }
 0x531   : > { %3193 = vrot.lane.b32.xlu1 %v8924_v54, %s10128_s29  ;;  %v3966_v54 = vsel %vm3954_vm12, %v3965_v41, %v3941_v37 }
 0x532   : > { %v3967_v44 = vsel %vm3956_vm2, %v3966_v54, %v3944_v63 }
 0x533   : > { %v3180_v56 = vpop.permute.xlu1 %3179  ;;  %v9185_v26 = vpop.permute.xlu0 %2705  ;;  %v3968_v14 = vsel %vm3958_vm15, %v3967_v44, %v3946_v21 }
 0x534   : > { %v3548_v18 = vsel %vm3526_vm8, %v3515_v6, %v3180_v56  ;;  %v3969_v8 = vsel %vm10122_vm1, %v3968_v14, %v3948_v19 }
 0x535   : > { %3289 = vrot.lane.b32.xlu1 %v8897_v30, %s10134_s12  ;;  %v3581_v34 = vsel %vm10136_vm9, %v3548_v18, %v3276_v22  ;;  %v3417_v22 = vsel %vm3394_vm5, %v3384_v43, %v9128_v13  ;;  %v9217_v5 = vsel %vm10121_vm0, %v3969_v8, %v3950_v46 }
 0x536   : > { %v5349_v62 = vpop.f32.mrf.mxu1  ;;  %5366 = vmatmul.mubr.msk.f32.gmra.mxu1 %vm10123_vm10, %v3581_v34  ;;  %v3450_v60 = vsel %vm3427_vm4, %v3417_v22, %v9147_v28  ;;  %v4130_v28 = vrot.slane %v9217_v5, 7 }
 0x537   : > { %v9193_v3 = vpop.permute.xlu1 %2577  ;;  %v3086_v4 = vpop.permute.xlu0 %3085  ;;  %v3803_v53 = vadd.f32 %v5349_v62, %v8866_v11 }
 0x538   : > { %v3797_v48 = vpop.f32.mrf.mxu1 }
 0x539   : > { %v3798_v1 = vadd.f32 %v8866_v11, %v3797_v48  ;;  %v3909_v57 = vmax.f32 %v3803_v53, 0.0  ;;  %v4129_v53 = vrot.slane %v8933_v23, 7 }
 0x53b   : > { %v2990_v30 = vpop.permute.xlu1 %2989  ;;  %v9198_v0 = vpop.permute.xlu0 %2801  ;;  %v3908_v20 = vmax.f32 %v3798_v1, 0.0  ;;  %v3979_v45 = vrot.slane %v3909_v57, 4  ;;  %v3981_v33 = vrot.slane %v3909_v57, 5  ;;  %v3983_v41 = vrot.slane %v3909_v57, 6 }
 0x53c   : > { %v3483_v6 = vsel %vm3460_vm6, %v3450_v60, %v2990_v30  ;;  %v3985_v13 = vrot.slane %v3909_v57, 7 }
 0x53d   : > { %v3972_v35 = vrot.slane %v3908_v20, 1  ;;  %v3974_v38 = vrot.slane %v3908_v20, 2  ;;  %v3976_v61 = vrot.slane %v3908_v20, 3  ;;  %v3516_v54 = vsel %vm3493_vm7, %v3483_v6, %v3086_v4 }
 0x53e   : > { %v9237_v4 = vsel %vm10240_vm14, %v4129_v53, %v4130_v28 }
 0x53f   : > { %v9204_v50 = vpop.permute.xlu1 %2579  ;;  %v3182_v39 = vpop.permute.xlu0 %3181  ;;  %v4003_v15 = vsel %vm10240_vm14, %v3908_v20, %v3972_v35  ;;  %v4163_v20 = vrot.slane %v9217_v5, 6  ;;  %v4162_v35 = vrot.slane %v8933_v23, 6 }
 0x540   : > { %v4004_v9 = vsel %vm10241_vm13, %v4003_v15, %v3974_v38  ;;  %v3549_v63 = vsel %vm3526_vm8, %v3516_v54, %v3182_v39  ;;  %vm10242_vm13 = vmmov %vm10240_vm14  ;;  %vm10244_vm14 = vcmask 1041408   ;;  %v3352_v39 = vsel %vm1781_vm11, %v8661_v2, %v9136_v49 }
 0x541   : > { %v4005_v24 = vsel %vm3954_vm12, %v4004_v9, %v3976_v61  ;;  %v3385_v8 = vsel %vm3361_vm3, %v3352_v39, %v9156_v10 }
 0x542   : > { %v4006_v16 = vsel %vm3956_vm2, %v4005_v24, %v3979_v45  ;;  %v3418_v43 = vsel %vm3394_vm5, %v3385_v8, %v9175_v55 }
 0x543   : > { %v2992_v56 = vpop.permute.xlu1 %2991  ;;  %v2898_v37 = vpop.permute.xlu0 %2897  ;;  %v4007_v18 = vsel %vm3958_vm15, %v4006_v16, %v3981_v33  ;;  %v3451_v10 = vsel %vm3427_vm4, %v3418_v43, %v9164_v52 }
 0x544   : > { %v4008_v34 = vsel %vm10122_vm1, %v4007_v18, %v3983_v41  ;;  %v3484_v15 = vsel %vm3460_vm6, %v3451_v10, %v2992_v56  ;;  %v3353_v56 = vsel %vm1781_vm11, %v8734_v32, %v9193_v3 }
 0x545   : > { %v9226_v62 = vsel %vm10121_vm0, %v4008_v34, %v3985_v13  ;;  %vm10243_vm0 = vcmp.eq.s32.totalorder %v7456_v51, 1  ;;  %v3386_v34 = vsel %vm3361_vm3, %v3353_v56, %v9185_v26 }
 0x546   : > { %v4132_v1 = vrot.slane %v9226_v62, 7  ;;  %v4165_v21 = vrot.slane %v9226_v62, 6 }
 0x547   : > { %v2708_v48 = vpop.permute.xlu1 %2707  ;;  %v3278_v44 = vpop.permute.xlu0 %3277 }
 0x548   : > { %v3582_v30 = vsel %vm10136_vm9, %v3549_v63, %v3278_v44  ;;  %v9242_v14 = vsel %vm10242_vm13, %v4130_v28, %v4132_v1  ;;  %v9257_v38 = vsel %vm10244_vm14, %v4163_v20, %v4165_v21  ;;  %vm10246_vm13 = vcmp.eq.s32.totalorder %v7494_v12, 1 }
 0x549   : > { %5368 = vmatprep.mubr.msk.f32.mxu1 %vm10123_vm10, %v3582_v30  ;;  %v9249_v19 = vsel %vm10243_vm0, %v9237_v4, %v9242_v14  ;;  %vm10245_vm0 = vmmov %vm10244_vm14  ;;  %v3419_v28 = vsel %vm3394_vm5, %v3386_v34, %v9198_v0  ;;  %v3354_v0 = vsel %vm1781_vm11, %v8787_v47, %v9204_v50  ;;  %vm10247_vm14 = vcmask 1040384  }
 0x54a   : > { %4203 = vrot.lane.b32.xlu0 %v9249_v19, %s10213_s16  ;;  %v9267_v46 = vsel %vm10245_vm0, %v4162_v35, %v4163_v20  ;;  %v3452_v54 = vsel %vm3427_vm4, %v3419_v28, %v2898_v37  ;;  %v3387_v37 = vsel %vm3361_vm3, %v3354_v0, %v2708_v48 }
 0x54b   : > { %v3088_v31 = vpop.permute.xlu1 %3087  ;;  %v2900_v57 = vpop.permute.xlu0 %2899  ;;  %v9275_v61 = vsel %vm10246_vm13, %v9267_v46, %v9257_v38  ;;  %vm10248_vm13 = vcmask 1046528  }
 0x54c   : > { %v3517_v22 = vsel %vm3493_vm7, %v3484_v15, %v3088_v31 }
 0x54e   : > { %4235 = vrot.lane.b32.xlu0 %v9275_v61, %s10126_s14 }
 0x54f   : > { %v2804_v2 = vpop.permute.xlu1 %2803  ;;  %v3280_v49 = vpop.permute.xlu0 %3279 }
 0x550   : > { %v3420_v43 = vsel %vm3394_vm5, %v3387_v37, %v2804_v2 }
 0x551   : > { %v3453_v15 = vsel %vm3427_vm4, %v3420_v43, %v2900_v57 }
 0x552   : > { %4259 = vrot.lane.b32.xlu0 %v8933_v23, %s10130_s15 }
 0x553   : > { %v3184_v55 = vpop.permute.xlu1 %3183  ;;  %v2710_v45 = vpop.permute.xlu0 %2709 }
 0x554   : > { %v3550_v9 = vsel %vm3526_vm8, %v3517_v22, %v3184_v55 }
 0x555   : > { %v3583_v60 = vsel %vm10136_vm9, %v3550_v9, %v3280_v49 }
 0x556   : > { %v5352_v33 = vpop.f32.mrf.mxu1  ;;  %5369 = vmatmul.mubr.msk.f32.gmra.mxu1 %vm10123_vm10, %v3583_v60 }
 0x557   : > { %v2582_v24 = vpop.permute.xlu1 %2581  ;;  %v3090_v41 = vpop.permute.xlu0 %3089 }
 0x558   : > { %v3807_v16 = vpop.f32.mrf.mxu1  ;;  %v3355_v34 = vsel %vm1781_vm11, %v10222_v29, %v2582_v24 }
 0x55b   : > { %v2994_v52 = vpop.permute.xlu1 %2993  ;;  %v2806_v6 = vpop.permute.xlu0 %2805 }
 0x55c   : > { %v3485_v63 = vsel %vm3460_vm6, %v3452_v54, %v2994_v52 }
 0x55d   : > { %v3518_v20 = vsel %vm3493_vm7, %v3485_v63, %v3090_v41 }
 0x55f   : > { %v9291_v13 = vpop.permute.xlu1 %2583  ;;  %v3186_v18 = vpop.permute.xlu0 %3185 }
 0x560   : > { %v3551_v31 = vsel %vm3526_vm8, %v3518_v20, %v3186_v18 }
 0x563   : > { %v2996_v44 = vpop.permute.xlu1 %2995  ;;  %v2902_v30 = vpop.permute.xlu0 %2901 }
 0x564   : > { %v3486_v22 = vsel %vm3460_vm6, %v3453_v15, %v2996_v44 }
 0x567   : > { %v9301_v32 = vpop.permute.xlu1 %2711  ;;  %v3282_v3 = vpop.permute.xlu0 %3281 }
 0x568   : > { %v3584_v39 = vsel %vm10136_vm9, %v3551_v31, %v3282_v3  ;;  %v3388_v31 = vsel %vm3361_vm3, %v3355_v34, %v2710_v45 }
 0x569   : > { %5371 = vmatprep.mubr.msk.f32.mxu1 %vm10123_vm10, %v3584_v39 }
 0x56b   : > { %v3092_v26 = vpop.permute.xlu1 %3091  ;;  %v9305_v8 = vpop.permute.xlu0 %2903 }
 0x56c   : > { %v3519_v55 = vsel %vm3493_vm7, %v3486_v22, %v3092_v26  ;;  %v3421_v26 = vsel %vm3394_vm5, %v3388_v31, %v2806_v6 }
 0x56d   : > { %v3454_v43 = vsel %vm3427_vm4, %v3421_v26, %v2902_v30 }
 0x56f   : > { %v9312_v49 = vpop.permute.xlu1 %2807  ;;  %v3284_v10 = vpop.permute.xlu0 %3283 }
 0x573   : > { %v3188_v9 = vpop.permute.xlu1 %3187  ;;  %v9317_v60 = vpop.permute.xlu0 %2713 }
 0x574   : > { %v3552_v33 = vsel %vm3526_vm8, %v3519_v55, %v3188_v9 }
 0x575   : > { %v3585_v47 = vsel %vm10136_vm9, %v3552_v33, %v3284_v10 }
 0x576   : > { %v5355_v50 = vpop.f32.mrf.mxu1  ;;  %5372 = vmatmul.mubr.msk.f32.gmra.mxu1 %vm10123_vm10, %v3585_v47 }
 0x577   : > { %v9322_v48 = vpop.permute.xlu1 %2585  ;;  %v3094_v2 = vpop.permute.xlu0 %3093  ;;  %v3821_v57 = vadd.f32 %v5355_v50, %v8866_v11 }
 0x578   : > { %v3815_v41 = vpop.f32.mrf.mxu1 }
 0x579   : > { %v3816_v16 = vadd.f32 %v8866_v11, %v3815_v41  ;;  %v3911_v28 = vmax.f32 %v3821_v57, 0.0 }
 0x57b   : > { %v2998_v52 = vpop.permute.xlu1 %2997  ;;  %v9326_v56 = vpop.permute.xlu0 %2809  ;;  %v3910_v18 = vmax.f32 %v3816_v16, 0.0  ;;  %v3995_v0 = vrot.slane %v3911_v28, 4  ;;  %v3997_v10 = vrot.slane %v3911_v28, 5  ;;  %v3999_v15 = vrot.slane %v3911_v28, 6 }
 0x57c   : > { %v3487_v55 = vsel %vm3460_vm6, %v3454_v43, %v2998_v52  ;;  %v4001_v33 = vrot.slane %v3911_v28, 7 }
 0x57d   : > { %v3988_v54 = vrot.slane %v3910_v18, 1  ;;  %v3990_v63 = vrot.slane %v3910_v18, 2  ;;  %v3992_v3 = vrot.slane %v3910_v18, 3  ;;  %v3520_v50 = vsel %vm3493_vm7, %v3487_v55, %v3094_v2 }
 0x57f   : > { %v2588_v44 = vpop.permute.xlu1 %2587  ;;  %v3190_v20 = vpop.permute.xlu0 %3189  ;;  %v4010_v39 = vsel %vm10247_vm14, %v3910_v18, %v3988_v54 }
 0x580   : > { %v4011_v37 = vsel %vm10245_vm0, %v4010_v39, %v3990_v63  ;;  %v3553_v30 = vsel %vm3526_vm8, %v3520_v50, %v3190_v20 }
 0x581   : > { %v4012_v24 = vsel %vm3954_vm12, %v4011_v37, %v3992_v3 }
 0x582   : > { %v4013_v22 = vsel %vm3956_vm2, %v4012_v24, %v3995_v0  ;;  %v10251_v24 = vld [vmem:[#allocation15_spill] sm:$0xff] }
 0x583   : > { %v3000_v9 = vpop.permute.xlu1 %2999  ;;  %v2906_v45 = vpop.permute.xlu0 %2905  ;;  %v4014_v47 = vsel %vm3958_vm15, %v4013_v22, %v3997_v10 }
 0x584   : > { %v4015_v6 = vsel %vm10122_vm1, %v4014_v47, %v3999_v15  ;;  %vm10250_vm1 = vcmp.eq.s32.totalorder %v7494_v12, 1  ;;  %v3358_v15 = vsel %vm1781_vm11, %v10251_v24, %v2588_v44 }
 0x585   : > { %v9342_v41 = vsel %vm10248_vm13, %v4015_v6, %v4001_v33  ;;  %vm10249_vm13 = vcmp.eq.s32.totalorder %v7456_v51, 1 }
 0x586   : > { %v4134_v18 = vrot.slane %v9342_v41, 7  ;;  %v4167_v52 = vrot.slane %v9342_v41, 6 }
 0x587   : > { %v2716_v57 = vpop.permute.xlu1 %2715  ;;  %v3286_v16 = vpop.permute.xlu0 %3285 }
 0x588   : > { %v3586_v34 = vsel %vm10136_vm9, %v3553_v30, %v3286_v16  ;;  %v9354_v2 = vsel %vm10247_vm14, %v4132_v1, %v4134_v18  ;;  %v9361_v28 = vsel %vm10245_vm0, %v4165_v21, %v4167_v52  ;;  %v3356_v21 = vsel %vm1781_vm11, %v10237_v36, %v9291_v13 }
 0x589   : > { %5374 = vmatprep.mubr.msk.f32.mxu1 %vm10123_vm10, %v3586_v34  ;;  %v9367_v54 = vsel %vm10249_vm13, %v9242_v14, %v9354_v2  ;;  %v9373_v63 = vsel %vm10250_vm1, %v9257_v38, %v9361_v28  ;;  %v3389_v14 = vsel %vm3361_vm3, %v3356_v21, %v9301_v32  ;;  %v3391_v32 = vsel %vm3361_vm3, %v3358_v15, %v2716_v57  ;;  %vm10253_vm1 = vmmov %vm10247_vm14 }
 0x58a   : > { %4205 = vrot.lane.b32.xlu0 %v9367_v54, %s10213_s16  ;;  %v3422_v26 = vsel %vm3394_vm5, %v3389_v14, %v9312_v49  ;;  %vm10254_vm14 = vmmov %vm10245_vm0  ;;  %vm10255_vm0 = vcmask 1045504   ;;  %vm10256_vm13 = vcmask 1046528  }
 0x58b   : > { %v3096_v1 = vpop.permute.xlu1 %3095  ;;  %v3002_v20 = vpop.permute.xlu0 %3001  ;;  %v3455_v37 = vsel %vm3427_vm4, %v3422_v26, %v9305_v8 }
 0x58c   : > { %v3488_v10 = vsel %vm3460_vm6, %v3455_v37, %v3000_v9  ;;  %v10252_v9 = vld [vmem:[#allocation16_spill] sm:$0xff] }
 0x58d   : > { %v3521_v13 = vsel %vm3493_vm7, %v3488_v10, %v3096_v1  ;;  %v3357_v44 = vsel %vm1781_vm11, %v10252_v9, %v9322_v48 }
 0x58e   : > { %v3390_v57 = vsel %vm3361_vm3, %v3357_v44, %v9317_v60 }
 0x58f   : > { %v2812_v31 = vpop.permute.xlu1 %2811  ;;  %v3004_v39 = vpop.permute.xlu0 %3003  ;;  %v3423_v16 = vsel %vm3394_vm5, %v3390_v57, %v9326_v56 }
 0x590   : > { %v3424_v49 = vsel %vm3394_vm5, %v3391_v32, %v2812_v31  ;;  %v3456_v31 = vsel %vm3427_vm4, %v3423_v16, %v2906_v45 }
 0x591   : > { %v3489_v21 = vsel %vm3460_vm6, %v3456_v31, %v3002_v20 }
 0x593   : > { %v3192_v3 = vpop.permute.xlu1 %3191  ;;  %v3100_v22 = vpop.permute.xlu0 %3099 }
 0x594   : > { %v3554_v55 = vsel %vm3526_vm8, %v3521_v13, %v3192_v3 }
 0x596   : > { %v5358_v38 = vpop.f32.mrf.mxu1 }
 0x597   : > { %v2908_v0 = vpop.permute.xlu1 %2907  ;;  %v3196_v30 = vpop.permute.xlu0 %3195 }
 0x598   : > { %v3825_v43 = vpop.f32.mrf.mxu1  ;;  %v3457_v8 = vsel %vm3427_vm4, %v3424_v49, %v2908_v0 }
 0x599   : > { %v3490_v50 = vsel %vm3460_vm6, %v3457_v8, %v3004_v39 }
 0x59a   : > { %v3523_v34 = vsel %vm3493_vm7, %v3490_v50, %v3100_v22 }
 0x59b   : > { %v3288_v33 = vpop.permute.xlu1 %3287  ;;  %v3556_v3 = vsel %vm3526_vm8, %v3523_v34, %v3196_v30  ;;  %v3292_v48 = vpop.permute.xlu0 %3291 }
 0x59c   : > { %v3587_v47 = vsel %vm10136_vm9, %v3554_v55, %v3288_v33  ;;  %v3589_v38 = vsel %vm10136_vm9, %v3556_v3, %v3292_v48 }
 0x59d   : > { %5375 = vmatmul.mubr.msk.f32.gmra.mxu1 %vm10123_vm10, %v3587_v47 }
 0x59f   : > { %v3098_v6 = vpop.permute.xlu1 %3097 }
 0x5a0   : > { %v3522_v14 = vsel %vm3493_vm7, %v3489_v21, %v3098_v6 }
 0x5a3   : > { %v3194_v1 = vpop.permute.xlu1 %3193 }
 0x5a4   : > { %v3555_v39 = vsel %vm3526_vm8, %v3522_v14, %v3194_v1 }
 0x5a7   : > { %v3290_v26 = vpop.permute.xlu1 %3289 }
 0x5a8   : > { %v3588_v60 = vsel %vm10136_vm9, %v3555_v39, %v3290_v26 }
 0x5a9   : > { %5377 = vmatprep.mubr.msk.f32.mxu1 %vm10123_vm10, %v3588_v60 }
 0x5aa   : > { %5378 = vmatmul.mubr.msk.f32.gmra.mxu1 %vm10123_vm10, %v3589_v38 }
 0x5b6   : > { %v5361_v56 = vpop.f32.mrf.mxu1 }
 0x5b7   : > { %v3839_v20 = vadd.f32 %v5361_v56, %v8866_v11 }
 0x5b8   : > { %v3833_v45 = vpop.f32.mrf.mxu1 }
 0x5b9   : > { %v3834_v0 = vadd.f32 %v8866_v11, %v3833_v45  ;;  %v3913_v43 = vmax.f32 %v3839_v20, 0.0 }
 0x5bb   : > { %v3912_v37 = vmax.f32 %v3834_v0, 0.0  ;;  %v4025_v32 = vrot.slane %v3913_v43, 4  ;;  %v4027_v33 = vrot.slane %v3913_v43, 5  ;;  %v4029_v47 = vrot.slane %v3913_v43, 6 }
 0x5bc   : > { %v4031_v44 = vrot.slane %v3913_v43, 7 }
 0x5bd   : > { %v4018_v10 = vrot.slane %v3912_v37, 1  ;;  %v4020_v15 = vrot.slane %v3912_v37, 2  ;;  %v4022_v13 = vrot.slane %v3912_v37, 3 }
 0x5bf   : > { %v4049_v22 = vsel %vm10253_vm1, %v3912_v37, %v4018_v10 }
 0x5c0   : > { %v4050_v55 = vsel %vm10254_vm14, %v4049_v22, %v4020_v15  ;;  %vm10257_vm14 = vcmp.eq.s32.totalorder %v7456_v51, 1 }
 0x5c1   : > { %v4051_v49 = vsel %vm3954_vm12, %v4050_v55, %v4022_v13 }
 0x5c2   : > { %v4052_v8 = vsel %vm3956_vm2, %v4051_v49, %v4025_v32 }
 0x5c3   : > { %v4053_v6 = vsel %vm3958_vm15, %v4052_v8, %v4027_v33 }
 0x5c4   : > { %v4054_v50 = vsel %vm10255_vm0, %v4053_v6, %v4029_v47  ;;  %vm10258_vm0 = vmmov %vm10253_vm1 }
 0x5c5   : > { %v9423_v30 = vsel %vm10256_vm13, %v4054_v50, %v4031_v44  ;;  %vm10259_vm13 = vcmask 1041408  }
 0x5c6   : > { %v4136_v57 = vrot.slane %v9423_v30, 7 }
 0x5c8   : > { %v9431_v16 = vsel %vm10253_vm1, %v4134_v18, %v4136_v57  ;;  %vm10260_vm1 = vcmask 1045504  }
 0x5c9   : > { %v9437_v34 = vsel %vm10257_vm14, %v9354_v2, %v9431_v16  ;;  %vm10261_vm14 = vcmask 1046528  }
 0x5d6   : > { %v5364_v1 = vpop.f32.mrf.mxu1 }
 0x5d8   : > { %v3843_v31 = vpop.f32.mrf.mxu1 }
 0x5f6   : > { %v5367_v21 = vpop.f32.mrf.mxu1 }
 0x5f7   : > { %v3857_v48 = vadd.f32 %v5367_v21, %v8866_v11 }
 0x5f8   : > { %v3851_v3 = vpop.f32.mrf.mxu1 }
 0x5f9   : > { %v3852_v14 = vadd.f32 %v8866_v11, %v3851_v3  ;;  %v3915_v26 = vmax.f32 %v3857_v48, 0.0 }
 0x5fb   : > { %v3914_v39 = vmax.f32 %v3852_v14, 0.0  ;;  %v4041_v45 = vrot.slane %v3915_v26, 4  ;;  %v4043_v2 = vrot.slane %v3915_v26, 5  ;;  %v4045_v37 = vrot.slane %v3915_v26, 6 }
 0x5fc   : > { %v4047_v10 = vrot.slane %v3915_v26, 7 }
 0x5fd   : > { %v4034_v60 = vrot.slane %v3914_v39, 1  ;;  %v4036_v38 = vrot.slane %v3914_v39, 2  ;;  %v4038_v18 = vrot.slane %v3914_v39, 3 }
 0x5ff   : > { %v4056_v56 = vsel %vm10258_vm0, %v3914_v39, %v4034_v60 }
 0x600   : > { %v4057_v20 = vsel %vm10259_vm13, %v4056_v56, %v4036_v38 }
 0x601   : > { %v4058_v0 = vsel %vm3954_vm12, %v4057_v20, %v4038_v18  ;;  %v5510_v18 = vld [vmem:[%s10034_s7] ss:$0 sm:$0xff] }
 0x602   : > { %v4059_v43 = vsel %vm3956_vm2, %v4058_v0, %v4041_v45 }
 0x603   : > { %v4060_v15 = vsel %vm3958_vm15, %v4059_v43, %v4043_v2 }
 0x604   : > { %v4061_v13 = vsel %vm10260_vm1, %v4060_v15, %v4045_v37  ;;  %vm10262_vm1 = vmmov %vm10258_vm0 }
 0x605   : > { %v9448_v22 = vsel %vm10261_vm14, %v4061_v13, %v4047_v10  ;;  %vm10263_vm14 = vmmov %vm10259_vm13 }
 0x616   : > { %v5370_v32 = vpop.f32.mrf.mxu1 }
 0x618   : > { %v3861_v55 = vpop.f32.mrf.mxu1 }
 0x636   : > { %v5373_v33 = vpop.f32.mrf.mxu1 }
 0x637   : > { %v3875_v1 = vadd.f32 %v5373_v33, %v8866_v11 }
 0x638   : > { %v3869_v49 = vpop.f32.mrf.mxu1 }
 0x639   : > { %v3870_v47 = vadd.f32 %v8866_v11, %v3869_v49  ;;  %v3917_v3 = vmax.f32 %v3875_v1, 0.0 }
 0x63b   : > { %v3916_v44 = vmax.f32 %v3870_v47, 0.0  ;;  %v4071_v38 = vrot.slane %v3917_v3, 4  ;;  %v4073_v20 = vrot.slane %v3917_v3, 5  ;;  %v4075_v15 = vrot.slane %v3917_v3, 6 }
 0x63c   : > { %v4077_v47 = vrot.slane %v3917_v3, 7 }
 0x63d   : > { %v4064_v50 = vrot.slane %v3916_v44, 1  ;;  %v4066_v31 = vrot.slane %v3916_v44, 2  ;;  %v4068_v14 = vrot.slane %v3916_v44, 3 }
 0x63f   : > { %v4095_v21 = vsel %vm10258_vm0, %v3916_v44, %v4064_v50  ;;  %vm10264_vm0 = vcmask 1045504  }
 0x640   : > { %v4096_v48 = vsel %vm10259_vm13, %v4095_v21, %v4066_v31  ;;  %vm10265_vm13 = vcmask 1046528   ;;  %vm10266_vm10 = vmmov %vm10264_vm0 }
 0x641   : > { %v4097_v26 = vsel %vm3954_vm12, %v4096_v48, %v4068_v14 }
 0x642   : > { %v4098_v11 = vsel %vm3956_vm2, %v4097_v26, %v4071_v38 }
 0x643   : > { %v4099_v37 = vsel %vm3958_vm15, %v4098_v11, %v4073_v20  ;;  %v4117_v11 = vld [vmem:[%s10030_s3 + $0x40] sm:$0xff]  ;;  %v4138_v20 = vrot.slane %v9448_v22, 7 }
 0x644   : > { %v4100_v49 = vsel %vm10264_vm0, %v4099_v37, %v4075_v15  ;;  %vm10268_vm0 = vmmov %vm10263_vm14  ;;  %5383 = vmatprep.subr.mxu0 %v4117_v11  ;;  %v4171_v15 = vrot.slane %v9448_v22, 6 }
 0x645   : > { %v9467_v21 = vsel %vm10265_vm13, %v4100_v49, %v4077_v47  ;;  %5384 = vmatpush3.msra.mxu0 %v4117_v11  ;;  %v4112_v49 = vld [vmem:[%s10030_s3 + $0x18] sm:$0xff] }
 0x646   : > { %v4173_v3 = vrot.slane %v9467_v21, 6 }
 0x65d   : > { %v5376_v8 = vpop.f32.mrf.mxu1 }
 0x65f   : > { %v3879_v6 = vpop.f32.mrf.mxu1 }
 0x66a   : > { %v5379_v39 = vpop.f32.mrf.mxu1 }
 0x66b   : > { %v3893_v56 = vadd.f32 %v5510_v18, %v5379_v39 }
 0x66c   : > { %v3887_v60 = vpop.f32.mrf.mxu1 }
 0x66d   : > { %v3888_v45 = vadd.f32 %v5510_v18, %v3887_v60  ;;  %v3919_v0 = vmax.f32 %v3893_v56, 0.0 }
 0x66f   : > { %v3918_v2 = vmax.f32 %v3888_v45, 0.0  ;;  %v4087_v55 = vrot.slane %v3919_v0, 4  ;;  %v4089_v8 = vrot.slane %v3919_v0, 5  ;;  %v4091_v6 = vrot.slane %v3919_v0, 6 }
 0x670   : > { %v4093_v1 = vrot.slane %v3919_v0, 7 }
 0x671   : > { %v4080_v43 = vrot.slane %v3918_v2, 1  ;;  %v4082_v10 = vrot.slane %v3918_v2, 2  ;;  %v4084_v13 = vrot.slane %v3918_v2, 3 }
 0x673   : > { %v4102_v32 = vsel %vm10262_vm1, %v3918_v2, %v4080_v43  ;;  %vm10267_vm1 = vmmov %vm10265_vm13  ;;  %vm10269_vm13 = vcmask 1040384   ;;  %v4116_v2 = vld [vmem:[%s10030_s3 + $0x38] sm:$0xff]  ;;  %v4115_v43 = vld [vmem:[%s10030_s3 + $0x30] sm:$0xff] }
 0x674   : > { %v4103_v33 = vsel %vm10263_vm14, %v4102_v32, %v4082_v10  ;;  %5385 = vmatprep.subr.mxu0 %v4116_v2  ;;  %v4114_v10 = vld [vmem:[%s10030_s3 + $0x28] sm:$0xff]  ;;  %v4113_v32 = vld [vmem:[%s10030_s3 + $0x20] sm:$0xff] }
 0x675   : > { %v4104_v44 = vsel %vm3954_vm12, %v4103_v33, %v4084_v13  ;;  %5386 = vmatpush3.msra.mxu0 %v4116_v2  ;;  %v4169_v13 = vrot.slane %v9423_v30, 6 }
 0x676   : > { %v4105_v50 = vsel %vm3956_vm2, %v4104_v44, %v4087_v55  ;;  %5387 = vmatprep.subr.mxu0 %v4115_v43 }
 0x677   : > { %v4106_v31 = vsel %vm3958_vm15, %v4105_v50, %v4089_v8  ;;  %5388 = vmatpush3.msra.mxu0 %v4115_v43  ;;  %v4111_v8 = vld [vmem:[%s10030_s3 + $0x10] sm:$0xff] }
 0x678   : > { %v4107_v48 = vsel %vm10266_vm10, %v4106_v31, %v4091_v6  ;;  %vm10270_vm10 = vcmp.eq.s32.totalorder %v7494_v12, 1  ;;  %5389 = vmatprep.subr.mxu0 %v4114_v10  ;;  %v4109_v6 = vld [vmem:[%s10030_s3] sm:$0xff] }
 0x679   : > { %v9471_v14 = vsel %vm10267_vm1, %v4107_v48, %v4093_v1  ;;  %vm10271_vm1 = vcmp.eq.s32.totalorder %v7456_v51, 1  ;;  %5390 = vmatpush3.msra.mxu0 %v4114_v10 }
 0x67a   : > { %v4160_v39 = vrot.slane %v9471_v14, 6  ;;  %v4120_v26 = vrot.slane %v9471_v14, 7  ;;  %5391 = vmatprep.subr.mxu0 %v4113_v32 }
 0x67b   : > { %5392 = vmatpush3.msra.mxu0 %v4113_v32 }
 0x67c   : > { %v4175_v60 = vsel %vm10263_vm14, %v4173_v3, %v4160_v39  ;;  %v4184_v38 = vsel %vm10268_vm0, %v4160_v39, %v4162_v35  ;;  %v4151_v18 = vsel %vm10269_vm13, %v4120_v26, %v4129_v53  ;;  %vm10272_vm14 = vmmov %vm10270_vm10  ;;  %v4140_v53 = vrot.slane %v9467_v21, 7  ;;  %5393 = vmatprep.subr.mxu0 %v4112_v49 }
 0x67d   : > { %v9485_v56 = vsel %vm10270_vm10, %v4175_v60, %v4184_v38  ;;  %v9490_v45 = vsel %vm10271_vm1, %v4151_v18, %v9237_v4  ;;  %v9499_v35 = vsel %vm10272_vm14, %v4184_v38, %v9267_v46  ;;  %vm10273_vm0 = vmmov %vm10269_vm13  ;;  %vm10276_vm14 = vcmask 1041408   ;;  %5394 = vmatpush3.msra.mxu0 %v4112_v49 }
 0x67e   : > { %4305 = vrot.lane.b32.xlu0 %v9485_v56, %s10214_s13  ;;  %4201 = vrot.lane.b32.xlu1 %v9490_v45, %s10213_s16  ;;  %v4142_v4 = vsel %vm10273_vm0, %v4140_v53, %v4120_v26  ;;  %vm10274_vm13 = vmmov %vm10271_vm1  ;;  %v4174_v55 = vsel %vm10276_vm14, %v4171_v15, %v4173_v3 }
 0x67f   : > { %v9513_v46 = vsel %vm10274_vm13, %v4142_v4, %v4151_v18  ;;  %vm10275_vm10 = vmmov %vm10273_vm0  ;;  %vm10277_vm0 = vcmp.eq.s32.totalorder %v7494_v12, 1  ;;  %5395 = vmatprep.subr.mxu0 %v4111_v8 }
 0x680   : > { %v4141_v0 = vsel %vm10275_vm10, %v4138_v20, %v4140_v53  ;;  %v4191_v33 = vsel %vm10277_vm0, %v4174_v55, %v4175_v60  ;;  %vm10278_vm13 = vmmov %vm10276_vm14  ;;  %5396 = vmatpush3.msra.mxu0 %v4111_v8 }
 0x681   : > { %v9529_v37 = vsel %vm10271_vm1, %v4141_v0, %v4142_v4  ;;  %v4170_v47 = vsel %vm10278_vm13, %v4167_v52, %v4169_v13  ;;  %vm10279_vm10 = vmmov %vm10277_vm0  ;;  %v4110_v52 = vld [vmem:[%s10030_s3 + $0x8] sm:$0xff] }
 0x682   : > { %4237 = vrot.lane.b32.xlu0 %v9373_v63, %s10126_s14  ;;  %4233 = vrot.lane.b32.xlu1 %v9499_v35, %s10126_s14  ;;  %v9568_v44 = vsel %vm10279_vm10, %v9361_v28, %v4170_v47  ;;  %s10280_s14 = smov 16   ;;  %vm10282_vm1 = vmmov %vm10278_vm13  ;;  %vm10287_vm13 = vcmp.eq.s32.totalorder %v7456_v51, 1  ;;  %v9652_v51 = vpop.permute.xlu0 %4203 }
 0x683   : > { %5397 = vmatprep.subr.mxu0 %v4110_v52  ;;  %v4172_v28 = vsel %vm10282_vm1, %v4169_v13, %v4171_v15  ;;  %vm10283_vm14 = vmmov %vm10277_vm0  ;;  %vm10286_vm0 = vcmask 1040384  }
 0x684   : > { %5398 = vmatpush3.msra.mxu0 %v4110_v52  ;;  %v9587_v50 = vsel %vm10283_vm14, %v4170_v47, %v4172_v28  ;;  %v4139_v1 = vsel %vm10286_vm0, %v4136_v57, %v4138_v20  ;;  %vm10288_vm10 = vmmov %vm10287_vm13  ;;  %v10295_v47 = vld [vmem:[#allocation24_spill] sm:$0xff] }
 0x685   : > { %5399 = vmatprep.subr.mxu0 %v4109_v6  ;;  %v4156_v31 = vsel %vm10287_vm13, %v9431_v16, %v4139_v1  ;;  %v4157_v48 = vsel %vm10288_vm10, %v4139_v1, %v4141_v0  ;;  %vm10289_vm1 = vmmov %vm10283_vm14  ;;  %vm10292_vm13 = vcmask 1045504  }
 0x686   : > { %4329 = vrot.lane.b32.xlu0 %v9467_v21, %s10124_s30  ;;  %4257 = vrot.lane.b32.xlu1 %v9471_v14, %s10130_s15  ;;  %s10285_s30 = smov 56   ;;  %v4190_v57 = vsel %vm10289_vm1, %v4172_v28, %v4174_v55  ;;  %v9657_v12 = vpop.permute.xlu0 %4235 }
 0x687   : > { %5400 = vmatpush3.msra.mxu0 %v4109_v6  ;;  %v10296_v6 = vld [vmem:[#allocation23_spill] sm:$0xff] }
 0x68a   : > { %4261 = vrot.lane.b32.xlu0 %v9217_v5, %s10130_s15  ;;  %4281 = vrot.lane.b32.xlu1 %v9513_v46, %s10132_s25  ;;  %s10281_s15 = smov 48  }
 0x68e   : > { %4283 = vrot.lane.b32.xlu1 %v9490_v45, %s10132_s25  ;;  %4353 = vrot.lane.b32.xlu0 %v9529_v37, %s10128_s29  ;;  %s10284_s29 = smov 24  }
 0x692   : > { %4207 = vrot.lane.b32.xlu1 %v9437_v34, %s10213_s16  ;;  %4285 = vrot.lane.b32.xlu0 %v9249_v19, %s10132_s25 }
 0x696   : > { %4307 = vrot.lane.b32.xlu1 %v9499_v35, %s10214_s13  ;;  %4377 = vrot.lane.b32.xlu0 %v4191_v33, %s10134_s12 }
 0x69a   : > { %4239 = vrot.lane.b32.xlu1 %v9568_v44, %s10280_s14  ;;  %4287 = vrot.lane.b32.xlu0 %v9367_v54, %s10132_s25 }
 0x69e   : > { %4331 = vrot.lane.b32.xlu1 %v9471_v14, %s10281_s15  ;;  %4379 = vrot.lane.b32.xlu0 %v9485_v56, %s10134_s12 }
 0x6a2   : > { %4263 = vrot.lane.b32.xlu1 %v9226_v62, %s10284_s29  ;;  %4241 = vrot.lane.b32.xlu0 %v9587_v50, %s10280_s14 }
 0x6a6   : > { %4355 = vrot.lane.b32.xlu1 %v9513_v46, %s10285_s30  ;;  %4333 = vrot.lane.b32.xlu0 %v8933_v23, %s10281_s15 }
 0x6aa   : > { %4209 = vrot.lane.b32.xlu1 %v4156_v31, %s10213_s16  ;;  %4265 = vrot.lane.b32.xlu0 %v9342_v41, %s10284_s29 }
 0x6ae   : > { %4309 = vrot.lane.b32.xlu1 %v9275_v61, %s10214_s13  ;;  %4357 = vrot.lane.b32.xlu0 %v9490_v45, %s10285_s30 }
 0x6b2   : > { %4211 = vrot.lane.b32.xlu1 %v4157_v48, %s10213_s16  ;;  %4289 = vrot.lane.b32.xlu0 %v9437_v34, %s10132_s25 }
 0x6b6   : > { %4311 = vrot.lane.b32.xlu1 %v9373_v63, %s10214_s13  ;;  %4381 = vrot.lane.b32.xlu0 %v9499_v35, %s10134_s12  ;;  %v10293_v35 = vld [vmem:[#allocation25_spill] sm:$0xff] }
 0x6ba   : > { %4243 = vrot.lane.b32.xlu1 %v4190_v57, %s10280_s14  ;;  %4291 = vrot.lane.b32.xlu0 %v4156_v31, %s10132_s25 }
 0x6be   : > { %4335 = vrot.lane.b32.xlu1 %v9217_v5, %s10281_s15  ;;  %4383 = vrot.lane.b32.xlu0 %v9275_v61, %s10134_s12 }
 0x6c2   : > { %4267 = vrot.lane.b32.xlu1 %v9423_v30, %s10284_s29  ;;  %4245 = vrot.lane.b32.xlu0 %v4191_v33, %s10280_s14 }
 0x6c6   : > { %4359 = vrot.lane.b32.xlu1 %v9249_v19, %s10285_s30  ;;  %4337 = vrot.lane.b32.xlu0 %v9226_v62, %s10281_s15  ;;  %v10290_v19 = vld [vmem:[#allocation5_spill] sm:$0xff] }
 0x6c7   : > { %v4635_v61 = vrot.slane %v10290_v19, 2 }
 0x6c9   : > { %vm4650_vm14 = vcmp.ge.s32.totalorder %v4635_v61, 1  ;;  %vm4673_vm0 = vcmp.ge.s32.totalorder %v4635_v61, 2 }
 0x6ca   : > { %4213 = vrot.lane.b32.xlu1 %v9529_v37, %s10213_s16  ;;  %4269 = vrot.lane.b32.xlu0 %v9448_v22, %s10284_s29 }
 0x6ce   : > { %4313 = vrot.lane.b32.xlu1 %v9568_v44, %s10214_s13  ;;  %4361 = vrot.lane.b32.xlu0 %v9367_v54, %s10285_s30  ;;  %v9667_v54 = vpop.permute.xlu0 %4259 }
 0x6d2   : > { %4215 = vrot.lane.b32.xlu1 %v9513_v46, %s10213_s16  ;;  %4293 = vrot.lane.b32.xlu0 %v4157_v48, %s10132_s25  ;;  %v9673_v39 = vpop.permute.xlu0 %4205  ;;  %v10294_v46 = vld [vmem:[#allocation28_spill] sm:$0xff] }
 0x6d6   : > { %4315 = vrot.lane.b32.xlu1 %v9587_v50, %s10214_s13  ;;  %4385 = vrot.lane.b32.xlu0 %v9373_v63, %s10134_s12  ;;  %v10291_v63 = vmov 0  }
 0x6d7   : > { %v4652_v16 = vsel %vm4650_vm14, 1, %v10291_v63  ;;  %v4675_v3 = vsel %vm4673_vm0, 1, %v10291_v63  ;;  %vm10297_vm14 = vcmask 588800  }
 0x6d8   : > { %vm10298_vm0 = vmmov %vm10297_vm14 }
 0x6da   : > { %4247 = vrot.lane.b32.xlu1 %v9485_v56, %s10280_s14  ;;  %4317 = vrot.lane.b32.xlu0 %v4190_v57, %s10214_s13 }
 0x6de   : > { %4339 = vrot.lane.b32.xlu1 %v9342_v41, %s10281_s15  ;;  %4319 = vrot.lane.b32.xlu0 %v4191_v33, %s10214_s13 }
 0x6e2   : > { %4271 = vrot.lane.b32.xlu1 %v9467_v21, %s10284_s29  ;;  %4343 = vrot.lane.b32.xlu0 %v9448_v22, %s10281_s15 }
 0x6e6   : > { %4363 = vrot.lane.b32.xlu1 %v9437_v34, %s10285_s30  ;;  %4367 = vrot.lane.b32.xlu0 %v4157_v48, %s10285_s30  ;;  %v4634_v34 = vrot.slane %v10290_v19, 5 }
 0x6e8   : > { %v4636_v38 = vsel %vm3954_vm12, %v10290_v19, %v4634_v34 }
 0x6e9   : > { %v4637_v45 = vsel %vm10292_vm13, %v4636_v38, %v4635_v61  ;;  %vm10299_vm13 = vmmov %vm10298_vm0 }
 0x6ea   : > { %4295 = vrot.lane.b32.xlu1 %v9529_v37, %s10132_s25  ;;  %4391 = vrot.lane.b32.xlu0 %v4190_v57, %s10134_s12  ;;  %vm4649_vm10 = vcmp.ge.s32.totalorder %v4637_v45, 1  ;;  %vm4672_vm1 = vcmp.ge.s32.totalorder %v4637_v45, 2 }
 0x6eb   : > { %v4651_v11 = vsel %vm4649_vm10, 1, %v10291_v63  ;;  %v4674_v15 = vsel %vm4672_vm1, 1, %v10291_v63  ;;  %vm10300_vm10 = vmmov %vm10298_vm0 }
 0x6ec   : > { %vm10301_vm1 = vmmov %vm10298_vm0 }
 0x6ee   : > { %4387 = vrot.lane.b32.xlu1 %v9568_v44, %s10134_s12  ;;  %4657 = vperm.xlu0 %5497, %v4652_v16  }
 0x6f0   : > { %v4202_v26 = vpop.permute.xlu1 %4201  ;;  %v4306_v60 = vpop.permute.xlu0 %4305 }
 0x6f1   : > { %v4401_v20 = vsel %vm1781_vm11, %v8933_v23, %v4202_v26 }
 0x6f2   : > { %4341 = vrot.lane.b32.xlu1 %v9423_v30, %s10281_s15  ;;  %4680 = vperm.xlu0 %5497, %v4675_v3  }
 0x6f4   : > { %v4234_v18 = vpop.permute.xlu1 %4233  ;;  %v4238_v56 = vpop.permute.xlu0 %4237 }
 0x6f5   : > { %v4409_v37 = vsel %vm3361_vm3, %v4401_v20, %v4234_v18 }
 0x6f6   : > { %4365 = vrot.lane.b32.xlu1 %v4156_v31, %s10285_s30  ;;  %2591 = vrot.lane.b32.xlu0 %v10293_v35, %s10213_s16  ;;  %v4402_v31 = vsel %vm1781_vm11, %v9217_v5, %v9652_v51 }
 0x6f7   : > { %v4410_v48 = vsel %vm3361_vm3, %v4402_v31, %v9657_v12 }
 0x6f8   : > { %v4258_v53 = vpop.permute.xlu1 %4257  ;;  %v4330_v4 = vpop.permute.xlu0 %4329  ;;  %v4418_v61 = vsel %vm3394_vm5, %v4410_v48, %v9667_v54 }
 0x6f9   : > { %v4417_v43 = vsel %vm3394_vm5, %v4409_v37, %v4258_v53 }
 0x6fa   : > { %4389 = vrot.lane.b32.xlu1 %v9587_v50, %s10134_s12  ;;  %2719 = vrot.lane.b32.xlu0 %v10294_v46, %s10280_s14 }
 0x6fc   : > { %v4282_v2 = vpop.permute.xlu1 %4281  ;;  %v4262_v0 = vpop.permute.xlu0 %4261 }
 0x6fd   : > { %v4425_v10 = vsel %vm3427_vm4, %v4417_v43, %v4282_v2 }
 0x6fe   : > { %4654 = vperm.xlu1 %5498, %v4651_v11   ;;  %2815 = vrot.lane.b32.xlu0 %v10251_v24, %s10284_s29  ;;  %v4433_v55 = vsel %vm3460_vm6, %v4425_v10, %v4306_v60 }
 0x6ff   : > { %v4441_v49 = vsel %vm3493_vm7, %v4433_v55, %v4330_v4 }
 0x700   : > { %v4284_v13 = vpop.permute.xlu1 %4283  ;;  %v4354_v32 = vpop.permute.xlu0 %4353 }
 0x701   : > { %v4449_v24 = vsel %vm3526_vm8, %v4441_v49, %v4354_v32  ;;  %v4426_v63 = vsel %vm3427_vm4, %v4418_v61, %v4284_v13 }
 0x702   : > { %4677 = vperm.xlu1 %5498, %v4674_v15   ;;  %2911 = vrot.lane.b32.xlu0 %v10235_v25, %s10132_s25 }
 0x704   : > { %v4208_v23 = vpop.permute.xlu1 %4207  ;;  %v4286_v33 = vpop.permute.xlu0 %4285 }
 0x706   : > { %2589 = vrot.lane.b32.xlu1 %v10295_v47, %s10213_s16 }
 0x708   : > { %v4308_v8 = vpop.permute.xlu1 %4307  ;;  %v4378_v44 = vpop.permute.xlu0 %4377 }
 0x709   : > { %v4457_v52 = vsel %vm10136_vm9, %v4449_v24, %v4378_v44 }
 0x70a   : > { %2717 = vrot.lane.b32.xlu1 %v10296_v6, %s10280_s14  ;;  %5401 = vmatprep.mubr.msk.f32.mxu0 %vm10297_vm14, %v4457_v52  ;;  %vm10302_vm14 = vmmov %vm10298_vm0 }
 0x70c   : > { %v4240_v28 = vpop.permute.xlu1 %4239  ;;  %v4288_v25 = vpop.permute.xlu0 %4287 }
 0x70e   : > { %2813 = vrot.lane.b32.xlu1 %v10252_v9, %s10284_s29  ;;  %v4434_v9 = vsel %vm3460_vm6, %v4426_v63, %v4308_v8 }
 0x710   : > { %v4332_v50 = vpop.permute.xlu1 %4331  ;;  %v4380_v1 = vpop.permute.xlu0 %4379 }
 0x712   : > { %2909 = vrot.lane.b32.xlu1 %v10234_v59, %s10132_s25  ;;  %v4442_v59 = vsel %vm3493_vm7, %v4434_v9, %v4332_v50  ;;  %s10313_s25 = smov 32  }
 0x714   : > { %v4264_v57 = vpop.permute.xlu1 %4263  ;;  %v4242_v19 = vpop.permute.xlu0 %4241 }
 0x716   : > { %3005 = vrot.lane.b32.xlu1 %v10233_v27, %s10214_s13  ;;  %v4403_v27 = vsel %vm1781_vm11, %v9226_v62, %v9673_v39 }
 0x717   : > { %v4411_v3 = vsel %vm3361_vm3, %v4403_v27, %v4238_v56 }
 0x718   : > { %v4356_v16 = vpop.permute.xlu1 %4355  ;;  %v4334_v34 = vpop.permute.xlu0 %4333  ;;  %v4419_v26 = vsel %vm3394_vm5, %v4411_v3, %v4262_v0  ;;  %v4404_v0 = vsel %vm1781_vm11, %v9342_v41, %v4208_v23 }
 0x719   : > { %v4450_v5 = vsel %vm3526_vm8, %v4442_v59, %v4356_v16  ;;  %v4427_v18 = vsel %vm3427_vm4, %v4419_v26, %v4286_v33  ;;  %v4412_v37 = vsel %vm3361_vm3, %v4404_v0, %v4240_v28 }
 0x71a   : > { %v4458_v51 = vsel %vm10136_vm9, %v4450_v5, %v4380_v1  ;;  %3007 = vrot.lane.b32.xlu1 %v10236_v40, %s10214_s13  ;;  %v4420_v43 = vsel %vm3394_vm5, %v4412_v37, %v4264_v57 }
 0x71b   : > { %5402 = vmatmul.mubr.msk.f32.vlgmr.msra.gmra.mxu0 %vm10298_vm0, %v4458_v51  ;;  %v4428_v13 = vsel %vm3427_vm4, %v4420_v43, %v4288_v25 }
 0x71c   : > { %v4210_v12 = vpop.permute.xlu1 %4209  ;;  %v4266_v54 = vpop.permute.xlu0 %4265 }
 0x71d   : > { %v4405_v24 = vsel %vm1781_vm11, %v9423_v30, %v4210_v12 }
 0x71e   : > { %v4413_v44 = vsel %vm3361_vm3, %v4405_v24, %v4242_v19  ;;  %v4630_v24 = vld [vmem:[%s10031_s4 + $0x30] sm:$0xff] }
 0x71f   : > { %v4421_v52 = vsel %vm3394_vm5, %v4413_v44, %v4266_v54  ;;  %v5142_v44 = vld [vmem:[%s10035_s8] ss:$0 sm:$0xff] }
 0x720   : > { %v4310_v60 = vpop.permute.xlu1 %4309  ;;  %v4358_v38 = vpop.permute.xlu0 %4357 }
 0x721   : > { %v4435_v45 = vsel %vm3460_vm6, %v4427_v18, %v4310_v60 }
 0x722   : > { %v4443_v53 = vsel %vm3493_vm7, %v4435_v45, %v4334_v34 }
 0x723   : > { %v4451_v4 = vsel %vm3526_vm8, %v4443_v53, %v4358_v38 }
 0x724   : > { %v4212_v35 = vpop.permute.xlu1 %4211  ;;  %v4290_v40 = vpop.permute.xlu0 %4289 }
 0x725   : > { %v4429_v25 = vsel %vm3427_vm4, %v4421_v52, %v4290_v40  ;;  %v4406_v34 = vsel %vm1781_vm11, %v9448_v22, %v4212_v35 }
 0x728   : > { %v4312_v46 = vpop.permute.xlu1 %4311  ;;  %v4382_v11 = vpop.permute.xlu0 %4381 }
 0x729   : > { %v4459_v62 = vsel %vm10136_vm9, %v4451_v4, %v4382_v11  ;;  %v4436_v32 = vsel %vm3460_vm6, %v4428_v13, %v4312_v46 }
 0x72a   : > { %5404 = vmatprep.mubr.msk.f32.mxu0 %vm10299_vm13, %v4459_v62  ;;  %vm10303_vm13 = vmmov %vm10298_vm0 }
 0x72c   : > { %v4244_v39 = vpop.permute.xlu1 %4243  ;;  %v4292_v56 = vpop.permute.xlu0 %4291 }
 0x72d   : > { %v4414_v51 = vsel %vm3361_vm3, %v4406_v34, %v4244_v39 }
 0x730   : > { %v4336_v20 = vpop.permute.xlu1 %4335  ;;  %v4384_v2 = vpop.permute.xlu0 %4383 }
 0x731   : > { %v4444_v55 = vsel %vm3493_vm7, %v4436_v32, %v4336_v20 }
 0x734   : > { %v4268_v10 = vpop.permute.xlu1 %4267  ;;  %v4246_v15 = vpop.permute.xlu0 %4245 }
 0x735   : > { %v4422_v12 = vsel %vm3394_vm5, %v4414_v51, %v4268_v10  ;;  %v4629_v51 = vld [vmem:[%s10031_s4 + $0x28] sm:$0xff] }
 0x736   : > { %v4430_v3 = vsel %vm3427_vm4, %v4422_v12, %v4292_v56 }
 0x738   : > { %v4360_v33 = vpop.permute.xlu1 %4359  ;;  %v4338_v49 = vpop.permute.xlu0 %4337 }
 0x739   : > { %v4452_v47 = vsel %vm3526_vm8, %v4444_v55, %v4360_v33 }
 0x73a   : > { %v4460_v41 = vsel %vm10136_vm9, %v4452_v47, %v4384_v2  ;;  %v4631_v47 = vld [vmem:[%s10031_s4 + $0x38] sm:$0xff] }
 0x73b   : > { %5405 = vmatmul.mubr.msk.f32.gmra.mxu0 %vm10300_vm10, %v4460_v41  ;;  %vm10304_vm10 = vcmask 1040384  }
 0x73c   : > { %v4214_v23 = vpop.permute.xlu1 %4213  ;;  %v4270_v8 = vpop.permute.xlu0 %4269 }
 0x73d   : > { %v4407_v4 = vsel %vm1781_vm11, %v9467_v21, %v4214_v23 }
 0x73e   : > { %v4415_v11 = vsel %vm3361_vm3, %v4407_v4, %v4246_v15  ;;  %v4628_v4 = vld [vmem:[%s10031_s4 + $0x20] sm:$0xff] }
 0x73f   : > { %v4423_v56 = vsel %vm3394_vm5, %v4415_v11, %v4270_v8 }
 0x740   : > { %v4314_v6 = vpop.permute.xlu1 %4313  ;;  %v4362_v28 = vpop.permute.xlu0 %4361 }
 0x741   : > { %v4437_v50 = vsel %vm3460_vm6, %v4429_v25, %v4314_v6 }
 0x742   : > { %v4445_v30 = vsel %vm3493_vm7, %v4437_v50, %v4338_v49  ;;  %v4632_v49 = vld [vmem:[%s10031_s4 + $0x40] sm:$0xff] }
 0x743   : > { %v4453_v48 = vsel %vm3526_vm8, %v4445_v30, %v4362_v28  ;;  %5413 = vmatprep.subr.mxu1 %v4632_v49 }
 0x744   : > { %v4216_v1 = vpop.permute.xlu1 %4215  ;;  %v4294_v31 = vpop.permute.xlu0 %4293  ;;  %5414 = vmatpush3.msra.mxu1 %v4632_v49 }
 0x745   : > { %v4408_v60 = vsel %vm1781_vm11, %v9471_v14, %v4216_v1  ;;  %v4431_v0 = vsel %vm3427_vm4, %v4423_v56, %v4294_v31  ;;  %5415 = vmatprep.subr.mxu1 %v4631_v47 }
 0x746   : > { %5416 = vmatpush3.msra.mxu1 %v4631_v47 }
 0x747   : > { %5417 = vmatprep.subr.mxu1 %v4630_v24 }
 0x748   : > { %v4316_v57 = vpop.permute.xlu1 %4315  ;;  %v4386_v61 = vpop.permute.xlu0 %4385  ;;  %5418 = vmatpush3.msra.mxu1 %v4630_v24 }
 0x749   : > { %v4461_v63 = vsel %vm10136_vm9, %v4453_v48, %v4386_v61  ;;  %v4438_v26 = vsel %vm3460_vm6, %v4430_v3, %v4316_v57  ;;  %5419 = vmatprep.subr.mxu1 %v4629_v51 }
 0x74a   : > { %5407 = vmatprep.mubr.msk.f32.mxu0 %vm10301_vm1, %v4461_v63  ;;  %vm10305_vm1 = vcmask 1041408   ;;  %5420 = vmatpush3.msra.mxu1 %v4629_v51 }
 0x74b   : > { %5421 = vmatprep.subr.mxu1 %v4628_v4 }
 0x74c   : > { %v4248_v19 = vpop.permute.xlu1 %4247  ;;  %v4318_v16 = vpop.permute.xlu0 %4317  ;;  %5422 = vmatpush3.msra.mxu1 %v4628_v4 }
 0x74d   : > { %v4416_v18 = vsel %vm3361_vm3, %v4408_v60, %v4248_v19  ;;  %v4439_v37 = vsel %vm3460_vm6, %v4431_v0, %v4318_v16 }
 0x750   : > { %v4340_v9 = vpop.permute.xlu1 %4339  ;;  %v4320_v54 = vpop.permute.xlu0 %4319 }
 0x751   : > { %v4446_v38 = vsel %vm3493_vm7, %v4438_v26, %v4340_v9 }
 0x754   : > { %v4272_v59 = vpop.permute.xlu1 %4271  ;;  %v4344_v40 = vpop.permute.xlu0 %4343 }
 0x755   : > { %v4424_v35 = vsel %vm3394_vm5, %v4416_v18, %v4272_v59 }
 0x758   : > { %v4364_v5 = vpop.permute.xlu1 %4363  ;;  %v4368_v39 = vpop.permute.xlu0 %4367 }
 0x759   : > { %v4454_v22 = vsel %vm3526_vm8, %v4446_v38, %v4364_v5 }
 0x75c   : > { %v4296_v27 = vpop.permute.xlu1 %4295  ;;  %v4392_v15 = vpop.permute.xlu0 %4391 }
 0x75d   : > { %v4432_v46 = vsel %vm3427_vm4, %v4424_v35, %v4296_v27 }
 0x75e   : > { %v4440_v62 = vsel %vm3460_vm6, %v4432_v46, %v4320_v54 }
 0x75f   : > { %v4448_v20 = vsel %vm3493_vm7, %v4440_v62, %v4344_v40 }
 0x760   : > { %v4388_v45 = vpop.permute.xlu1 %4387  ;;  %v4456_v21 = vsel %vm3526_vm8, %v4448_v20, %v4368_v39 }
 0x761   : > { %v4462_v53 = vsel %vm10136_vm9, %v4454_v22, %v4388_v45  ;;  %v4464_v55 = vsel %vm10136_vm9, %v4456_v21, %v4392_v15 }
 0x762   : > { %5408 = vmatmul.mubr.msk.f32.gmra.mxu0 %vm10302_vm14, %v4462_v53  ;;  %vm10306_vm14 = vcmask 1045504  }
 0x764   : > { %v4342_v14 = vpop.permute.xlu1 %4341 }
 0x765   : > { %v4447_v43 = vsel %vm3493_vm7, %v4439_v37, %v4342_v14 }
 0x768   : > { %v4366_v2 = vpop.permute.xlu1 %4365 }
 0x769   : > { %v4455_v10 = vsel %vm3526_vm8, %v4447_v43, %v4366_v2  ;;  %v9815_v60 = vpop.permute.xlu0 %4657  ;;  %v4627_v43 = vld [vmem:[%s10031_s4 + $0x18] sm:$0xff] }
 0x76a   : > { %5423 = vmatprep.subr.mxu1 %v4627_v43 }
 0x76b   : > { %5424 = vmatpush3.msra.mxu1 %v4627_v43 }
 0x76c   : > { %v4390_v13 = vpop.permute.xlu1 %4389 }
 0x76d   : > { %v4463_v32 = vsel %vm10136_vm9, %v4455_v10, %v4390_v13  ;;  %v9855_v2 = vpop.permute.xlu0 %4680  ;;  %vm10310_vm9 = vcmask 1046528  }
 0x76e   : > { %5410 = vmatprep.mubr.msk.f32.mxu0 %vm10298_vm0, %v4463_v32  ;;  %vm10307_vm0 = vcmask 1046528  }
 0x76f   : > { %5411 = vmatmul.mubr.msk.f32.gmra.mxu0 %vm10303_vm13, %v4464_v55  ;;  %vm4660_vm13 = vcmp.eq.s32.totalorder %v9815_v60, 1 }
 0x779   : > { %v9821_v22 = vpop.permute.xlu1 %4654 }
 0x77d   : > { %v4678_v21 = vpop.permute.xlu1 %4677 }
 0x7db   : > { %v5403_v33 = vpop.f32.mrf.mxu0 }
 0x7dd   : > { %v4561_v41 = vpop.f32.mrf.mxu0 }
 0x7de   : > { %v4562_v52 = vadd.f32 %v5142_v44, %v4561_v41 }
 0x7e0   : > { %v4595_v25 = vmax.f32 %v4562_v52, 0.0 }
 0x7e2   : > { %v4599_v1 = vrot.slane %v4595_v25, 2  ;;  %v4601_v30 = vrot.slane %v4595_v25, 4 }
 0x7e4   : > { %v4617_v48 = vsel %vm10304_vm10, %v4595_v25, %v4599_v1 }
 0x7e5   : > { %v4618_v63 = vsel %vm10305_vm1, %v4617_v48, %v4601_v30  ;;  %vm10308_vm1 = vmmov %vm10306_vm14 }
 0x7fb   : > { %v5406_v23 = vpop.f32.mrf.mxu0 }
 0x7fc   : > { %v4575_v50 = vadd.f32 %v5406_v23, %v5142_v44 }
 0x7fd   : > { %v4570_v8 = vpop.f32.mrf.mxu0 }
 0x7fe   : > { %v4596_v31 = vmax.f32 %v4575_v50, 0.0  ;;  %v4624_v50 = vld [vmem:[%s10031_s4] sm:$0xff] }
 0x800   : > { %v4604_v57 = vrot.slane %v4596_v31, 5  ;;  %v4606_v19 = vrot.slane %v4596_v31, 7  ;;  %v4608_v12 = vrot.slane %v4596_v31, 1 }
 0x802   : > { %v4619_v9 = vsel %vm3954_vm12, %v4618_v63, %v4604_v57  ;;  %v2590_v63 = vpop.permute.xlu1 %2589 }
 0x803   : > { %v4620_v34 = vsel %vm3956_vm2, %v4619_v9, %v4606_v19 }
 0x804   : > { %v4621_v26 = vsel %vm3958_vm15, %v4620_v34, %v4608_v12 }
 0x806   : > { %v2718_v19 = vpop.permute.xlu1 %2717 }
 0x80a   : > { %v2814_v9 = vpop.permute.xlu1 %2813 }
 0x822   : > { %v5409_v6 = vpop.f32.mrf.mxu0 }
 0x824   : > { %v4579_v28 = vpop.f32.mrf.mxu0 }
 0x82f   : > { %v5412_v61 = vpop.f32.mrf.mxu0 }
 0x831   : > { %v4587_v59 = vpop.f32.mrf.mxu0 }
 0x832   : > { %v4588_v16 = vadd.f32 %v5142_v44, %v4587_v59  ;;  %v2592_v59 = vpop.permute.xlu0 %2591 }
 0x834   : > { %v4597_v5 = vmax.f32 %v4588_v16, 0.0  ;;  %v2910_v16 = vpop.permute.xlu1 %2909 }
 0x836   : > { %v4611_v54 = vrot.slane %v4597_v5, 2  ;;  %v4613_v27 = vrot.slane %v4597_v5, 4  ;;  %v9812_v3 = vrot.slane %v4597_v5, 6  ;;  %v2720_v34 = vpop.permute.xlu0 %2719 }
 0x838   : > { %v4622_v38 = vsel %vm10306_vm14, %v4621_v26, %v4611_v54  ;;  %v4643_v53 = vrot.slane %v9812_v3, 2  ;;  %vm4659_vm14 = vcmp.eq.s32.totalorder %v9821_v22, 1  ;;  %v4663_v56 = vrot.slane %v9812_v3, 7  ;;  %v3006_v5 = vpop.permute.xlu1 %3005 }
 0x839   : > { %v9819_v18 = vsel %vm10307_vm0, %v4622_v38, %v4613_v27  ;;  %v4669_v37 = vrot.slane %v9812_v3, 1  ;;  %v4686_v32 = vrot.slane %v9812_v3, 6  ;;  %v4700_v47 = vrot.slane %v9812_v3, 4 }
 0x83a   : > { %v9824_v45 = vrot.slane %v9819_v18, 7  ;;  %v9827_v35 = vrot.slane %v9819_v18, 1  ;;  %v9830_v40 = vrot.slane %v9819_v18, 2  ;;  %v4666_v20 = vrot.slane %v9819_v18, 6  ;;  %v2816_v51 = vpop.permute.xlu0 %2815 }
 0x83b   : > { %v4689_v55 = vrot.slane %v9819_v18, 5  ;;  %v4695_v33 = vrot.slane %v9819_v18, 4  ;;  %v4703_v24 = vrot.slane %v9819_v18, 3  ;;  %v4692_v23 = vrot.slane %v9812_v3, 5 }
 0x83c   : > { %v4662_v46 = vsel %vm4660_vm13, %v9824_v45, %v9827_v35  ;;  %v4641_v14 = vsel %vm10304_vm10, %v9812_v3, %v9824_v45  ;;  %v4644_v11 = vsel %vm10308_vm1, %v9830_v40, %v4643_v53  ;;  %v4664_v0 = vsel %vm10304_vm10, %v9824_v45, %v4663_v56  ;;  %v3008_v12 = vpop.permute.xlu1 %3007  ;;  %v10315_v53 = vld [vmem:[#allocation22_spill] sm:$0xff] }
 0x83d   : > { %4721 = vrot.lane.b32.xlu1 %v4662_v46, %s10213_s16  ;;  %v4648_v62 = vsel %vm10307_vm0, %v4644_v11, %v9827_v35  ;;  %vm4683_vm1 = vcmp.eq.s32.totalorder %v9855_v2, 1  ;;  %vm10309_vm0 = vcmask 1041408   ;;  %v4670_v13 = vsel %vm10310_vm9, %v9827_v35, %v4669_v37 }
 0x83e   : > { %v4661_v39 = vsel %vm4659_vm14, %v4641_v14, %v4648_v62  ;;  %v4668_v10 = vsel %vm10309_vm0, %v4664_v0, %v4666_v20  ;;  %vm4682_vm10 = vcmp.eq.s32.totalorder %v4678_v21, 1  ;;  %vm10311_vm9 = vmmov %vm10309_vm0  ;;  %v4701_v41 = vsel %vm3956_vm2, %v4695_v33, %v4700_v47  ;;  %v2912_v54 = vpop.permute.xlu0 %2911 }
 0x83f   : > { %4719 = vrot.lane.b32.xlu0 %v4661_v39, %s10213_s16  ;;  %v4684_v15 = vsel %vm4682_vm10, %v4668_v10, %v4670_v13  ;;  %v4687_v49 = vsel %vm10311_vm9, %v4666_v20, %v4686_v32  ;;  %v4693_v8 = vsel %vm3954_vm12, %v4689_v55, %v4692_v23  ;;  %v4705_v44 = vsel %vm3958_vm15, %v4701_v41, %v4703_v24 }
 0x840   : > { %v4697_v52 = vsel %vm3956_vm2, %v4693_v8, %v4695_v33  ;;  %v4708_v6 = vrot.slane %v9812_v3, 3  ;;  %v4706_v28 = vsel %vm4682_vm10, %v4705_v44, %v4668_v10  ;;  %vm10314_vm2 = vcmask 1045504  }
 0x841   : > { %3103 = vrot.lane.b32.xlu1 %v10237_v36, %s10281_s15  ;;  %v4685_v36 = vsel %vm4683_vm1, %v4666_v20, %v9819_v18  ;;  %v4699_v1 = vsel %vm4660_vm13, %v4695_v33, %v9824_v45  ;;  %v4713_v31 = vsel %vm4659_vm14, %v4648_v62, %v4697_v52  ;;  %v4707_v30 = vsel %vm4683_vm1, %v4703_v24, %v4666_v20 }
 0x842   : > { %v4709_v25 = vsel %vm3958_vm15, %v4703_v24, %v4708_v6  ;;  %v4715_v48 = vsel %vm4682_vm10, %v4670_v13, %v4705_v44  ;;  %v4714_v57 = vsel %vm4660_vm13, %v9827_v35, %v4695_v33  ;;  %v4716_v61 = vsel %vm4683_vm1, %v9819_v18, %v4703_v24 }
 0x843   : > { %3101 = vrot.lane.b32.xlu0 %v10222_v29, %s10281_s15  ;;  %v4626_v29 = vld [vmem:[%s10031_s4 + $0x10] sm:$0xff]  ;;  %v3359_v4 = vsel %vm1781_vm11, %v10315_v53, %v2590_v63  ;;  %vm10317_vm15 = vcmask 523264  }
 0x844   : > { %5425 = vmatprep.subr.mxu1 %v4626_v29  ;;  %v3392_v62 = vsel %vm3361_vm3, %v3359_v4, %v2718_v19  ;;  %vm10318_vm13 = vmmov %vm10317_vm15  ;;  %v5154_v4 = vld [vmem:[%s10037_s10] ss:$0 sm:$0xff] }
 0x845   : > { %4729 = vrot.lane.b32.xlu1 %v4685_v36, %s10280_s14  ;;  %5426 = vmatpush3.msra.mxu1 %v4626_v29  ;;  %v3425_v56 = vsel %vm3394_vm5, %v3392_v62, %v2814_v9  ;;  %vm10321_vm0 = vmmov %vm10318_vm13 }
 0x846   : > { %v3458_v0 = vsel %vm3427_vm4, %v3425_v56, %v2910_v16  ;;  %vm10323_vm9 = vmmov %vm10321_vm0 }
 0x847   : > { %4727 = vrot.lane.b32.xlu0 %v4684_v15, %s10280_s14  ;;  %v3491_v21 = vsel %vm3460_vm6, %v3458_v0, %v3006_v5  ;;  %v5151_v5 = vld [vmem:[%s10036_s9] ss:$0 sm:$0xff]  ;;  %s5156_s14 = sshll.u32 %s5674_s21, 4 }
 0x849   : > { %3199 = vrot.lane.b32.xlu1 %v10231_v58, %s10285_s30  ;;  %v4691_v58 = vsel %vm3954_vm12, %v4687_v49, %v4689_v55 }
 0x84b   : > { %3197 = vrot.lane.b32.xlu0 %v9019_v42, %s10285_s30  ;;  %v4625_v42 = vld [vmem:[%s10031_s4 + $0x8] sm:$0xff] }
 0x84c   : > { %5427 = vmatprep.subr.mxu1 %v4625_v42 }
 0x84d   : > { %4736 = vrot.lane.b32.xlu1 %v4689_v55, %s10284_s29  ;;  %5428 = vmatpush3.msra.mxu1 %v4625_v42 }
 0x84e   : > { %5429 = vmatprep.subr.mxu1 %v4624_v50 }
 0x84f   : > { %4734 = vrot.lane.b32.xlu0 %v4691_v58, %s10284_s29  ;;  %5430 = vmatpush3.msra.mxu1 %v4624_v50 }
 0x851   : > { %3295 = vrot.lane.b32.xlu1 %v10232_v17, %s10312_s1  ;;  %v4698_v17 = vsel %vm4659_vm14, %v4697_v52, %v4641_v14  ;;  %v10316_v14 = vld [vmem:[#allocation21_spill] sm:$0xff]  ;;  %vm10319_vm14 = vcmask 588800  }
 0x852   : > { %v3360_v11 = vsel %vm1781_vm11, %v10316_v14, %v2592_v59  ;;  %vm10320_vm1 = vmmov %vm10319_vm14  ;;  %v5590_v59 = vmov 0.0  }
 0x853   : > { %3293 = vrot.lane.b32.xlu0 %v9005_v7, %s10312_s1  ;;  %v4712_v7 = vsel %vm10314_vm2, %v4709_v25, %v9830_v40  ;;  %v3393_v39 = vsel %vm3361_vm3, %v3360_v11, %v2720_v34  ;;  %vm10322_vm10 = vmmov %vm10320_vm1  ;;  %5434 = vmatprep.subr.mxu0 %v5590_v59 }
 0x854   : > { %v3426_v2 = vsel %vm3394_vm5, %v3393_v39, %v2816_v51  ;;  %vm10324_vm2 = vmmov %vm10320_vm1 }
 0x855   : > { %4750 = vrot.lane.b32.xlu1 %v4706_v28, %s10214_s13  ;;  %v3459_v37 = vsel %vm3427_vm4, %v3426_v2, %v2912_v54 }
 0x856   : > { %v3492_v10 = vsel %vm3460_vm6, %v3459_v37, %v3008_v12 }
 0x857   : > { %4742 = vrot.lane.b32.xlu0 %v4698_v17, %s10313_s25 }
 0x859   : > { %4757 = vrot.lane.b32.xlu1 %v4712_v7, %s10281_s15 }
 0x85b   : > { %4744 = vrot.lane.b32.xlu0 %v4699_v1, %s10313_s25  ;;  %s5012_s25 = scalar_lea.hbm %s10038_s11, %s5156_s14 }
 0x85d   : > { %4765 = vrot.lane.b32.xlu1 %v4713_v31, %s10285_s30 }
 0x85f   : > { %4752 = vrot.lane.b32.xlu0 %v4707_v30, %s10214_s13 }
 0x861   : > { %4773 = vrot.lane.b32.xlu1 %v4715_v48, %s10312_s1 }
 0x863   : > { %4759 = vrot.lane.b32.xlu0 %v9830_v40, %s10281_s15  ;;  %s5002_s15 = scalar_lea.sflag [#allocation3], %s377_s24 }
 0x867   : > { %4767 = vrot.lane.b32.xlu0 %v4714_v57, %s10285_s30  ;;  %s5592_s30 = smov [#allocation2]  }
 0x868   : > { %s5515_s12 = sshll.u32 %s5592_s30, 4  ;;  %s5516_s12 = int_to_ptr.vmem [resolvable:$false] %s5515_s12 }
 0x869   : > { %s5517_s21 = scalar_lea.vmem %s5516_s12, 32 }
 0x86b   : > { %4775 = vrot.lane.b32.xlu0 %v4716_v61, %s10312_s1  ;;  %s5014_s1 = sshll.u32 %s378_s0, 4  ;;  %s5015_s1 = int_to_ptr.vmem [resolvable:$true] %s5014_s1 }
 0x86c   : > { %s5511_s13 = scalar_lea.vmem %s5015_s1, 16  ;;  %p5518_p0 = scmp.lt.s32.totalorder %s5015_s1, %s5516_s12 }
 0x86d   : > { %p5512_p11 = scmp.ne.s32.totalorder %s5015_s1, %s5511_s13  ;;  %p5519_p1 = scmp.lt.s32.totalorder %s5517_s21, %s5511_s13 }
 0x86f   : > { %p5513_p12 = pnand %p5512_p11, %p5691_p5  ;;  %p5520_p2 = por %p5519_p1, %p5518_p0 }
 0x871   : > { %p5514_p13 = pneg %p5513_p12 }
 0x873   : > { %p5521_p3 = pnand %p5520_p2, %p5514_p13 }
 0x8af   : > { %v4722_v27 = vpop.permute.xlu1 %4721 }
 0x8b0   : > { %v4780_v7 = vsel %vm1781_vm11, %v9812_v3, %v4722_v27  ;;  %v4895_v3 = vld [vmem:[%s10032_s5] sm:$0xff] }
 0x8b1   : > { %v4720_v26 = vpop.permute.xlu0 %4719  ;;  %5435 = vmatpush3.msra.mxu0 %v4895_v3 }
 0x8b2   : > { %v4779_v47 = vsel %vm1781_vm11, %v9819_v18, %v4720_v26 }
 0x8b3   : > { %v3104_v60 = vpop.permute.xlu1 %3103 }
 0x8b4   : > { %v3525_v36 = vsel %vm3493_vm7, %v3492_v10, %v3104_v60 }
 0x8b5   : > { %v3102_v38 = vpop.permute.xlu0 %3101 }
 0x8b6   : > { %v3524_v13 = vsel %vm3493_vm7, %v3491_v21, %v3102_v38 }
 0x8b7   : > { %v4730_v22 = vpop.permute.xlu1 %4729 }
 0x8b8   : > { %v4782_v1 = vsel %vm3361_vm3, %v4780_v7, %v4730_v22 }
 0x8b9   : > { %v4728_v45 = vpop.permute.xlu0 %4727 }
 0x8ba   : > { %v4781_v58 = vsel %vm3361_vm3, %v4779_v47, %v4728_v45  ;;  %vm5591_vm3 = vmmov 0  }
 0x8bb   : > { %v3200_v35 = vpop.permute.xlu1 %3199  ;;  %5436 = vmatprep.mubr.msk.f32.mxu0 %vm5591_vm3, %v5590_v59 }
 0x8bc   : > { %v3558_v32 = vsel %vm3526_vm8, %v3525_v36, %v3200_v35 }
 0x8bd   : > { %v3198_v40 = vpop.permute.xlu0 %3197 }
 0x8be   : > { %v3557_v15 = vsel %vm3526_vm8, %v3524_v13, %v3198_v40 }
 0x8bf   : > { %v4737_v46 = vpop.permute.xlu1 %4736 }
 0x8c0   : > { %v4784_v31 = vsel %vm3394_vm5, %v4782_v1, %v4737_v46 }
 0x8c1   : > { %v4735_v20 = vpop.permute.xlu0 %4734 }
 0x8c2   : > { %v4783_v41 = vsel %vm3394_vm5, %v4781_v58, %v4735_v20  ;;  %vm10326_vm5 = vcmask 1041408  }
 0x8c3   : > { %v3296_v43 = vpop.permute.xlu1 %3295 }
 0x8c4   : > { %v3591_v33 = vsel %vm10318_vm13, %v3558_v32, %v3296_v43 }
 0x8c5   : > { %v3294_v29 = vpop.permute.xlu0 %3293 }
 0x8c6   : > { %v3590_v55 = vsel %vm10317_vm15, %v3557_v15, %v3294_v29 }
 0x8c7   : > { %v4751_v49 = vpop.permute.xlu1 %4750  ;;  %5380 = vmatprep.mubr.msk.f32.mxu1 %vm10319_vm14, %v3590_v55 }
 0x8c8   : > { %5381 = vmatmul.mubr.msk.f32.gmra.mxu1 %vm10320_vm1, %v3591_v33 }
 0x8c9   : > { %v4743_v24 = vpop.permute.xlu0 %4742 }
 0x8ca   : > { %v4785_v8 = vsel %vm3427_vm4, %v4783_v41, %v4743_v24 }
 0x8cb   : > { %v4758_v23 = vpop.permute.xlu1 %4757  ;;  %v4787_v44 = vsel %vm3460_vm6, %v4785_v8, %v4751_v49 }
 0x8cc   : > { %v4789_v28 = vsel %vm3493_vm7, %v4787_v44, %v4758_v23 }
 0x8cd   : > { %v4745_v42 = vpop.permute.xlu0 %4744 }
 0x8ce   : > { %v4786_v48 = vsel %vm3427_vm4, %v4784_v31, %v4745_v42  ;;  %vm10325_vm4 = vcmask 1040384  }
 0x8cf   : > { %v4766_v52 = vpop.permute.xlu1 %4765 }
 0x8d0   : > { %v4791_v25 = vsel %vm3526_vm8, %v4789_v28, %v4766_v52 }
 0x8d1   : > { %v4753_v6 = vpop.permute.xlu0 %4752 }
 0x8d2   : > { %v4788_v57 = vsel %vm3460_vm6, %v4786_v48, %v4753_v6  ;;  %vm4976_vm6 = vcmask 76800  }
 0x8d3   : > { %v4774_v17 = vpop.permute.xlu1 %4773 }
 0x8d4   : > { %v4793_v18 = vsel %vm10321_vm0, %v4791_v25, %v4774_v17 }
 0x8d5   : > { %5431 = vmatprep.mubr.msk.f32.mxu1 %vm10322_vm10, %v4793_v18  ;;  %v4760_v50 = vpop.permute.xlu0 %4759 }
 0x8d6   : > { %v4790_v61 = vsel %vm3493_vm7, %v4788_v57, %v4760_v50  ;;  %vm4986_vm7 = vcmask 80896  }
 0x8d9   : > { %v4768_v30 = vpop.permute.xlu0 %4767 }
 0x8da   : > { %v4792_v63 = vsel %vm3526_vm8, %v4790_v61, %v4768_v30 }
 0x8dd   : > { %v4776_v19 = vpop.permute.xlu0 %4775 }
 0x8de   : > { %v4794_v9 = vsel %vm10323_vm9, %v4792_v63, %v4776_v19 }
 0x8df   : > { %5432 = vmatmul.mubr.msk.f32.vlgmr.msra.gmra.mxu1 %vm10324_vm2, %v4794_v9 }
 0x988   : > { %v5382_v16 = vpop.f32.mrf.mxu1 }
 0x98a   : > { %v3897_v34 = vpop.f32.mrf.mxu1 }
 0x99f   : > { %v5433_v51 = vpop.f32.mrf.mxu1 }
 0x9a0   : > { %v4879_v12 = vadd.f32 %v5433_v51, %v5151_v5 }
 0x9a1   : > { %v4873_v54 = vpop.f32.mrf.mxu1 }
 0x9a2   : > { %v4874_v27 = vadd.f32 %v5151_v5, %v4873_v54  ;;  %v4883_v26 = vmax.f32 %v4879_v12, 0.0 }
 0x9a4   : > { %v4882_v60 = vmax.f32 %v4874_v27, 0.0  ;;  %v4890_v45 = vrot.slane %v4883_v26, 5 }
 0x9a6   : > { %v4885_v38 = vrot.slane %v4882_v60, 1  ;;  %v4887_v22 = vrot.slane %v4882_v60, 4 }
 0x9a8   : > { %v4892_v35 = vsel %vm10325_vm4, %v4882_v60, %v4885_v38 }
 0x9a9   : > { %v4893_v40 = vsel %vm10326_vm5, %v4892_v35, %v4887_v22 }
 0x9aa   : > { %v4894_v53 = vsel %vm3954_vm12, %v4893_v40, %v4890_v45 }
 0x9ab   : > { %5437 = vmatmul.mubr.msk.f32.vlgmr.msra.gmra.mxu0 %vm1781_vm11, %v4894_v53  ;;  %vm4999_vm11 = vcmask 73728  }
 0xa6b   : > { %v4972_v46 = vpop.f32.mrf.mxu0 }
 0xa6c   : > { %v4973_v14 = vadd.f32 %v5154_v4, %v4972_v46 }
 0xa6d   : > { %v5438_v11 = vpop.f32.mrf.mxu0 }
 0xa6e   : > { %v4977_v62 = vsel %vm4976_vm6, %v4973_v14, 0.0 }
 0xa6f   : > { %v4978_v39 = vrot.slane %v4977_v62, 4 }
 0xa71   : > { %v4979_v56 = vadd.f32 %v4978_v39, %v4977_v62 }
 0xa73   : > { %v4980_v20 = vrot.slane %v4979_v56, 2 }
 0xa75   : > { %v4981_v2 = vadd.f32 %v4980_v20, %v4979_v56 }
 0xa77   : > { %v4982_v0 = vrot.slane %v4981_v2, 1 }
 0xa79   : > { %v4983_v37 = vadd.f32 %v4982_v0, %v4981_v2 }
 0xa7b   : > { %v4985_v21 = vmul.f32 0.25, %v4983_v37 }
 0xa7d   : > { %v4987_v43 = vsel %vm4986_vm7, %v4985_v21, -inf }
 0xa7e   : > { %4988 = vmax.xlane.f32.xlu1 %v4987_v43 }
 0xb07   : > { %v4989_v10 = vpop.xlane.xlu1 %4988 }
 0xb08   : > { %v4990_v13 = vsub.f32 %v4985_v21, %v4989_v10 }
 0xb0a   : > { %v4991_v36 = vmul.f32 1.442695, %v4990_v13 }
 0xb0c   : > { %5499 = vpow2.f32 %v4991_v36 }
 0xb19   : > { %v5500_v15 = vpop.eup %5499 }
 0xb1a   : > { %v4993_v29 = vsel %vm4986_vm7, %v5500_v15, 0.0 }
 0xb1b   : > { %4994 = vadd.xlane.f32.xlu0 %v4993_v29 }
 0xba4   : > { %v4995_v32 = vpop.xlane.xlu0 %4994 }
 0xba5   : > { %5501 = vlog2.f32 %v4995_v32 }
 0xbb2   : > { %v5502_v55 = vpop.eup %5501 }
 0xbb3   : > { %v4997_v33 = vmul.f32 0.6931472, %v5502_v55 }
 0xbb5   : > { %v4998_v49 = vsub.f32 %v4990_v13, %v4997_v33 }
 0xbb7   : > { %5000 = vst.msk [vmem:[%s378_s0] sm:$0x1] %vm4999_vm11, %v4998_v49 }
 0xbb8   : > { %5524 = shalt.err (!%p5521_p3)
}
 0xbb9   : > { %s5525_s22 = scalar_lea.hbm %s5012_s25, 16  ;;  %s5529_s14 = scalar_lea.hbm %s10038_s11, 32 }
 0xbba   : > { %p5526_p4 = scmp.ne.s32.totalorder %s5012_s25, %s5525_s22  ;;  %p5530_p9 = scmp.lt.s32.totalorder %s5012_s25, %s10038_s11 }
 0xbbb   : > { %p5531_p10 = scmp.lt.s32.totalorder %s5529_s14, %s5525_s22 }
 0xbbc   : > { %p5527_p7 = pnand %p5526_p4, %p5691_p5 }
 0xbbd   : > { %p5532_p11 = por %p5531_p10, %p5530_p9 }
 0xbbe   : > { %p5528_p8 = pneg %p5527_p7 }
 0xbc0   : > { %p5533_p12 = pnand %p5532_p11, %p5528_p8 }
 0xbc2   : > { %5536 = shalt.err (!%p5533_p12)
}
 0xbc3   : > { %5439 = dma.vmem_to_hbm [thread:$0]  (%p5691_p5), %s5015_s1, 16, %s5012_s25, %s5002_s15  }
 0xbc4 PF: > { %p5445_p13 = scmp.ge.s32.totalorder %s5571_s20, 2  ;;  %s5026_s2 = sand.u32 1, %s5559_s17  }
 0xbc5   : > { %s5027_s13 = scalar_lea.sflag [#allocation3], %s5026_s2 }
 0xbc6   : > { %p5442_p0 = pnand %p5445_p13, %p5695_p6 }
 0xbc8   : > { %p5443_p1 = pneg %p5442_p0 }
 0xbca   : > { %5554 = dma.done.wait (%p5443_p1), %s5027_s13, 16  }
 0xbcb   : > { %5556 = vsyncadd (%p5443_p1), %s5027_s13, 4294967280  ;;  %p21_p2 = scmp.ge.s32.totalorder %s5678_s23, 4   ;;  %s10327_s17 = smov %s5563_s18 }
 0xbcc   : > { %s10328_s18 = smov %s5567_s19  ;;  %s10329_s19 = smov %s5689_s26 }
 0xbcd   : > { %s10330_s20 = smov %s5678_s23  ;;  %23 = sbr.rel (!%p21_p2) target bundleno = 7 (0x7), region = 99 }
 0xbd2   :  { %5031 = vsyncpa [#allocation3], 1 }
 0xbd3   :  { %5033 = vsyncpa [#allocation3 + $0x1], 1 }

</bundles_post_ra>
